<compile_context>
chip_gen: v7x
topology: tpu7x:2x2x1
jax: 0.10.0
libtpu: 0.0.40
codegen_flags: <defaults>
</compile_context>

<pallas_src>
import functools
import math

import jax
import jax.numpy as jnp
from jax.experimental import pallas as pl
from jax.experimental.pallas import tpu as pltpu


_HALF_PI = math.pi / 2.0
# Taylor coefficients of cos(y) in t = y^2, accurate to <7e-9 on y in [0, pi/2].
_COS_COEFFS = (
    1.0,
    -1.0 / 2.0,
    1.0 / 24.0,
    -1.0 / 720.0,
    1.0 / 40320.0,
    -1.0 / 3628800.0,
    1.0 / 479001600.0,
)


def _round_up(x: int, m: int) -> int:
    return ((x + m - 1) // m) * m


def _cosine_envelope_kernel(d_ref, o_ref, *, cutoff, half_arg_scale):
    """Rank-agnostic elementwise body: works on 1-D or 2-D blocks."""
    d = d_ref[...].astype(jnp.float32)
    # envelope(d) = 0.5*(cos(pi*d/cutoff) + 1) = cos(pi*d/(2*cutoff))^2
    # Distances are >= 0; |.| keeps the (even) function exact for d in
    # (-cutoff, cutoff) too, and the clamp bounds the polynomial argument.
    y = jnp.minimum(jnp.abs(d * half_arg_scale), _HALF_PI)
    t = y * y
    c = _COS_COEFFS[-1]
    for coef in _COS_COEFFS[-2::-1]:   # unrolled Horner in t
        c = c * t + coef
    env = c * c
    # Exact zero at/beyond the cutoff, matching the PyTorch masked assignment.
    o_ref[...] = jnp.where(d >= cutoff, 0.0, env).astype(o_ref.dtype)


def _cosine_envelope_jnp(d, cutoff):
    """Plain-XLA path for tiny inputs (lets XLA fuse it with neighbors)."""
    d32 = d.astype(jnp.float32)
    env = 0.5 * (jnp.cos(d32 * (math.pi / cutoff)) + 1.0)
    return jnp.where(d32 >= cutoff, 0.0, env).astype(d.dtype)


def cosine_envelope(
    d: jax.Array,
    cutoff: float,
    *,
    lane_width: int = 512,            # multiple of 128 -> lane-dense 2-D slab
    row_tile: int = 512,              # (512, 512) f32 block = 1 MiB per buffer
    max_block_elems: int = 256 * 1024,  # 1 MiB f32 block for the 1-D path
    min_pallas_elems: int = 1 << 18,  # below this, fused XLA elementwise wins
) -> jax.Array:
    """Pallas implementation of CosineEnvelope.forward for arbitrary-shaped d."""
    cutoff = float(cutoff)
    orig_shape = d.shape
    total = int(math.prod(orig_shape)) if orig_shape else 1

    # Tiny inputs: a pallas_call is pure launch/pipeline overhead.
    use_pallas = total >= max(int(min_pallas_elems), 8 * lane_width)
    if not use_pallas:
        return _cosine_envelope_jnp(d, cutoff)

    kernel = functools.partial(
        _cosine_envelope_kernel,
        cutoff=cutoff,
        half_arg_scale=math.pi / (2.0 * cutoff),
    )

    flat = d.reshape(-1)  # contiguous reshape: no data movement

    if total % lane_width == 0:
        # Lane-dense 2-D slab, no padding needed.  Pick the row tile so the
        # grid has >= 2 steps (v7x TensorCore sharding) while capping the block
        # at ~1 MiB f32; the last block may be partial (Pallas masks it).
        rows = total // lane_width
        tile = min(row_tile, _round_up(pl.cdiv(rows, 2), 8))
        grid = (pl.cdiv(rows, tile),)
        x = flat.reshape(rows, lane_width)
        block_shape = (tile, lane_width)
        index_map = lambda i: (i, 0)
    else:
        # Ragged total: stream the flat 1-D array directly.  No pad copy on the
        # input, no un-pad slice on the output; the partial last block is
        # handled by Pallas' out-of-bounds masking.
        block_elems = min(max_block_elems, _round_up(pl.cdiv(total, 2), 1024))
        grid = (pl.cdiv(total, block_elems),)
        x = flat
        block_shape = (block_elems,)
        index_map = lambda i: (i,)

    out = pl.pallas_call(
        kernel,
        out_shape=jax.ShapeDtypeStruct(x.shape, d.dtype),
        grid_spec=pl.GridSpec(
            grid=grid,
            in_specs=[pl.BlockSpec(block_shape, index_map)],
            out_specs=pl.BlockSpec(block_shape, index_map),
        ),
        compiler_params=pltpu.CompilerParams(
            dimension_semantics=("parallel",),
        ),
    )(x)

    return out.reshape(orig_shape)  # contiguous reshape: no data movement


if __name__ == "__main__":
    cutoff = 5.0
    key = jax.random.PRNGKey(0)
    k1, k2, k3, k4 = jax.random.split(key, 4)

    def ref_fn(x):
        env = 0.5 * (jnp.cos(jnp.pi * x / cutoff) + 1.0)
        return jnp.where(x >= cutoff, 0.0, env).astype(x.dtype)

    # 1) Small PaiNN-style edge-distance tensor (num_edges, 1): tiny-input
    #    fast path (plain jnp, fused by XLA).
    d_small = jax.random.uniform(k1, (256, 1), jnp.float32) * 8.0
    out_small = jax.block_until_ready(cosine_envelope(d_small, cutoff))
    assert out_small.shape == d_small.shape and out_small.dtype == d_small.dtype
    assert jnp.allclose(out_small, ref_fn(d_small), atol=1e-5)

    # 2) Lane-width-divisible edge count (262144 = 512*512): zero-copy 2-D
    #    (rows, 512) Pallas path with a 2-step grid (>= 2 for v7x).
    d_div = jax.random.uniform(k2, (262144, 1), jnp.float32) * 8.0
    out_div = jax.block_until_ready(cosine_envelope(d_div, cutoff))
    assert out_div.shape == d_div.shape and out_div.dtype == d_div.dtype
    assert jnp.allclose(out_div, ref_fn(d_div), atol=1e-5)

    # 3) Ragged edge count (50_000 not a multiple of 512): zero-copy 1-D Pallas
    #    path with a partial (masked) last block.  Also pin exact boundary
    #    values: d=0 -> 1, d=cutoff -> 0, d=2*cutoff -> 0.
    d_rag = jax.random.uniform(k3, (50_000, 1), jnp.float32) * 8.0
    d_rag = d_rag.at[0, 0].set(0.0).at[1, 0].set(cutoff).at[2, 0].set(2.0 * cutoff)
    out_rag = jax.block_until_ready(
        cosine_envelope(d_rag, cutoff, min_pallas_elems=0)
    )
    assert out_rag.shape == d_rag.shape and out_rag.dtype == d_rag.dtype
    assert jnp.allclose(out_rag, ref_fn(d_rag), atol=1e-5)
    assert out_rag[0, 0] == 1.0 and out_rag[1, 0] == 0.0 and out_rag[2, 0] == 0.0

    # 4) Divisible total but rows not a multiple of the row tile
    #    (rows = 300, tile = 160): exercises the 2-D partial-last-block path.
    d_rt = jax.random.uniform(k4, (512 * 300, 1), jnp.float32) * 8.0
    out_rt = jax.block_until_ready(
        cosine_envelope(d_rt, cutoff, min_pallas_elems=0)
    )
    assert jnp.allclose(out_rt, ref_fn(d_rt), atol=1e-5)

    print("KERNEL_OK")
</pallas_src>

<mosaic_0001>
module attributes {stable_mosaic.version = 11 : i64} {
  func.func @_cosine_envelope_kernel(%arg0: i32, %arg1: memref<256x512xf32, #tpu.memory_space<vmem>>, %arg2: memref<256x512xf32, #tpu.memory_space<vmem>>) attributes {dimension_semantics = [#tpu.dimension_semantics<parallel>], iteration_bounds = array<i64: 2>, scalar_prefetch = 0 : i64, scratch_operands = 0 : i64, tpu.core_type = #tpu.core_type<tc>, window_params = [{transform_indices = @transform_0, window_bounds = array<i64: 256, 512>}, {transform_indices = @transform_1, window_bounds = array<i64: 256, 512>}]} {
    %c0 = arith.constant 0 : index
    %c0_0 = arith.constant 0 : index
    %0 = vector.load %arg1[%c0, %c0_0] : memref<256x512xf32, #tpu.memory_space<vmem>>, vector<256x512xf32>
    %cst = arith.constant 0.314159274 : f32
    %1 = vector.broadcast %cst : f32 to vector<256x512xf32>
    %2 = arith.mulf %0, %1 : vector<256x512xf32>
    %3 = math.absf %2 : vector<256x512xf32>
    %cst_1 = arith.constant 1.57079637 : f32
    %4 = vector.broadcast %cst_1 : f32 to vector<256x512xf32>
    %5 = arith.minimumf %3, %4 : vector<256x512xf32>
    %6 = arith.mulf %5, %5 : vector<256x512xf32>
    %cst_2 = arith.constant 2.08767559E-9 : f32
    %7 = vector.broadcast %cst_2 : f32 to vector<256x512xf32>
    %8 = arith.mulf %7, %6 : vector<256x512xf32>
    %cst_3 = arith.constant -2.755732E-7 : f32
    %9 = vector.broadcast %cst_3 : f32 to vector<256x512xf32>
    %10 = arith.addf %8, %9 : vector<256x512xf32>
    %11 = arith.mulf %10, %6 : vector<256x512xf32>
    %cst_4 = arith.constant 2.48015876E-5 : f32
    %12 = vector.broadcast %cst_4 : f32 to vector<256x512xf32>
    %13 = arith.addf %11, %12 : vector<256x512xf32>
    %14 = arith.mulf %13, %6 : vector<256x512xf32>
    %cst_5 = arith.constant -0.00138888892 : f32
    %15 = vector.broadcast %cst_5 : f32 to vector<256x512xf32>
    %16 = arith.addf %14, %15 : vector<256x512xf32>
    %17 = arith.mulf %16, %6 : vector<256x512xf32>
    %cst_6 = arith.constant 0.0416666679 : f32
    %18 = vector.broadcast %cst_6 : f32 to vector<256x512xf32>
    %19 = arith.addf %17, %18 : vector<256x512xf32>
    %20 = arith.mulf %19, %6 : vector<256x512xf32>
    %cst_7 = arith.constant -5.000000e-01 : f32
    %21 = vector.broadcast %cst_7 : f32 to vector<256x512xf32>
    %22 = arith.addf %20, %21 : vector<256x512xf32>
    %23 = arith.mulf %22, %6 : vector<256x512xf32>
    %cst_8 = arith.constant 1.000000e+00 : f32
    %24 = vector.broadcast %cst_8 : f32 to vector<256x512xf32>
    %25 = arith.addf %23, %24 : vector<256x512xf32>
    %26 = arith.mulf %25, %25 : vector<256x512xf32>
    %cst_9 = arith.constant 5.000000e+00 : f32
    %27 = vector.broadcast %cst_9 : f32 to vector<256x512xf32>
    %28 = arith.cmpf oge, %0, %27 : vector<256x512xf32>
    %cst_10 = arith.constant 0.000000e+00 : f32
    %29 = vector.broadcast %cst_10 : f32 to vector<256x512xf32>
    %30 = arith.select %28, %29, %26 : vector<256x512xi1>, vector<256x512xf32>
    %c0_11 = arith.constant 0 : index
    %c0_12 = arith.constant 0 : index
    %31 = vector.load %arg2[%c0_11, %c0_12] : memref<256x512xf32, #tpu.memory_space<vmem>>, vector<256x512xf32>
    tpu.vector_store %arg2[%c0_11, %c0_12], %30 {strides = array<i32>} : memref<256x512xf32, #tpu.memory_space<vmem>>, vector<256x512xf32>,
    return
  }
  func.func @transform_0(%arg0: i32) -> (i32, i32) {
    %c0_i32 = arith.constant 0 : i32
    %c0_i32_0 = arith.constant 0 : i32
    return %arg0, %c0_i32 : i32, i32
  }
  func.func @transform_1(%arg0: i32) -> (i32, i32) {
    %c0_i32 = arith.constant 0 : i32
    %c0_i32_0 = arith.constant 0 : i32
    return %arg0, %c0_i32 : i32, i32
  }
}

</mosaic_0001>

<bundles_post_ra>
// kernel: tpu_custom_call.1
= control target key start
LH: loop header
LB: loop body
LE: loop exit
PB: predicated region body
PF: predicated region fallthrough
CT: control target
= control target key end

     0   :  { %6 = vsyncpa [#allocation3], 0  ;;  %s5245_s0 = inlined_call_operand.hbm [shape: f32[512,512], index: 0, kind: input, shape index: {}]   ;;  %s5246_s1 = inlined_call_operand.hbm [shape: f32[512,512], index: 1, kind: output, shape index: {}]  }
   0x1   :  { %8 = vsyncpa [#allocation3 + $0x1], 0 }
   0x2   :  { %9 = vsyncpa [#allocation4], 0 }
   0x3   :  { %11 = vsyncpa [#allocation4 + $0x1], 0  ;;  %s3098_s6 = smov 0   ;;  %s3100_s7 = smov 0  }
   0x4   :  { %s3102_s8 = smov 0   ;;  %s3104_s9 = smov 0  }
   0x5 LB: > { %s3119_s10 = sadd.s32 4294967295, %s3080_s9   ;;  %s2914_s11 = sadd.s32 4294967294, %s3080_s9   ;;  %s3080_s9 = sphi %s3104_s9, %s5259_s9   ;;  %s3076_s8 = sphi %s3102_s8, %s5258_s8   ;;  %s3072_s7 = sphi %s3100_s7, %s5257_s7   ;;  %s3068_s6 = sphi %s3098_s6, %s5256_s6  }
   0x6   : > { %s3123_s12 = sadd.s32 1, %s3080_s9   ;;  %s24_s13 = sadd.s32 1, %s3076_s8 }
   0x7   : > { %s21_s14 = ssub.s32 %s3080_s9, %s3123_s12  ;;  %p31_p0 = scmp.ne.s32.totalorder %s3076_s8, %s3072_s7 }
   0x8   : > { %p22_p1 = scmp.eq.s32.totalorder %s21_s14, 0  ;;  %p32_p2 = scmp.eq.s32.totalorder %s3080_s9, 0 }
   0x9   : > { %p37_p3 = scmp.ne.s32.totalorder %s3072_s7, %s3068_s6  ;;  %p38_p4 = scmp.eq.s32.totalorder %s3119_s10, 0 }
   0xa   : > { %s3135_s15 = scalar_select %p22_p1, %s3076_s8, %s24_s13  }
   0xb   : > { %p3137_p5 = por %p32_p2, %p31_p0  ;;  %p3141_p6 = por %p38_p4, %p37_p3 }
   0xc   : > { %p61_p7 = scmp.eq.s32.totalorder %s3119_s10, 1  ;;  %p67_p8 = scmp.eq.s32.totalorder %s2914_s11, 1 }
   0xd   : > { %p2946_p10 = scmp.lt.s32.totalorder %s3080_s9, 2  ;;  %s87_s20 = sand.u32 1, %s3076_s8  }
   0xe   : > { %p3148_p11 = por %p61_p7, %p31_p0  ;;  %p3152_p12 = por %p67_p8, %p37_p3 }
   0xf   : > { %s2931_s21 = sshll.u32 %s3080_s9, 14  ;;  %s2917_s22 = sshll.u32 %s87_s20, 10 }
  0x10   : > { %s5250_s18 = scalar_select %p3148_p11, 1, 0 }
  0x11   : > { %s5251_s19 = scalar_select %p3152_p12, 1, 0 }
  0x12   : > { %s3161_s25 = scalar_lea.hbm %s5245_s0, %s2931_s21  ;;  %s91_s26 = scalar_lea.vmem [#allocation2], %s2917_s22 }
  0x13   : > { %s99_s27 = sshll.u32 %s91_s26, 4  ;;  %p3165_p13 = pnand %p2946_p10, %p3137_p5  ;;  %s3169_s27 = int_to_ptr.vmem [resolvable:$true] %s99_s27 }
  0x14   : > { %s3171_s29 = scalar_lea.sflag [#allocation3], %s87_s20  ;;  %s2984_s30 = scalar_lea.hbm %s3161_s25, 16384 }
  0x15   : > { %p2985_p0 = scmp.ne.s32.totalorder %s3161_s25, %s2984_s30  ;;  %p2986_p1 = pneg %p3165_p13 }
  0x16   : > { %s2989_s4 = scalar_lea.hbm %s5245_s0, 32768  ;;  %p2990_p4 = scmp.lt.u32.totalorder %s3161_s25, %s5245_s0 }
  0x17   : > { %p2987_p2 = pnand %p2986_p1, %p2985_p0  ;;  %p2991_p5 = scmp.lt.u32.totalorder %s2989_s4, %s2984_s30 }
  0x18   : > { %p2993_p8 = scmp.lt.u32.totalorder %s2984_s30, %s3161_s25 }
  0x19   : > { %p2988_p3 = pneg %p2987_p2  ;;  %p2992_p7 = por %p2991_p5, %p2990_p4 }
  0x1b   : > { %p2994_p10 = por %p2993_p8, %p2992_p7 }
  0x1d   : > { %p2995_p9 = pnand %p2994_p10, %p2988_p3 }
  0x1f   : > { %2998 = shalt.err (!%p2995_p9)
}
  0x20   : > { %s2999_s13 = scalar_lea.vmem %s3169_s27, 16384  ;;  %s3082_s14 = smov [#allocation2]  }
  0x21   : > { %p3000_p0 = scmp.ne.s32.totalorder %s3169_s27, %s2999_s13  ;;  %s3004_s16 = sshll.u32 %s3082_s14, 4  ;;  %s3005_s16 = int_to_ptr.vmem [resolvable:$false] %s3004_s16 }
  0x22   : > { %s3006_s20 = scalar_lea.vmem %s3005_s16, 32768  ;;  %p3007_p11 = scmp.lt.s32.totalorder %s3169_s27, %s3005_s16 }
  0x23   : > { %p3002_p2 = pnand %p3000_p0, %p2986_p1  ;;  %p3008_p4 = scmp.lt.s32.totalorder %s3006_s20, %s2999_s13 }
  0x25   : > { %p3003_p12 = pneg %p3002_p2  ;;  %p3009_p5 = por %p3008_p4, %p3007_p11 }
  0x27   : > { %p3010_p7 = pnand %p3009_p5, %p3003_p12 }
  0x29   : > { %3013 = shalt.err (!%p3010_p7)
}
  0x2a   : > { %s3083_s21 = smov 512   ;;  %s3084_s22 = smov 32  }
  0x2b   : > { %2941 = dma.hbm_to_vmem [thread:$0]  (!%p3165_p13), %s3161_s25, 16384, %s3169_s27, %s3171_s29, %s3083_s21, %s3083_s21, %s3084_s22  }
  0x2c   : > { %p2921_p9 = scmp.ge.s32.totalorder %s3080_s9, 1  ;;  %p107_p1 = scmp.lt.s32.totalorder %s3080_s9, 3 }
  0x2e   : > { %p108_p3 = pnand %p2921_p9, %p107_p1 }
  0x2f   : > { %s3202_s23 = sand.u32 (!%p108_p3), 1, %s3072_s7  }
  0x30   : > { %111 = sbr.rel (%p108_p3) target bundleno = 703 (0x2bf), region = 24  ;;  %s2922_s24 = sshll.u32 (!%p108_p3), %s3202_s23, 10 }
  0x31   : > { %s114_s26 = scalar_lea.sflag (!%p108_p3), [#allocation3], %s3202_s23  ;;  %s3208_s30 = scalar_lea.vmem (!%p108_p3), [#allocation2], %s2922_s24 }
  0x37   : > { %3059 = dma.done.wait (%p3141_p6), %s114_s26, 16384  }
  0x38   : > { %3061 = vsyncadd (%p3141_p6), %s114_s26, 4294950912  ;;  %v3215_v0 = vld [vmem:[%s3208_s30] sm:$0xff]  ;;  %v3218_v1 = vld [vmem:[%s3208_s30 + $0x8] sm:$0xff]  ;;  %s3321_s17 = scalar_lea.vmem [#allocation5], %s2922_s24  ;;  %s2933_s25 = sshll.u32 %s3119_s10, 14 }
  0x39   : > { %v3221_v2 = vld [vmem:[%s3208_s30 + $0x10] sm:$0xff]  ;;  %v266_v3 = vmul.f32 0.31415927, %v3215_v0  ;;  %v267_v4 = vmul.f32 0.31415927, %v3218_v1  ;;  %v3227_v6 = vld [vmem:[%s3208_s30 + $0x18] sm:$0xff]  ;;  %s5197_s2 = scalar_lea.hbm %s5246_s1, %s2933_s25 }
  0x3a   : > { %v268_v5 = vmul.f32 0.31415927, %v3221_v2  ;;  %v3230_v7 = vld [vmem:[%s3208_s30 + $0x20] sm:$0xff]  ;;  %v3233_v8 = vld [vmem:[%s3208_s30 + $0x28] sm:$0xff]  ;;  %v269_v11 = vmul.f32 0.31415927, %v3227_v6 }
  0x3b   : > { %v394_v9 = vand.u32 2147483647, %v266_v3  ;;  %v395_v10 = vand.u32 2147483647, %v267_v4  ;;  %v270_v13 = vmul.f32 0.31415927, %v3230_v7 }
  0x3c   : > { %v396_v12 = vand.u32 2147483647, %v268_v5  ;;  %v397_v16 = vand.u32 2147483647, %v269_v11  ;;  %v271_v19 = vmul.f32 0.31415927, %v3233_v8 }
  0x3d   : > { %v522_v14 = vmin.f32 %v394_v9, 1.5707964  ;;  %v523_v15 = vmin.f32 %v395_v10, 1.5707964  ;;  %v398_v18 = vand.u32 2147483647, %v270_v13 }
  0x3e   : > { %v524_v17 = vmin.f32 %v396_v12, 1.5707964  ;;  %v525_v22 = vmin.f32 %v397_v16, 1.5707964  ;;  %v3243_v23 = vld [vmem:[%s3208_s30 + $0x30] sm:$0xff]  ;;  %v3253_v31 = vld [vmem:[%s3208_s30 + $0x38] sm:$0xff] }
  0x3f   : > { %v3238_v20 = vmul.f32 %v522_v14, %v522_v14  ;;  %v3240_v21 = vmul.f32 %v523_v15, %v523_v15  ;;  %v526_v25 = vmin.f32 %v398_v18, 1.5707964  ;;  %v399_v26 = vand.u32 2147483647, %v271_v19  ;;  %s2841_s27 = sshll.u32 %s3321_s17, 4  ;;  %s2827_s10 = scalar_lea.sflag [#allocation4], %s3202_s23  ;;  %s5200_s27 = int_to_ptr.vmem [resolvable:$true] %s2841_s27 }
  0x40   : > { %v3245_v24 = vmul.f32 %v524_v17, %v524_v17  ;;  %v272_v27 = vmul.f32 0.31415927, %v3243_v23  ;;  %v3250_v30 = vmul.f32 %v525_v22, %v525_v22  ;;  %v273_v46 = vmul.f32 0.31415927, %v3253_v31  ;;  %s3014_s3 = scalar_lea.vmem %s5200_s27, 16384  ;;  %p5253_p11 = scmp.ne.s32.totalorder %s5250_s18, 0 }
  0x41   : > { %v778_v28 = vmul.f32 2.0876756e-09, %v3238_v20  ;;  %v779_v29 = vmul.f32 2.0876756e-09, %v3240_v21  ;;  %v3256_v33 = vmul.f32 %v526_v25, %v526_v25  ;;  %v527_v34 = vmin.f32 %v399_v26, 1.5707964  ;;  %p3015_p6 = scmp.ne.s32.totalorder %s5200_s27, %s3014_s3 }
  0x42   : > { %v780_v32 = vmul.f32 2.0876756e-09, %v3245_v24  ;;  %v400_v35 = vand.u32 2147483647, %v272_v27  ;;  %v781_v38 = vmul.f32 2.0876756e-09, %v3250_v30 }
  0x43   : > { %v906_v36 = vadd.f32 -2.755732e-07, %v778_v28  ;;  %v907_v37 = vadd.f32 -2.755732e-07, %v779_v29  ;;  %v782_v40 = vmul.f32 2.0876756e-09, %v3256_v33  ;;  %v3260_v41 = vmul.f32 %v527_v34, %v527_v34  ;;  %p3016_p12 = pnand %p3015_p6, %p5253_p11 }
  0x44   : > { %v908_v39 = vadd.f32 -2.755732e-07, %v780_v32  ;;  %v528_v42 = vmin.f32 %v400_v35, 1.5707964  ;;  %v909_v45 = vadd.f32 -2.755732e-07, %v781_v38 }
  0x45   : > { %v1034_v43 = vmul.f32 %v906_v36, %v3238_v20  ;;  %v1035_v44 = vmul.f32 %v907_v37, %v3240_v21  ;;  %v910_v48 = vadd.f32 -2.755732e-07, %v782_v40  ;;  %v783_v49 = vmul.f32 2.0876756e-09, %v3260_v41  ;;  %p3017_p13 = pneg %p3016_p12  ;;  %s3085_s4 = smov [#allocation5]  }
  0x46   : > { %v1036_v47 = vmul.f32 %v908_v39, %v3245_v24  ;;  %v3267_v50 = vmul.f32 %v528_v42, %v528_v42  ;;  %v1037_v53 = vmul.f32 %v909_v45, %v3250_v30  ;;  %v401_v54 = vand.u32 2147483647, %v273_v46  ;;  %s3018_s5 = sshll.u32 %s3085_s4, 4  ;;  %s3019_s5 = int_to_ptr.vmem [resolvable:$false] %s3018_s5 }
  0x47   : > { %v1162_v51 = vadd.f32 2.4801588e-05, %v1034_v43  ;;  %v1163_v52 = vadd.f32 2.4801588e-05, %v1035_v44  ;;  %v1038_v56 = vmul.f32 %v910_v48, %v3256_v33  ;;  %v911_v57 = vadd.f32 -2.755732e-07, %v783_v49  ;;  %p3021_p8 = scmp.lt.s32.totalorder %s5200_s27, %s3019_s5 }
  0x48   : > { %v1164_v55 = vadd.f32 2.4801588e-05, %v1036_v47  ;;  %v784_v58 = vmul.f32 2.0876756e-09, %v3267_v50  ;;  %v1165_v61 = vadd.f32 2.4801588e-05, %v1037_v53 }
  0x49   : > { %v1290_v59 = vmul.f32 %v1162_v51, %v3238_v20  ;;  %v1291_v60 = vmul.f32 %v1163_v52, %v3240_v21  ;;  %v529_v62 = vmin.f32 %v401_v54, 1.5707964  ;;  %v1166_v3 = vadd.f32 2.4801588e-05, %v1038_v56  ;;  %s3020_s11 = scalar_lea.vmem %s3019_s5, 32768 }
  0x4a   : > { %v1292_v63 = vmul.f32 %v1164_v55, %v3245_v24  ;;  %v1039_v4 = vmul.f32 %v911_v57, %v3260_v41  ;;  %v912_v5 = vadd.f32 -2.755732e-07, %v784_v58  ;;  %v1293_v11 = vmul.f32 %v1165_v61, %v3250_v30  ;;  %p3022_p10 = scmp.lt.s32.totalorder %s3020_s11, %s3014_s3 }
  0x4b   : > { %v1418_v9 = vadd.f32 -0.0013888889, %v1290_v59  ;;  %v1419_v10 = vadd.f32 -0.0013888889, %v1291_v60  ;;  %v3277_v12 = vmul.f32 %v529_v62, %v529_v62  ;;  %v1294_v14 = vmul.f32 %v1166_v3, %v3256_v33 }
  0x4c   : > { %v1420_v13 = vadd.f32 -0.0013888889, %v1292_v63  ;;  %v1167_v15 = vadd.f32 2.4801588e-05, %v1039_v4  ;;  %v1040_v16 = vmul.f32 %v912_v5, %v3267_v50  ;;  %v1421_v19 = vadd.f32 -0.0013888889, %v1293_v11  ;;  %p3023_p0 = por %p3022_p10, %p3021_p8 }
  0x4d   : > { %v1546_v17 = vmul.f32 %v1418_v9, %v3238_v20  ;;  %v1547_v18 = vmul.f32 %v1419_v10, %v3240_v21  ;;  %v785_v22 = vmul.f32 2.0876756e-09, %v3277_v12  ;;  %v1422_v26 = vadd.f32 -0.0013888889, %v1294_v14 }
  0x4e   : > { %v1548_v25 = vmul.f32 %v1420_v13, %v3245_v24  ;;  %v1295_v27 = vmul.f32 %v1167_v15, %v3260_v41  ;;  %v1168_v28 = vadd.f32 2.4801588e-05, %v1040_v16  ;;  %v1549_v34 = vmul.f32 %v1421_v19, %v3250_v30  ;;  %p3024_p2 = pnand %p3023_p0, %p3017_p13 }
  0x4f   : > { %v1674_v29 = vadd.f32 0.041666668, %v1546_v17  ;;  %v1675_v32 = vadd.f32 0.041666668, %v1547_v18  ;;  %v913_v35 = vadd.f32 -2.755732e-07, %v785_v22  ;;  %v1550_v37 = vmul.f32 %v1422_v26, %v3256_v33 }
  0x50   : > { %vm2442_vm0 = vcmp.ge.f32.partialorder %v3215_v0, 5.0  ;;  %vm2443_vm1 = vcmp.ge.f32.partialorder %v3218_v1, 5.0  ;;  %v1676_v36 = vadd.f32 0.041666668, %v1548_v25  ;;  %v1423_v38 = vadd.f32 -0.0013888889, %v1295_v27 }
  0x51   : > { %v1296_v39 = vmul.f32 %v1168_v28, %v3267_v50  ;;  %v1802_v40 = vmul.f32 %v1674_v29, %v3238_v20  ;;  %v1803_v42 = vmul.f32 %v1675_v32, %v3240_v21  ;;  %vm2444_vm2 = vcmp.ge.f32.partialorder %v3221_v2, 5.0  ;;  %v3329_v32 = vld [vmem:[%s3208_s30 + $0x48] sm:$0xff] }
  0x52   : > { %v1677_v43 = vadd.f32 0.041666668, %v1549_v34  ;;  %v1041_v44 = vmul.f32 %v913_v35, %v3277_v12  ;;  %v1804_v45 = vmul.f32 %v1676_v36, %v3245_v24  ;;  %vm2445_vm3 = vcmp.ge.f32.partialorder %v3227_v6, 5.0  ;;  %v3338_v36 = vld [vmem:[%s3208_s30 + $0x50] sm:$0xff]  ;;  %v3345_v6 = vld [vmem:[%s3208_s30 + $0x58] sm:$0xff] }
  0x53   : > { %v1678_v46 = vadd.f32 0.041666668, %v1550_v37  ;;  %v1551_v47 = vmul.f32 %v1423_v38, %v3260_v41  ;;  %v1424_v48 = vadd.f32 -0.0013888889, %v1296_v39  ;;  %v1930_v49 = vadd.f32 -0.5, %v1802_v40 }
  0x54   : > { %v1931_v51 = vadd.f32 -0.5, %v1803_v42  ;;  %v1805_v52 = vmul.f32 %v1677_v43, %v3250_v30  ;;  %vm2446_vm4 = vcmp.ge.f32.partialorder %v3230_v7, 5.0  ;;  %v1169_v53 = vadd.f32 2.4801588e-05, %v1041_v44  ;;  %v3350_v42 = vld [vmem:[%s3208_s30 + $0x60] sm:$0xff] }
  0x55   : > { %v1932_v54 = vadd.f32 -0.5, %v1804_v45  ;;  %v1806_v55 = vmul.f32 %v1678_v46, %v3256_v33  ;;  %v1679_v56 = vadd.f32 0.041666668, %v1551_v47  ;;  %v1552_v57 = vmul.f32 %v1424_v48, %v3267_v50 }
  0x56   : > { %v2058_v58 = vmul.f32 %v1930_v49, %v3238_v20  ;;  %v2059_v59 = vmul.f32 %v1931_v51, %v3240_v21  ;;  %v1933_v60 = vadd.f32 -0.5, %v1805_v52  ;;  %v1297_v61 = vmul.f32 %v1169_v53, %v3277_v12  ;;  %v3358_v52 = vld [vmem:[%s3208_s30 + $0x68] sm:$0xff] }
  0x57   : > { %v2060_v62 = vmul.f32 %v1932_v54, %v3245_v24  ;;  %v1934_v63 = vadd.f32 -0.5, %v1806_v55  ;;  %v1807_v3 = vmul.f32 %v1679_v56, %v3260_v41  ;;  %v1680_v4 = vadd.f32 0.041666668, %v1552_v57  ;;  %v3364_v57 = vld [vmem:[%s3208_s30 + $0x70] sm:$0xff] }
  0x58   : > { %v2186_v5 = vadd.f32 1.0, %v2058_v58  ;;  %v2187_v9 = vadd.f32 1.0, %v2059_v59  ;;  %v2061_v10 = vmul.f32 %v1933_v60, %v3250_v30  ;;  %v1425_v11 = vadd.f32 -0.0013888889, %v1297_v61  ;;  %v3313_v30 = vld [vmem:[%s3208_s30 + $0x40] sm:$0xff] }
  0x59   : > { %v2188_v13 = vadd.f32 1.0, %v2060_v62  ;;  %v2062_v20 = vmul.f32 %v1934_v63, %v3256_v33  ;;  %v1935_v21 = vadd.f32 -0.5, %v1807_v3  ;;  %v1808_v14 = vmul.f32 %v1680_v4, %v3267_v50 }
  0x5a   : > { %v2314_v15 = vmul.f32 %v2186_v5, %v2186_v5  ;;  %v2315_v16 = vmul.f32 %v2187_v9, %v2187_v9  ;;  %v2189_v24 = vadd.f32 1.0, %v2061_v10  ;;  %v1553_v17 = vmul.f32 %v1425_v11, %v3277_v12 }
  0x5b   : > { %v2316_v18 = vmul.f32 %v2188_v13, %v2188_v13  ;;  %v2190_v19 = vadd.f32 1.0, %v2062_v20  ;;  %v2063_v22 = vmul.f32 %v1935_v21, %v3260_v41  ;;  %v1936_v25 = vadd.f32 -0.5, %v1808_v14 }
  0x5c   : > { %v2570_v33 = vsel %vm2442_vm0, 0.0, %v2314_v15  ;;  %v2571_v26 = vsel %vm2443_vm1, 0.0, %v2315_v16  ;;  %v2317_v27 = vmul.f32 %v2189_v24, %v2189_v24  ;;  %v1681_v28 = vadd.f32 0.041666668, %v1553_v17  ;;  %v3384_v17 = vld [vmem:[%s3208_s30 + $0x78] sm:$0xff] }
  0x5d   : > { %2698 = vst [vmem:[%s3321_s17] sm:$0xff] %v2570_v33  ;;  %2699 = vst [vmem:[%s3321_s17 + $0x8] sm:$0xff] %v2571_v26  ;;  %v2572_v41 = vsel %vm2444_vm2, 0.0, %v2316_v18  ;;  %v2318_v0 = vmul.f32 %v2190_v19, %v2190_v19  ;;  %v2191_v1 = vadd.f32 1.0, %v2063_v22  ;;  %v2064_v29 = vmul.f32 %v1936_v25, %v3267_v50 }
  0x5e   : > { %2700 = vst [vmem:[%s3321_s17 + $0x10] sm:$0xff] %v2572_v41  ;;  %v2573_v34 = vsel %vm2445_vm3, 0.0, %v2317_v27  ;;  %vm2447_vm5 = vcmp.ge.f32.partialorder %v3233_v8, 5.0  ;;  %v1809_v35 = vmul.f32 %v1681_v28, %v3277_v12  ;;  %v274_v2 = vmul.f32 0.31415927, %v3313_v30 }
  0x5f   : > { %2701 = vst [vmem:[%s3321_s17 + $0x18] sm:$0xff] %v2573_v34  ;;  %v2574_v50 = vsel %vm2446_vm4, 0.0, %v2318_v0  ;;  %v2319_v37 = vmul.f32 %v2191_v1, %v2191_v1  ;;  %v2192_v38 = vadd.f32 1.0, %v2064_v29  ;;  %vm2448_vm6 = vcmp.ge.f32.partialorder %v3243_v23, 5.0 }
  0x60   : > { %2702 = vst [vmem:[%s3321_s17 + $0x20] sm:$0xff] %v2574_v50  ;;  %v1937_v8 = vadd.f32 -0.5, %v1809_v35  ;;  %v402_v39 = vand.u32 2147483647, %v274_v2  ;;  %v275_v40 = vmul.f32 0.31415927, %v3329_v32 }
  0x61   : > { %v2575_v43 = vsel %vm2447_vm5, 0.0, %v2319_v37  ;;  %v2320_v44 = vmul.f32 %v2192_v38, %v2192_v38  ;;  %v276_v7 = vmul.f32 0.31415927, %v3338_v36  ;;  %v277_v47 = vmul.f32 0.31415927, %v3345_v6 }
  0x62   : > { %2703 = vst [vmem:[%s3321_s17 + $0x28] sm:$0xff] %v2575_v43  ;;  %v2065_v45 = vmul.f32 %v1937_v8, %v3277_v12  ;;  %v530_v23 = vmin.f32 %v402_v39, 1.5707964  ;;  %v403_v46 = vand.u32 2147483647, %v275_v40  ;;  %vm2449_vm7 = vcmp.ge.f32.partialorder %v3253_v31, 5.0 }
  0x63   : > { %v2576_v48 = vsel %vm2448_vm6, 0.0, %v2320_v44  ;;  %v404_v49 = vand.u32 2147483647, %v276_v7  ;;  %v278_v51 = vmul.f32 0.31415927, %v3350_v42  ;;  %vm2450_vm8 = vcmp.ge.f32.partialorder %v3313_v30, 5.0 }
  0x64   : > { %2704 = vst [vmem:[%s3321_s17 + $0x30] sm:$0xff] %v2576_v48  ;;  %v2193_v53 = vadd.f32 1.0, %v2065_v45  ;;  %v3361_v54 = vmul.f32 %v530_v23, %v530_v23  ;;  %v531_v55 = vmin.f32 %v403_v46, 1.5707964  ;;  %v405_v56 = vand.u32 2147483647, %v277_v47 }
  0x65   : > { %v532_v12 = vmin.f32 %v404_v49, 1.5707964  ;;  %v406_v58 = vand.u32 2147483647, %v278_v51  ;;  %v279_v4 = vmul.f32 0.31415927, %v3358_v52 }
  0x66   : > { %v2321_v59 = vmul.f32 %v2193_v53, %v2193_v53  ;;  %v786_v60 = vmul.f32 2.0876756e-09, %v3361_v54  ;;  %v3368_v61 = vmul.f32 %v531_v55, %v531_v55  ;;  %v533_v62 = vmin.f32 %v405_v56, 1.5707964 }
  0x67   : > { %v3370_v63 = vmul.f32 %v532_v12, %v532_v12  ;;  %v534_v3 = vmin.f32 %v406_v58, 1.5707964  ;;  %v280_v5 = vmul.f32 0.31415927, %v3364_v57  ;;  %v407_v21 = vand.u32 2147483647, %v279_v4 }
  0x68   : > { %v2577_v9 = vsel %vm2449_vm7, 0.0, %v2321_v59  ;;  %v914_v10 = vadd.f32 -2.755732e-07, %v786_v60  ;;  %v787_v31 = vmul.f32 2.0876756e-09, %v3368_v61  ;;  %v3375_v11 = vmul.f32 %v533_v62, %v533_v62 }
  0x69   : > { %2705 = vst [vmem:[%s3321_s17 + $0x38] sm:$0xff] %v2577_v9  ;;  %v788_v13 = vmul.f32 2.0876756e-09, %v3370_v63  ;;  %v3379_v20 = vmul.f32 %v534_v3, %v534_v3  ;;  %v408_v14 = vand.u32 2147483647, %v280_v5  ;;  %vm2451_vm9 = vcmp.ge.f32.partialorder %v3329_v32, 5.0 }
  0x6a   : > { %v1042_v15 = vmul.f32 %v914_v10, %v3361_v54  ;;  %v915_v16 = vadd.f32 -2.755732e-07, %v787_v31  ;;  %v789_v24 = vmul.f32 2.0876756e-09, %v3375_v11  ;;  %v535_v22 = vmin.f32 %v407_v21, 1.5707964 }
  0x6b   : > { %v916_v18 = vadd.f32 -2.755732e-07, %v788_v13  ;;  %v790_v19 = vmul.f32 2.0876756e-09, %v3379_v20  ;;  %v536_v27 = vmin.f32 %v408_v14, 1.5707964 }
  0x6c   : > { %v1170_v25 = vadd.f32 2.4801588e-05, %v1042_v15  ;;  %v1043_v33 = vmul.f32 %v915_v16, %v3368_v61  ;;  %v917_v26 = vadd.f32 -2.755732e-07, %v789_v24  ;;  %v3389_v0 = vmul.f32 %v535_v22, %v535_v22 }
  0x6d   : > { %v1044_v28 = vmul.f32 %v916_v18, %v3370_v63  ;;  %v918_v41 = vadd.f32 -2.755732e-07, %v790_v19  ;;  %v281_v1 = vmul.f32 0.31415927, %v3384_v17  ;;  %v3394_v2 = vmul.f32 %v536_v27, %v536_v27 }
  0x6e   : > { %v1298_v29 = vmul.f32 %v1170_v25, %v3361_v54  ;;  %v1171_v34 = vadd.f32 2.4801588e-05, %v1043_v33  ;;  %v1045_v35 = vmul.f32 %v917_v26, %v3375_v11  ;;  %v791_v38 = vmul.f32 2.0876756e-09, %v3389_v0 }
  0x6f   : > { %v1172_v50 = vadd.f32 2.4801588e-05, %v1044_v28  ;;  %v1046_v37 = vmul.f32 %v918_v41, %v3379_v20  ;;  %v409_v8 = vand.u32 2147483647, %v281_v1  ;;  %v792_v44 = vmul.f32 2.0876756e-09, %v3394_v2 }
  0x70   : > { %v1426_v39 = vadd.f32 -0.0013888889, %v1298_v29  ;;  %v1299_v40 = vmul.f32 %v1171_v34, %v3368_v61  ;;  %v1173_v43 = vadd.f32 2.4801588e-05, %v1045_v35  ;;  %v919_v23 = vadd.f32 -2.755732e-07, %v791_v38 }
  0x71   : > { %v1300_v7 = vmul.f32 %v1172_v50, %v3370_v63  ;;  %v1174_v45 = vadd.f32 2.4801588e-05, %v1046_v37  ;;  %v537_v46 = vmin.f32 %v409_v8, 1.5707964  ;;  %v920_v51 = vadd.f32 -2.755732e-07, %v792_v44 }
  0x72   : > { %v1554_v47 = vmul.f32 %v1426_v39, %v3361_v54  ;;  %v1427_v48 = vadd.f32 -0.0013888889, %v1299_v40  ;;  %v1301_v49 = vmul.f32 %v1173_v43, %v3375_v11  ;;  %v1047_v56 = vmul.f32 %v919_v23, %v3389_v0 }
  0x73   : > { %v1428_v53 = vadd.f32 -0.0013888889, %v1300_v7  ;;  %v1302_v55 = vmul.f32 %v1174_v45, %v3379_v20  ;;  %v3405_v12 = vmul.f32 %v537_v46, %v537_v46  ;;  %v1048_v62 = vmul.f32 %v920_v51, %v3394_v2 }
  0x74   : > { %v1682_v58 = vadd.f32 0.041666668, %v1554_v47  ;;  %v1555_v59 = vmul.f32 %v1427_v48, %v3368_v61  ;;  %v1429_v60 = vadd.f32 -0.0013888889, %v1301_v49  ;;  %v1175_v5 = vadd.f32 2.4801588e-05, %v1047_v56 }
  0x75   : > { %v1556_v3 = vmul.f32 %v1428_v53, %v3370_v63  ;;  %v1430_v4 = vadd.f32 -0.0013888889, %v1302_v55  ;;  %v793_v9 = vmul.f32 2.0876756e-09, %v3405_v12  ;;  %v1176_v21 = vadd.f32 2.4801588e-05, %v1048_v62 }
  0x76   : > { %v1810_v10 = vmul.f32 %v1682_v58, %v3361_v54  ;;  %v1683_v31 = vadd.f32 0.041666668, %v1555_v59  ;;  %v1557_v13 = vmul.f32 %v1429_v60, %v3375_v11  ;;  %v1303_v16 = vmul.f32 %v1175_v5, %v3389_v0  ;;  %v3440_v62 = vld [vmem:[%s3208_s30 + $0x80] sm:$0xff]  ;;  %v3446_v5 = vld [vmem:[%s3208_s30 + $0x88] sm:$0xff] }
  0x77   : > { %v1684_v14 = vadd.f32 0.041666668, %v1556_v3  ;;  %v1558_v15 = vmul.f32 %v1430_v4, %v3379_v20  ;;  %v921_v24 = vadd.f32 -2.755732e-07, %v793_v9  ;;  %vm2452_vm10 = vcmp.ge.f32.partialorder %v3338_v36, 5.0 }
  0x78   : > { %v1938_v18 = vadd.f32 -0.5, %v1810_v10  ;;  %v1811_v19 = vmul.f32 %v1683_v31, %v3368_v61  ;;  %v1685_v22 = vadd.f32 0.041666668, %v1557_v13  ;;  %v1304_v25 = vmul.f32 %v1176_v21, %v3394_v2  ;;  %v3453_v21 = vld [vmem:[%s3208_s30 + $0x90] sm:$0xff] }
  0x79   : > { %v1812_v33 = vmul.f32 %v1684_v14, %v3370_v63  ;;  %vm2453_vm11 = vcmp.ge.f32.partialorder %v3345_v6, 5.0  ;;  %v1686_v26 = vadd.f32 0.041666668, %v1558_v15  ;;  %v1431_v27 = vadd.f32 -0.0013888889, %v1303_v16 }
  0x7a   : > { %v1049_v28 = vmul.f32 %v921_v24, %v3405_v12  ;;  %v2066_v41 = vmul.f32 %v1938_v18, %v3361_v54  ;;  %v1939_v1 = vadd.f32 -0.5, %v1811_v19  ;;  %v1813_v29 = vmul.f32 %v1685_v22, %v3375_v11 }
  0x7b   : > { %v1432_v34 = vadd.f32 -0.0013888889, %v1304_v25  ;;  %v1940_v35 = vadd.f32 -0.5, %v1812_v33  ;;  %v1814_v50 = vmul.f32 %v1686_v26, %v3379_v20  ;;  %v1559_v37 = vmul.f32 %v1431_v27, %v3389_v0  ;;  %v3471_v33 = vld [vmem:[%s3208_s30 + $0xa0] sm:$0xff] }
  0x7c   : > { %v1177_v38 = vadd.f32 2.4801588e-05, %v1049_v28  ;;  %v2194_v8 = vadd.f32 1.0, %v2066_v41  ;;  %v2067_v39 = vmul.f32 %v1939_v1, %v3368_v61  ;;  %v1941_v40 = vadd.f32 -0.5, %v1813_v29 }
  0x7d   : > { %v1560_v43 = vmul.f32 %v1432_v34, %v3394_v2  ;;  %v2068_v44 = vmul.f32 %v1940_v35, %v3370_v63  ;;  %v1942_v54 = vadd.f32 -0.5, %v1814_v50  ;;  %v1687_v7 = vadd.f32 0.041666668, %v1559_v37  ;;  %v3476_v34 = vld [vmem:[%s3208_s30 + $0xa8] sm:$0xff] }
  0x7e   : > { %v1305_v45 = vmul.f32 %v1177_v38, %v3405_v12  ;;  %v2322_v23 = vmul.f32 %v2194_v8, %v2194_v8  ;;  %v2195_v46 = vadd.f32 1.0, %v2067_v39  ;;  %v2069_v47 = vmul.f32 %v1941_v40, %v3375_v11 }
  0x7f   : > { %v1688_v48 = vadd.f32 0.041666668, %v1560_v43  ;;  %v2196_v49 = vadd.f32 1.0, %v2068_v44  ;;  %v2070_v51 = vmul.f32 %v1942_v54, %v3379_v20  ;;  %v1815_v61 = vmul.f32 %v1687_v7, %v3389_v0 }
  0x80   : > { %v1433_v53 = vadd.f32 -0.0013888889, %v1305_v45  ;;  %v2578_v63 = vsel %vm2450_vm8, 0.0, %v2322_v23  ;;  %v2323_v55 = vmul.f32 %v2195_v46, %v2195_v46  ;;  %v2197_v56 = vadd.f32 1.0, %v2069_v47  ;;  %v3492_v23 = vld [vmem:[%s3208_s30 + $0xb0] sm:$0xff]  ;;  %v3495_v46 = vld [vmem:[%s3208_s30 + $0xb8] sm:$0xff] }
  0x81   : > { %v1816_v58 = vmul.f32 %v1688_v48, %v3394_v2  ;;  %2706 = vst [vmem:[%s3321_s17 + $0x40] sm:$0xff] %v2578_v63  ;;  %v2324_v59 = vmul.f32 %v2196_v49, %v2196_v49  ;;  %v2198_v11 = vadd.f32 1.0, %v2070_v51  ;;  %v1943_v60 = vadd.f32 -0.5, %v1815_v61 }
  0x82   : > { %v1561_v20 = vmul.f32 %v1433_v53, %v3405_v12  ;;  %v2579_v30 = vsel %vm2451_vm9, 0.0, %v2323_v55  ;;  %v2325_v3 = vmul.f32 %v2197_v56, %v2197_v56  ;;  %vm2454_vm12 = vcmp.ge.f32.partialorder %v3350_v42, 5.0 }
  0x83   : > { %v1944_v4 = vadd.f32 -0.5, %v1816_v58  ;;  %2707 = vst [vmem:[%s3321_s17 + $0x48] sm:$0xff] %v2579_v30  ;;  %v2580_v9 = vsel %vm2452_vm10, 0.0, %v2324_v59  ;;  %v2326_v10 = vmul.f32 %v2198_v11, %v2198_v11  ;;  %v2071_v31 = vmul.f32 %v1943_v60, %v3389_v0  ;;  %v3464_v0 = vld [vmem:[%s3208_s30 + $0x98] sm:$0xff] }
  0x84   : > { %v1689_v13 = vadd.f32 0.041666668, %v1561_v20  ;;  %2708 = vst [vmem:[%s3321_s17 + $0x50] sm:$0xff] %v2580_v9  ;;  %v2581_v32 = vsel %vm2453_vm11, 0.0, %v2325_v3  ;;  %v282_v14 = vmul.f32 0.31415927, %v3440_v62 }
  0x85   : > { %v2072_v42 = vmul.f32 %v1944_v4, %v3394_v2  ;;  %2709 = vst [vmem:[%s3321_s17 + $0x58] sm:$0xff] %v2581_v32  ;;  %v2582_v15 = vsel %vm2454_vm12, 0.0, %v2326_v10  ;;  %v2199_v36 = vadd.f32 1.0, %v2071_v31  ;;  %v283_v24 = vmul.f32 0.31415927, %v3446_v5 }
  0x86   : > { %v1817_v16 = vmul.f32 %v1689_v13, %v3405_v12  ;;  %2710 = vst [vmem:[%s3321_s17 + $0x60] sm:$0xff] %v2582_v15  ;;  %vm2455_vm13 = vcmp.ge.f32.partialorder %v3358_v52, 5.0  ;;  %v410_v18 = vand.u32 2147483647, %v282_v14  ;;  %v284_v2 = vmul.f32 0.31415927, %v3453_v21 }
  0x87   : > { %v2200_v6 = vadd.f32 1.0, %v2072_v42  ;;  %v2327_v19 = vmul.f32 %v2199_v36, %v2199_v36  ;;  %vm2456_vm14 = vcmp.ge.f32.partialorder %v3364_v57, 5.0  ;;  %v411_v25 = vand.u32 2147483647, %v283_v24 }
  0x88   : > { %v1945_v22 = vadd.f32 -0.5, %v1817_v16  ;;  %v538_v27 = vmin.f32 %v410_v18, 1.5707964  ;;  %v412_v28 = vand.u32 2147483647, %v284_v2  ;;  %vm2457_vm15 = vcmp.ge.f32.partialorder %v3384_v17, 5.0 }
  0x89   : > { %v2328_v26 = vmul.f32 %v2200_v6, %v2200_v6  ;;  %v285_v41 = vmul.f32 0.31415927, %v3464_v0  ;;  %v2583_v52 = vsel %vm2455_vm13, 0.0, %v2327_v19  ;;  %v539_v29 = vmin.f32 %v411_v25, 1.5707964 }
  0x8a   : > { %v2073_v1 = vmul.f32 %v1945_v22, %v3405_v12  ;;  %2711 = vst [vmem:[%s3321_s17 + $0x68] sm:$0xff] %v2583_v52  ;;  %v3479_v57 = vmul.f32 %v538_v27, %v538_v27  ;;  %v540_v50 = vmin.f32 %v412_v28, 1.5707964  ;;  %v286_v39 = vmul.f32 0.31415927, %v3471_v33 }
  0x8b   : > { %v2584_v35 = vsel %vm2456_vm14, 0.0, %v2328_v26  ;;  %v413_v37 = vand.u32 2147483647, %v285_v41  ;;  %v3483_v8 = vmul.f32 %v539_v29, %v539_v29  ;;  %v287_v44 = vmul.f32 0.31415927, %v3476_v34 }
  0x8c   : > { %2712 = vst [vmem:[%s3321_s17 + $0x70] sm:$0xff] %v2584_v35  ;;  %v2201_v38 = vadd.f32 1.0, %v2073_v1  ;;  %v794_v12 = vmul.f32 2.0876756e-09, %v3479_v57  ;;  %v3487_v40 = vmul.f32 %v540_v50, %v540_v50  ;;  %v414_v45 = vand.u32 2147483647, %v286_v39 }
  0x8d   : > { %v541_v43 = vmin.f32 %v413_v37, 1.5707964  ;;  %v795_v7 = vmul.f32 2.0876756e-09, %v3483_v8  ;;  %v415_v51 = vand.u32 2147483647, %v287_v44 }
  0x8e   : > { %v2329_v54 = vmul.f32 %v2201_v38, %v2201_v38  ;;  %v922_v47 = vadd.f32 -2.755732e-07, %v794_v12  ;;  %v796_v48 = vmul.f32 2.0876756e-09, %v3487_v40  ;;  %v542_v63 = vmin.f32 %v414_v45, 1.5707964 }
  0x8f   : > { %v3498_v49 = vmul.f32 %v541_v43, %v541_v43  ;;  %v923_v53 = vadd.f32 -2.755732e-07, %v795_v7  ;;  %v543_v59 = vmin.f32 %v415_v51, 1.5707964  ;;  %v288_v20 = vmul.f32 0.31415927, %v3492_v23 }
  0x90   : > { %v2585_v61 = vsel %vm2457_vm15, 0.0, %v2329_v54  ;;  %v1050_v55 = vmul.f32 %v922_v47, %v3479_v57  ;;  %v924_v56 = vadd.f32 -2.755732e-07, %v796_v48  ;;  %v3506_v60 = vmul.f32 %v542_v63, %v542_v63 }
  0x91   : > { %2713 = vst [vmem:[%s3321_s17 + $0x78] sm:$0xff] %v2585_v61  ;;  %v797_v58 = vmul.f32 2.0876756e-09, %v3498_v49  ;;  %v1051_v11 = vmul.f32 %v923_v53, %v3483_v8  ;;  %v289_v30 = vmul.f32 0.31415927, %v3495_v46  ;;  %v3511_v9 = vmul.f32 %v543_v59, %v543_v59 }
  0x92   : > { %v1178_v3 = vadd.f32 2.4801588e-05, %v1050_v55  ;;  %v1052_v17 = vmul.f32 %v924_v56, %v3487_v40  ;;  %v798_v31 = vmul.f32 2.0876756e-09, %v3506_v60  ;;  %v416_v13 = vand.u32 2147483647, %v288_v20 }
  0x93   : > { %v925_v4 = vadd.f32 -2.755732e-07, %v797_v58  ;;  %v1179_v10 = vadd.f32 2.4801588e-05, %v1051_v11  ;;  %v799_v15 = vmul.f32 2.0876756e-09, %v3511_v9 }
  0x94   : > { %v1306_v32 = vmul.f32 %v1178_v3, %v3479_v57  ;;  %v1180_v42 = vadd.f32 2.4801588e-05, %v1052_v17  ;;  %v926_v16 = vadd.f32 -2.755732e-07, %v798_v31  ;;  %v544_v24 = vmin.f32 %v416_v13, 1.5707964 }
  0x95   : > { %v1053_v14 = vmul.f32 %v925_v4, %v3498_v49  ;;  %v1307_v36 = vmul.f32 %v1179_v10, %v3483_v8  ;;  %v417_v6 = vand.u32 2147483647, %v289_v30  ;;  %v927_v22 = vadd.f32 -2.755732e-07, %v799_v15 }
  0x96   : > { %v1434_v18 = vadd.f32 -0.0013888889, %v1306_v32  ;;  %v1308_v2 = vmul.f32 %v1180_v42, %v3487_v40  ;;  %v1054_v26 = vmul.f32 %v926_v16, %v3506_v60  ;;  %v3520_v27 = vmul.f32 %v544_v24, %v544_v24 }
  0x97   : > { %v1181_v19 = vadd.f32 2.4801588e-05, %v1053_v14  ;;  %v1435_v25 = vadd.f32 -0.0013888889, %v1307_v36  ;;  %v545_v28 = vmin.f32 %v417_v6, 1.5707964  ;;  %v1055_v29 = vmul.f32 %v927_v22, %v3511_v9 }
  0x98   : > { %v1562_v41 = vmul.f32 %v1434_v18, %v3479_v57  ;;  %v1436_v52 = vadd.f32 -0.0013888889, %v1308_v2  ;;  %v1182_v50 = vadd.f32 2.4801588e-05, %v1054_v26  ;;  %v800_v37 = vmul.f32 2.0876756e-09, %v3520_v27 }
  0x99   : > { %v1309_v1 = vmul.f32 %v1181_v19, %v3498_v49  ;;  %v1563_v35 = vmul.f32 %v1435_v25, %v3483_v8  ;;  %v3527_v38 = vmul.f32 %v545_v28, %v545_v28  ;;  %v1183_v44 = vadd.f32 2.4801588e-05, %v1055_v29 }
  0x9a   : > { %v1690_v39 = vadd.f32 0.041666668, %v1562_v41  ;;  %v1564_v12 = vmul.f32 %v1436_v52, %v3487_v40  ;;  %vm2458_vm0 = vcmp.ge.f32.partialorder %v3440_v62, 5.0  ;;  %v1310_v7 = vmul.f32 %v1182_v50, %v3506_v60 }
  0x9b   : > { %v1437_v43 = vadd.f32 -0.0013888889, %v1309_v1  ;;  %v1691_v54 = vadd.f32 0.041666668, %v1563_v35  ;;  %v928_v45 = vadd.f32 -2.755732e-07, %v800_v37  ;;  %v1311_v53 = vmul.f32 %v1183_v44, %v3511_v9 }
  0x9c   : > { %v801_v47 = vmul.f32 2.0876756e-09, %v3527_v38  ;;  %v1818_v48 = vmul.f32 %v1690_v39, %v3479_v57  ;;  %vm2459_vm1 = vcmp.ge.f32.partialorder %v3446_v5, 5.0  ;;  %v1692_v51 = vadd.f32 0.041666668, %v1564_v12  ;;  %v3558_v12 = vld [vmem:[%s3208_s30 + $0xc0] sm:$0xff] }
  0x9d   : > { %v1565_v61 = vmul.f32 %v1437_v43, %v3498_v49  ;;  %v1819_v63 = vmul.f32 %v1691_v54, %v3483_v8  ;;  %vm2460_vm2 = vcmp.ge.f32.partialorder %v3453_v21, 5.0  ;;  %v1438_v55 = vadd.f32 -0.0013888889, %v1310_v7  ;;  %v3566_v7 = vld [vmem:[%s3208_s30 + $0xc8] sm:$0xff] }
  0x9e   : > { %v1056_v56 = vmul.f32 %v928_v45, %v3520_v27  ;;  %v929_v58 = vadd.f32 -2.755732e-07, %v801_v47  ;;  %v1946_v59 = vadd.f32 -0.5, %v1818_v48  ;;  %v1820_v11 = vmul.f32 %v1692_v51, %v3487_v40 }
  0x9f   : > { %v1693_v20 = vadd.f32 0.041666668, %v1565_v61  ;;  %v1439_v30 = vadd.f32 -0.0013888889, %v1311_v53  ;;  %v1947_v3 = vadd.f32 -0.5, %v1819_v63  ;;  %vm2461_vm3 = vcmp.ge.f32.partialorder %v3464_v0, 5.0 }
  0xa0   : > { %v1566_v17 = vmul.f32 %v1438_v55, %v3506_v60  ;;  %v1184_v4 = vadd.f32 2.4801588e-05, %v1056_v56  ;;  %v1057_v10 = vmul.f32 %v929_v58, %v3527_v38  ;;  %v2074_v31 = vmul.f32 %v1946_v59, %v3479_v57  ;;  %v3577_v61 = vld [vmem:[%s3208_s30 + $0xd0] sm:$0xff]  ;;  %v3587_v0 = vld [vmem:[%s3208_s30 + $0xd8] sm:$0xff] }
  0xa1   : > { %v1948_v13 = vadd.f32 -0.5, %v1820_v11  ;;  %v1821_v32 = vmul.f32 %v1693_v20, %v3498_v49  ;;  %v1567_v42 = vmul.f32 %v1439_v30, %v3511_v9  ;;  %v2075_v14 = vmul.f32 %v1947_v3, %v3483_v8 }
  0xa2   : > { %v1694_v15 = vadd.f32 0.041666668, %v1566_v17  ;;  %v1312_v36 = vmul.f32 %v1184_v4, %v3520_v27  ;;  %v1185_v16 = vadd.f32 2.4801588e-05, %v1057_v10  ;;  %v2202_v24 = vadd.f32 1.0, %v2074_v31  ;;  %v3593_v10 = vld [vmem:[%s3208_s30 + $0xe0] sm:$0xff] }
  0xa3   : > { %v2076_v6 = vmul.f32 %v1948_v13, %v3487_v40  ;;  %v1949_v18 = vadd.f32 -0.5, %v1821_v32  ;;  %v1695_v2 = vadd.f32 0.041666668, %v1567_v42  ;;  %v2203_v19 = vadd.f32 1.0, %v2075_v14 }
  0xa4   : > { %v1822_v57 = vmul.f32 %v1694_v15, %v3506_v60  ;;  %v1440_v22 = vadd.f32 -0.0013888889, %v1312_v36  ;;  %v1313_v25 = vmul.f32 %v1185_v16, %v3527_v38  ;;  %v2330_v26 = vmul.f32 %v2202_v24, %v2202_v24 }
  0xa5   : > { %v2204_v28 = vadd.f32 1.0, %v2076_v6  ;;  %v2077_v8 = vmul.f32 %v1949_v18, %v3498_v49  ;;  %v1823_v41 = vmul.f32 %v1695_v2, %v3511_v9  ;;  %v2331_v52 = vmul.f32 %v2203_v19, %v2203_v19  ;;  %v3613_v19 = vld [vmem:[%s3208_s30 + $0xe8] sm:$0xff] }
  0xa6   : > { %v1950_v40 = vadd.f32 -0.5, %v1822_v57  ;;  %v1568_v1 = vmul.f32 %v1440_v22, %v3520_v27  ;;  %v1441_v29 = vadd.f32 -0.0013888889, %v1313_v25  ;;  %v2586_v35 = vsel %vm2458_vm0, 0.0, %v2330_v26 }
  0xa7   : > { %v2332_v50 = vmul.f32 %v2204_v28, %v2204_v28  ;;  %v2205_v37 = vadd.f32 1.0, %v2077_v8  ;;  %v1951_v39 = vadd.f32 -0.5, %v1823_v41  ;;  %2714 = vst [vmem:[%s3321_s17 + $0x80] sm:$0xff] %v2586_v35  ;;  %v2587_v49 = vsel %vm2459_vm1, 0.0, %v2331_v52 }
  0xa8   : > { %v2078_v43 = vmul.f32 %v1950_v40, %v3506_v60  ;;  %v1696_v44 = vadd.f32 0.041666668, %v1568_v1  ;;  %v1569_v54 = vmul.f32 %v1441_v29, %v3527_v38  ;;  %2715 = vst [vmem:[%s3321_s17 + $0x88] sm:$0xff] %v2587_v49  ;;  %vm2462_vm4 = vcmp.ge.f32.partialorder %v3471_v33, 5.0  ;;  %v3622_v29 = vld [vmem:[%s3208_s30 + $0xf0] sm:$0xff] }
  0xa9   : > { %v2588_v62 = vsel %vm2460_vm2, 0.0, %v2332_v50  ;;  %v2333_v45 = vmul.f32 %v2205_v37, %v2205_v37  ;;  %v2079_v47 = vmul.f32 %v1951_v39, %v3511_v9  ;;  %v290_v51 = vmul.f32 0.31415927, %v3558_v12  ;;  %v3629_v39 = vld [vmem:[%s3208_s30 + $0xf8] sm:$0xff] }
  0xaa   : > { %2716 = vst [vmem:[%s3321_s17 + $0x90] sm:$0xff] %v2588_v62  ;;  %v2206_v5 = vadd.f32 1.0, %v2078_v43  ;;  %v1824_v48 = vmul.f32 %v1696_v44, %v3520_v27  ;;  %v1697_v60 = vadd.f32 0.041666668, %v1569_v54  ;;  %vm2463_vm5 = vcmp.ge.f32.partialorder %v3476_v34, 5.0 }
  0xab   : > { %v2589_v53 = vsel %vm2461_vm3, 0.0, %v2333_v45  ;;  %v2207_v21 = vadd.f32 1.0, %v2079_v47  ;;  %v291_v9 = vmul.f32 0.31415927, %v3566_v7  ;;  %v418_v58 = vand.u32 2147483647, %v290_v51 }
  0xac   : > { %2717 = vst [vmem:[%s3321_s17 + $0x98] sm:$0xff] %v2589_v53  ;;  %v2334_v63 = vmul.f32 %v2206_v5, %v2206_v5  ;;  %v1952_v55 = vadd.f32 -0.5, %v1824_v48  ;;  %v1825_v56 = vmul.f32 %v1697_v60, %v3527_v38  ;;  %v292_v20 = vmul.f32 0.31415927, %v3577_v61 }
  0xad   : > { %v2335_v59 = vmul.f32 %v2207_v21, %v2207_v21  ;;  %v419_v11 = vand.u32 2147483647, %v291_v9  ;;  %v546_v4 = vmin.f32 %v418_v58, 1.5707964  ;;  %v293_v33 = vmul.f32 0.31415927, %v3587_v0 }
  0xae   : > { %v2590_v30 = vsel %vm2462_vm4, 0.0, %v2334_v63  ;;  %v2080_v3 = vmul.f32 %v1952_v55, %v3520_v27  ;;  %v1953_v17 = vadd.f32 -0.5, %v1825_v56  ;;  %v420_v32 = vand.u32 2147483647, %v292_v20 }
  0xaf   : > { %2718 = vst [vmem:[%s3321_s17 + $0xa0] sm:$0xff] %v2590_v30  ;;  %v2591_v31 = vsel %vm2463_vm5, 0.0, %v2335_v59  ;;  %v547_v13 = vmin.f32 %v419_v11, 1.5707964  ;;  %v3600_v15 = vmul.f32 %v546_v4, %v546_v4  ;;  %vm2464_vm6 = vcmp.ge.f32.partialorder %v3492_v23, 5.0 }
  0xb0   : > { %2719 = vst [vmem:[%s3321_s17 + $0xa8] sm:$0xff] %v2591_v31  ;;  %v2208_v42 = vadd.f32 1.0, %v2080_v3  ;;  %v2081_v14 = vmul.f32 %v1953_v17, %v3527_v38  ;;  %v548_v36 = vmin.f32 %v420_v32, 1.5707964  ;;  %v294_v34 = vmul.f32 0.31415927, %v3593_v10 }
  0xb1   : > { %v3604_v27 = vmul.f32 %v547_v13, %v547_v13  ;;  %v802_v6 = vmul.f32 2.0876756e-09, %v3600_v15  ;;  %v421_v18 = vand.u32 2147483647, %v293_v33  ;;  %vm2465_vm7 = vcmp.ge.f32.partialorder %v3495_v46, 5.0 }
  0xb2   : > { %v2336_v16 = vmul.f32 %v2208_v42, %v2208_v42  ;;  %v2209_v24 = vadd.f32 1.0, %v2081_v14  ;;  %v3610_v2 = vmul.f32 %v548_v36, %v548_v36  ;;  %v422_v23 = vand.u32 2147483647, %v294_v34 }
  0xb3   : > { %v803_v38 = vmul.f32 2.0876756e-09, %v3604_v27  ;;  %v930_v25 = vadd.f32 -2.755732e-07, %v802_v6  ;;  %v549_v26 = vmin.f32 %v421_v18, 1.5707964 }
  0xb4   : > { %v2592_v57 = vsel %vm2464_vm6, 0.0, %v2336_v16  ;;  %v2337_v22 = vmul.f32 %v2209_v24, %v2209_v24  ;;  %v804_v8 = vmul.f32 2.0876756e-09, %v3610_v2  ;;  %v550_v41 = vmin.f32 %v422_v23, 1.5707964 }
  0xb5   : > { %2720 = vst [vmem:[%s3321_s17 + $0xb0] sm:$0xff] %v2592_v57  ;;  %v931_v28 = vadd.f32 -2.755732e-07, %v803_v38  ;;  %v1058_v52 = vmul.f32 %v930_v25, %v3600_v15  ;;  %v3618_v40 = vmul.f32 %v549_v26, %v549_v26  ;;  %v295_v1 = vmul.f32 0.31415927, %v3613_v19 }
  0xb6   : > { %v2593_v46 = vsel %vm2465_vm7, 0.0, %v2337_v22  ;;  %v932_v50 = vadd.f32 -2.755732e-07, %v804_v8  ;;  %v3626_v37 = vmul.f32 %v550_v41, %v550_v41  ;;  %v296_v47 = vmul.f32 0.31415927, %v3622_v29 }
  0xb7   : > { %2721 = vst [vmem:[%s3321_s17 + $0xb8] sm:$0xff] %v2593_v46  ;;  %v1059_v35 = vmul.f32 %v931_v28, %v3604_v27  ;;  %v1186_v49 = vadd.f32 2.4801588e-05, %v1058_v52  ;;  %v805_v43 = vmul.f32 2.0876756e-09, %v3618_v40  ;;  %vm2466_vm8 = vcmp.ge.f32.partialorder %v3558_v12, 5.0 }
  0xb8   : > { %v423_v44 = vand.u32 2147483647, %v295_v1  ;;  %v1060_v62 = vmul.f32 %v932_v50, %v3610_v2  ;;  %v806_v45 = vmul.f32 2.0876756e-09, %v3626_v37  ;;  %v424_v9 = vand.u32 2147483647, %v296_v47 }
  0xb9   : > { %v1187_v54 = vadd.f32 2.4801588e-05, %v1059_v35  ;;  %v1314_v5 = vmul.f32 %v1186_v49, %v3600_v15  ;;  %v933_v48 = vadd.f32 -2.755732e-07, %v805_v43  ;;  %v297_v58 = vmul.f32 0.31415927, %v3629_v39 }
  0xba   : > { %v551_v60 = vmin.f32 %v423_v44, 1.5707964  ;;  %v1188_v53 = vadd.f32 2.4801588e-05, %v1060_v62  ;;  %v934_v21 = vadd.f32 -2.755732e-07, %v806_v45 }
  0xbb   : > { %v1315_v51 = vmul.f32 %v1187_v54, %v3604_v27  ;;  %v1442_v63 = vadd.f32 -0.0013888889, %v1314_v5  ;;  %v1061_v55 = vmul.f32 %v933_v48, %v3618_v40  ;;  %v552_v30 = vmin.f32 %v424_v9, 1.5707964 }
  0xbc   : > { %v3638_v56 = vmul.f32 %v551_v60, %v551_v60  ;;  %v1316_v11 = vmul.f32 %v1188_v53, %v3610_v2  ;;  %v1062_v20 = vmul.f32 %v934_v21, %v3626_v37  ;;  %v425_v31 = vand.u32 2147483647, %v297_v58 }
  0xbd   : > { %v1443_v59 = vadd.f32 -0.0013888889, %v1315_v51  ;;  %v1570_v3 = vmul.f32 %v1442_v63, %v3600_v15  ;;  %v1189_v17 = vadd.f32 2.4801588e-05, %v1061_v55  ;;  %v3646_v14 = vmul.f32 %v552_v30, %v552_v30 }
  0xbe   : > { %v807_v4 = vmul.f32 2.0876756e-09, %v3638_v56  ;;  %v1444_v32 = vadd.f32 -0.0013888889, %v1316_v11  ;;  %v1190_v42 = vadd.f32 2.4801588e-05, %v1062_v20 }
  0xbf   : > { %v1571_v13 = vmul.f32 %v1443_v59, %v3604_v27  ;;  %v1698_v33 = vadd.f32 0.041666668, %v1570_v3  ;;  %v1317_v36 = vmul.f32 %v1189_v17, %v3618_v40  ;;  %v553_v16 = vmin.f32 %v425_v31, 1.5707964 }
  0xc0   : > { %v935_v34 = vadd.f32 -2.755732e-07, %v807_v4  ;;  %v1572_v6 = vmul.f32 %v1444_v32, %v3610_v2  ;;  %v1318_v18 = vmul.f32 %v1190_v42, %v3626_v37  ;;  %v808_v38 = vmul.f32 2.0876756e-09, %v3646_v14 }
  0xc1   : > { %v1699_v24 = vadd.f32 0.041666668, %v1571_v13  ;;  %v1826_v23 = vmul.f32 %v1698_v33, %v3600_v15  ;;  %vm2467_vm9 = vcmp.ge.f32.partialorder %v3566_v7, 5.0  ;;  %v1445_v57 = vadd.f32 -0.0013888889, %v1317_v36  ;;  %v3679_v33 = vld [vmem:[%s3208_s30 + $0x100] sm:$0xff] }
  0xc2   : > { %v1063_v22 = vmul.f32 %v935_v34, %v3638_v56  ;;  %v3656_v25 = vmul.f32 %v553_v16, %v553_v16  ;;  %v1700_v28 = vadd.f32 0.041666668, %v1572_v6  ;;  %v1446_v8 = vadd.f32 -0.0013888889, %v1318_v18  ;;  %v3690_v18 = vld [vmem:[%s3208_s30 + $0x108] sm:$0xff] }
  0xc3   : > { %v1827_v26 = vmul.f32 %v1699_v24, %v3604_v27  ;;  %v936_v41 = vadd.f32 -2.755732e-07, %v808_v38  ;;  %v1954_v46 = vadd.f32 -0.5, %v1826_v23  ;;  %vm2468_vm10 = vcmp.ge.f32.partialorder %v3577_v61, 5.0 }
  0xc4   : > { %v1573_v52 = vmul.f32 %v1445_v57, %v3618_v40  ;;  %v1191_v1 = vadd.f32 2.4801588e-05, %v1063_v22  ;;  %v809_v35 = vmul.f32 2.0876756e-09, %v3656_v25  ;;  %v1828_v49 = vmul.f32 %v1700_v28, %v3610_v2 }
  0xc5   : > { %v1955_v50 = vadd.f32 -0.5, %v1827_v26  ;;  %v1574_v43 = vmul.f32 %v1446_v8, %v3626_v37  ;;  %v1064_v44 = vmul.f32 %v936_v41, %v3646_v14  ;;  %v2082_v54 = vmul.f32 %v1954_v46, %v3600_v15  ;;  %v3701_v46 = vld [vmem:[%s3208_s30 + $0x110] sm:$0xff] }
  0xc6   : > { %v1701_v62 = vadd.f32 0.041666668, %v1573_v52  ;;  %v1319_v45 = vmul.f32 %v1191_v1, %v3638_v56  ;;  %v937_v47 = vadd.f32 -2.755732e-07, %v809_v35  ;;  %v1956_v48 = vadd.f32 -0.5, %v1828_v49 }
  0xc7   : > { %v2083_v5 = vmul.f32 %v1955_v50, %v3604_v27  ;;  %v1702_v60 = vadd.f32 0.041666668, %v1574_v43  ;;  %v1192_v51 = vadd.f32 2.4801588e-05, %v1064_v44  ;;  %v2210_v53 = vadd.f32 1.0, %v2082_v54 }
  0xc8   : > { %v1829_v21 = vmul.f32 %v1701_v62, %v3618_v40  ;;  %v1447_v9 = vadd.f32 -0.0013888889, %v1319_v45  ;;  %v1065_v63 = vmul.f32 %v937_v47, %v3656_v25  ;;  %v2084_v58 = vmul.f32 %v1956_v48, %v3610_v2  ;;  %v3719_v48 = vld [vmem:[%s3208_s30 + $0x120] sm:$0xff] }
  0xc9   : > { %v2211_v55 = vadd.f32 1.0, %v2083_v5  ;;  %v1830_v15 = vmul.f32 %v1702_v60, %v3626_v37  ;;  %v1320_v59 = vmul.f32 %v1192_v51, %v3646_v14  ;;  %v2338_v11 = vmul.f32 %v2210_v53, %v2210_v53 }
  0xca   : > { %v1957_v27 = vadd.f32 -0.5, %v1829_v21  ;;  %v1575_v20 = vmul.f32 %v1447_v9, %v3638_v56  ;;  %v1193_v30 = vadd.f32 2.4801588e-05, %v1065_v63  ;;  %v2212_v17 = vadd.f32 1.0, %v2084_v58 }
  0xcb   : > { %v2339_v3 = vmul.f32 %v2211_v55, %v2211_v55  ;;  %v1958_v4 = vadd.f32 -0.5, %v1830_v15  ;;  %v1448_v31 = vadd.f32 -0.0013888889, %v1320_v59  ;;  %v2594_v13 = vsel %vm2466_vm8, 0.0, %v2338_v11  ;;  %v3730_v11 = vld [vmem:[%s3208_s30 + $0x128] sm:$0xff] }
  0xcc   : > { %v2085_v2 = vmul.f32 %v1957_v27, %v3618_v40  ;;  %v1703_v32 = vadd.f32 0.041666668, %v1575_v20  ;;  %v1321_v42 = vmul.f32 %v1193_v30, %v3656_v25  ;;  %2722 = vst [vmem:[%s3321_s17 + $0xc0] sm:$0xff] %v2594_v13  ;;  %v2340_v34 = vmul.f32 %v2212_v17, %v2212_v17 }
  0xcd   : > { %v2595_v36 = vsel %vm2467_vm9, 0.0, %v2339_v3  ;;  %v2086_v16 = vmul.f32 %v1958_v4, %v3626_v37  ;;  %v1576_v24 = vmul.f32 %v1448_v31, %v3646_v14  ;;  %vm2469_vm11 = vcmp.ge.f32.partialorder %v3587_v0, 5.0 }
  0xce   : > { %2723 = vst [vmem:[%s3321_s17 + $0xc8] sm:$0xff] %v2595_v36  ;;  %v2213_v12 = vadd.f32 1.0, %v2085_v2  ;;  %v1831_v40 = vmul.f32 %v1703_v32, %v3638_v56  ;;  %v1449_v6 = vadd.f32 -0.0013888889, %v1321_v42  ;;  %v2596_v38 = vsel %vm2468_vm10, 0.0, %v2340_v34  ;;  %v3743_v32 = vld [vmem:[%s3208_s30 + $0x130] sm:$0xff] }
  0xcf   : > { %v2214_v7 = vadd.f32 1.0, %v2086_v16  ;;  %v1704_v23 = vadd.f32 0.041666668, %v1576_v24  ;;  %v298_v37 = vmul.f32 0.31415927, %v3679_v33  ;;  %2724 = vst [vmem:[%s3321_s17 + $0xd0] sm:$0xff] %v2596_v38 }
  0xd0   : > { %v2341_v57 = vmul.f32 %v2213_v12, %v2213_v12  ;;  %vm2470_vm12 = vcmp.ge.f32.partialorder %v3593_v10, 5.0  ;;  %v1959_v22 = vadd.f32 -0.5, %v1831_v40  ;;  %v1577_v26 = vmul.f32 %v1449_v6, %v3656_v25  ;;  %v3707_v10 = vld [vmem:[%s3208_s30 + $0x118] sm:$0xff] }
  0xd1   : > { %v2342_v28 = vmul.f32 %v2214_v7, %v2214_v7  ;;  %v1832_v8 = vmul.f32 %v1704_v23, %v3646_v14  ;;  %v426_v41 = vand.u32 2147483647, %v298_v37  ;;  %v299_v61 = vmul.f32 0.31415927, %v3690_v18  ;;  %v3755_v23 = vld [vmem:[%s3208_s30 + $0x138] sm:$0xff] }
  0xd2   : > { %v2597_v52 = vsel %vm2469_vm11, 0.0, %v2341_v57  ;;  %v2087_v1 = vmul.f32 %v1959_v22, %v3638_v56  ;;  %v1705_v35 = vadd.f32 0.041666668, %v1577_v26  ;;  %vm2471_vm13 = vcmp.ge.f32.partialorder %v3613_v19, 5.0 }
  0xd3   : > { %2725 = vst [vmem:[%s3321_s17 + $0xd8] sm:$0xff] %v2597_v52  ;;  %v2598_v50 = vsel %vm2470_vm12, 0.0, %v2342_v28  ;;  %v1960_v49 = vadd.f32 -0.5, %v1832_v8  ;;  %v554_v43 = vmin.f32 %v426_v41, 1.5707964  ;;  %vm2472_vm14 = vcmp.ge.f32.partialorder %v3622_v29, 5.0 }
  0xd4   : > { %v427_v44 = vand.u32 2147483647, %v299_v61  ;;  %2726 = vst [vmem:[%s3321_s17 + $0xe0] sm:$0xff] %v2598_v50  ;;  %v2215_v54 = vadd.f32 1.0, %v2087_v1  ;;  %v1833_v62 = vmul.f32 %v1705_v35, %v3656_v25  ;;  %v300_v0 = vmul.f32 0.31415927, %v3701_v46 }
  0xd5   : > { %v2088_v45 = vmul.f32 %v1960_v49, %v3646_v14  ;;  %v3715_v56 = vmul.f32 %v554_v43, %v554_v43  ;;  %v301_v5 = vmul.f32 0.31415927, %v3707_v10  ;;  %v302_v59 = vmul.f32 0.31415927, %v3719_v48 }
  0xd6   : > { %v555_v47 = vmin.f32 %v427_v44, 1.5707964  ;;  %v2343_v60 = vmul.f32 %v2215_v54, %v2215_v54  ;;  %v1961_v51 = vadd.f32 -0.5, %v1833_v62  ;;  %v428_v53 = vand.u32 2147483647, %v300_v0 }
  0xd7   : > { %v2216_v21 = vadd.f32 1.0, %v2088_v45  ;;  %v810_v9 = vmul.f32 2.0876756e-09, %v3715_v56  ;;  %v429_v14 = vand.u32 2147483647, %v301_v5  ;;  %vm2473_vm15 = vcmp.ge.f32.partialorder %v3629_v39, 5.0 }
  0xd8   : > { %v3723_v63 = vmul.f32 %v555_v47, %v555_v47  ;;  %v2599_v55 = vsel %vm2471_vm13, 0.0, %v2343_v60  ;;  %v2089_v58 = vmul.f32 %v1961_v51, %v3656_v25  ;;  %v556_v15 = vmin.f32 %v428_v53, 1.5707964 }
  0xd9   : > { %2727 = vst [vmem:[%s3321_s17 + $0xe8] sm:$0xff] %v2599_v55  ;;  %v2344_v27 = vmul.f32 %v2216_v21, %v2216_v21  ;;  %v938_v20 = vadd.f32 -2.755732e-07, %v810_v9  ;;  %v557_v3 = vmin.f32 %v429_v14, 1.5707964  ;;  %vm2474_vm0 = vcmp.ge.f32.partialorder %v3679_v33, 5.0 }
  0xda   : > { %v811_v30 = vmul.f32 2.0876756e-09, %v3723_v63  ;;  %v2217_v17 = vadd.f32 1.0, %v2089_v58  ;;  %v3735_v19 = vmul.f32 %v556_v15, %v556_v15  ;;  %v430_v4 = vand.u32 2147483647, %v302_v59 }
  0xdb   : > { %v2600_v25 = vsel %vm2472_vm14, 0.0, %v2344_v27  ;;  %v1066_v31 = vmul.f32 %v938_v20, %v3715_v56  ;;  %v3740_v2 = vmul.f32 %v557_v3, %v557_v3  ;;  %v303_v16 = vmul.f32 0.31415927, %v3730_v11 }
  0xdc   : > { %v939_v13 = vadd.f32 -2.755732e-07, %v811_v30  ;;  %2728 = vst [vmem:[%s3321_s17 + $0xf0] sm:$0xff] %v2600_v25  ;;  %v2345_v42 = vmul.f32 %v2217_v17, %v2217_v17  ;;  %v812_v36 = vmul.f32 2.0876756e-09, %v3735_v19  ;;  %vm2475_vm1 = vcmp.ge.f32.partialorder %v3690_v18, 5.0 }
  0xdd   : > { %v558_v34 = vmin.f32 %v430_v4, 1.5707964  ;;  %v1194_v24 = vadd.f32 2.4801588e-05, %v1066_v31  ;;  %v813_v12 = vmul.f32 2.0876756e-09, %v3740_v2 }
  0xde   : > { %v1067_v29 = vmul.f32 %v939_v13, %v3723_v63  ;;  %v2601_v40 = vsel %vm2473_vm15, 0.0, %v2345_v42  ;;  %v940_v6 = vadd.f32 -2.755732e-07, %v812_v36  ;;  %v431_v7 = vand.u32 2147483647, %v303_v16 }
  0xdf   : > { %v3752_v38 = vmul.f32 %v558_v34, %v558_v34  ;;  %2729 = vst [vmem:[%s3321_s17 + $0xf8] sm:$0xff] %v2601_v40  ;;  %v1322_v37 = vmul.f32 %v1194_v24, %v3715_v56  ;;  %v941_v22 = vadd.f32 -2.755732e-07, %v813_v12  ;;  %v304_v26 = vmul.f32 0.31415927, %v3743_v32 }
  0xe0   : > { %v1195_v57 = vadd.f32 2.4801588e-05, %v1067_v29  ;;  %v1068_v28 = vmul.f32 %v940_v6, %v3735_v19  ;;  %v559_v41 = vmin.f32 %v431_v7, 1.5707964  ;;  %v305_v43 = vmul.f32 0.31415927, %v3755_v23 }
  0xe1   : > { %v814_v8 = vmul.f32 2.0876756e-09, %v3752_v38  ;;  %v1450_v39 = vadd.f32 -0.0013888889, %v1322_v37  ;;  %v1069_v52 = vmul.f32 %v941_v22, %v3740_v2  ;;  %v432_v1 = vand.u32 2147483647, %v304_v26 }
  0xe2   : > { %v1323_v61 = vmul.f32 %v1195_v57, %v3723_v63  ;;  %v1196_v35 = vadd.f32 2.4801588e-05, %v1068_v28  ;;  %v3764_v49 = vmul.f32 %v559_v41, %v559_v41  ;;  %v433_v60 = vand.u32 2147483647, %v305_v43 }
  0xe3   : > { %v942_v50 = vadd.f32 -2.755732e-07, %v814_v8  ;;  %v1578_v44 = vmul.f32 %v1450_v39, %v3715_v56  ;;  %v1197_v62 = vadd.f32 2.4801588e-05, %v1069_v52  ;;  %v560_v0 = vmin.f32 %v432_v1, 1.5707964 }
  0xe4   : > { %v1451_v54 = vadd.f32 -0.0013888889, %v1323_v61  ;;  %v1324_v45 = vmul.f32 %v1196_v35, %v3735_v19  ;;  %v815_v5 = vmul.f32 2.0876756e-09, %v3764_v49  ;;  %v561_v4 = vmin.f32 %v433_v60, 1.5707964 }
  0xe5   : > { %v1070_v47 = vmul.f32 %v942_v50, %v3752_v38  ;;  %v1706_v51 = vadd.f32 0.041666668, %v1578_v44  ;;  %v1325_v21 = vmul.f32 %v1197_v62, %v3740_v2  ;;  %v3773_v9 = vmul.f32 %v560_v0, %v560_v0  ;;  %v3801_v62 = vld [vmem:[%s3208_s30 + $0x140] sm:$0xff] }
  0xe6   : > { %v1579_v53 = vmul.f32 %v1451_v54, %v3723_v63  ;;  %v1452_v14 = vadd.f32 -0.0013888889, %v1324_v45  ;;  %v943_v58 = vadd.f32 -2.755732e-07, %v815_v5  ;;  %v3784_v24 = vmul.f32 %v561_v4, %v561_v4 }
  0xe7   : > { %v1198_v55 = vadd.f32 2.4801588e-05, %v1070_v47  ;;  %v1834_v15 = vmul.f32 %v1706_v51, %v3715_v56  ;;  %v1453_v27 = vadd.f32 -0.0013888889, %v1325_v21  ;;  %v816_v20 = vmul.f32 2.0876756e-09, %v3773_v9 }
  0xe8   : > { %v1707_v59 = vadd.f32 0.041666668, %v1579_v53  ;;  %v1580_v30 = vmul.f32 %v1452_v14, %v3735_v19  ;;  %v1071_v17 = vmul.f32 %v943_v58, %v3764_v49  ;;  %vm2476_vm2 = vcmp.ge.f32.partialorder %v3701_v46, 5.0 }
  0xe9   : > { %v1326_v3 = vmul.f32 %v1198_v55, %v3752_v38  ;;  %v1962_v25 = vadd.f32 -0.5, %v1834_v15  ;;  %v1581_v13 = vmul.f32 %v1453_v27, %v3740_v2  ;;  %v944_v42 = vadd.f32 -2.755732e-07, %v816_v20  ;;  %v3816_v27 = vld [vmem:[%s3208_s30 + $0x148] sm:$0xff] }
  0xea   : > { %v1835_v31 = vmul.f32 %v1707_v59, %v3723_v63  ;;  %v1708_v36 = vadd.f32 0.041666668, %v1580_v30  ;;  %v1199_v16 = vadd.f32 2.4801588e-05, %v1071_v17  ;;  %v817_v22 = vmul.f32 2.0876756e-09, %v3784_v24 }
  0xeb   : > { %v1454_v34 = vadd.f32 -0.0013888889, %v1326_v3  ;;  %v2090_v29 = vmul.f32 %v1962_v25, %v3715_v56  ;;  %v1709_v40 = vadd.f32 0.041666668, %v1581_v13  ;;  %v1072_v6 = vmul.f32 %v944_v42, %v3773_v9 }
  0xec   : > { %v1963_v12 = vadd.f32 -0.5, %v1835_v31  ;;  %v1836_v7 = vmul.f32 %v1708_v36, %v3735_v19  ;;  %v1327_v57 = vmul.f32 %v1199_v16, %v3764_v49  ;;  %vm2477_vm3 = vcmp.ge.f32.partialorder %v3707_v10, 5.0  ;;  %v3836_v10 = vld [vmem:[%s3208_s30 + $0x158] sm:$0xff] }
  0xed   : > { %v1582_v37 = vmul.f32 %v1454_v34, %v3752_v38  ;;  %v2218_v26 = vadd.f32 1.0, %v2090_v29  ;;  %v1837_v56 = vmul.f32 %v1709_v40, %v3740_v2  ;;  %v1200_v8 = vadd.f32 2.4801588e-05, %v1072_v6 }
  0xee   : > { %v2091_v28 = vmul.f32 %v1963_v12, %v3723_v63  ;;  %v1964_v41 = vadd.f32 -0.5, %v1836_v7  ;;  %v1455_v61 = vadd.f32 -0.0013888889, %v1327_v57  ;;  %v945_v54 = vadd.f32 -2.755732e-07, %v817_v22  ;;  %v3843_v22 = vld [vmem:[%s3208_s30 + $0x160] sm:$0xff] }
  0xef   : > { %v1710_v39 = vadd.f32 0.041666668, %v1582_v37  ;;  %v2346_v52 = vmul.f32 %v2218_v26, %v2218_v26  ;;  %v1965_v35 = vadd.f32 -0.5, %v1837_v56  ;;  %v1328_v50 = vmul.f32 %v1200_v8, %v3773_v9 }
  0xf0   : > { %v2219_v1 = vadd.f32 1.0, %v2091_v28  ;;  %v2092_v43 = vmul.f32 %v1964_v41, %v3735_v19  ;;  %v1583_v63 = vmul.f32 %v1455_v61, %v3764_v49  ;;  %v1073_v53 = vmul.f32 %v945_v54, %v3784_v24 }
  0xf1   : > { %v1838_v44 = vmul.f32 %v1710_v39, %v3752_v38  ;;  %v2602_v0 = vsel %vm2474_vm0, 0.0, %v2346_v52  ;;  %v2093_v47 = vmul.f32 %v1965_v35, %v3740_v2  ;;  %v1456_v5 = vadd.f32 -0.0013888889, %v1328_v50 }
  0xf2   : > { %v2347_v45 = vmul.f32 %v2219_v1, %v2219_v1  ;;  %2730 = vst [vmem:[%s3321_s17 + $0x100] sm:$0xff] %v2602_v0  ;;  %v2220_v60 = vadd.f32 1.0, %v2092_v43  ;;  %v1711_v19 = vadd.f32 0.041666668, %v1583_v63  ;;  %v306_v33 = vmul.f32 0.31415927, %v3801_v62 }
  0xf3   : > { %v1966_v51 = vadd.f32 -0.5, %v1838_v44  ;;  %v2221_v14 = vadd.f32 1.0, %v2093_v47  ;;  %v1584_v55 = vmul.f32 %v1456_v5, %v3773_v9  ;;  %v1201_v59 = vadd.f32 2.4801588e-05, %v1073_v53 }
  0xf4   : > { %v2603_v21 = vsel %vm2475_vm1, 0.0, %v2347_v45  ;;  %v2348_v2 = vmul.f32 %v2220_v60, %v2220_v60  ;;  %v1839_v15 = vmul.f32 %v1711_v19, %v3764_v49  ;;  %vm2478_vm4 = vcmp.ge.f32.partialorder %v3719_v48, 5.0  ;;  %v3862_v45 = vld [vmem:[%s3208_s30 + $0x168] sm:$0xff]  ;;  %v3865_v60 = vld [vmem:[%s3208_s30 + $0x170] sm:$0xff] }
  0xf5   : > { %2731 = vst [vmem:[%s3321_s17 + $0x108] sm:$0xff] %v2603_v21  ;;  %v2094_v58 = vmul.f32 %v1966_v51, %v3752_v38  ;;  %v2349_v20 = vmul.f32 %v2221_v14, %v2221_v14  ;;  %v1712_v18 = vadd.f32 0.041666668, %v1584_v55  ;;  %v434_v30 = vand.u32 2147483647, %v306_v33  ;;  %v3823_v38 = vld [vmem:[%s3208_s30 + $0x150] sm:$0xff] }
  0xf6   : > { %v2604_v3 = vsel %vm2476_vm2, 0.0, %v2348_v2  ;;  %v1967_v4 = vadd.f32 -0.5, %v1839_v15  ;;  %v1329_v25 = vmul.f32 %v1201_v59, %v3784_v24  ;;  %v307_v36 = vmul.f32 0.31415927, %v3816_v27 }
  0xf7   : > { %v2222_v17 = vadd.f32 1.0, %v2094_v58  ;;  %2732 = vst [vmem:[%s3321_s17 + $0x110] sm:$0xff] %v2604_v3  ;;  %v2605_v31 = vsel %vm2477_vm3, 0.0, %v2349_v20  ;;  %v1840_v13 = vmul.f32 %v1712_v18, %v3773_v9  ;;  %v562_v42 = vmin.f32 %v434_v30, 1.5707964 }
  0xf8   : > { %2733 = vst [vmem:[%s3321_s17 + $0x118] sm:$0xff] %v2605_v31  ;;  %v2095_v34 = vmul.f32 %v1967_v4, %v3764_v49  ;;  %v1457_v16 = vadd.f32 -0.0013888889, %v1329_v25  ;;  %v435_v40 = vand.u32 2147483647, %v307_v36  ;;  %vm2479_vm5 = vcmp.ge.f32.partialorder %v3730_v11, 5.0 }
  0xf9   : > { %v2350_v46 = vmul.f32 %v2222_v17, %v2222_v17  ;;  %v1968_v29 = vadd.f32 -0.5, %v1840_v13  ;;  %v3832_v12 = vmul.f32 %v562_v42, %v562_v42  ;;  %v308_v6 = vmul.f32 0.31415927, %v3823_v38 }
  0xfa   : > { %v2223_v37 = vadd.f32 1.0, %v2095_v34  ;;  %v1585_v57 = vmul.f32 %v1457_v16, %v3784_v24  ;;  %v563_v28 = vmin.f32 %v435_v40, 1.5707964  ;;  %vm2480_vm6 = vcmp.ge.f32.partialorder %v3743_v32, 5.0 }
  0xfb   : > { %v2606_v7 = vsel %vm2478_vm4, 0.0, %v2350_v46  ;;  %v2096_v49 = vmul.f32 %v1968_v29, %v3773_v9  ;;  %v818_v26 = vmul.f32 2.0876756e-09, %v3832_v12  ;;  %v436_v56 = vand.u32 2147483647, %v308_v6 }
  0xfc   : > { %2734 = vst [vmem:[%s3321_s17 + $0x120] sm:$0xff] %v2606_v7  ;;  %v2351_v8 = vmul.f32 %v2223_v37, %v2223_v37  ;;  %v1713_v48 = vadd.f32 0.041666668, %v1585_v57  ;;  %v309_v41 = vmul.f32 0.31415927, %v3836_v10  ;;  %v3850_v52 = vmul.f32 %v563_v28, %v563_v28  ;;  %v3890_v7 = vld [vmem:[%s3208_s30 + $0x178] sm:$0xff] }
  0xfd   : > { %v2224_v39 = vadd.f32 1.0, %v2096_v49  ;;  %v946_v61 = vadd.f32 -2.755732e-07, %v818_v26  ;;  %v564_v1 = vmin.f32 %v436_v56, 1.5707964  ;;  %vm2481_vm7 = vcmp.ge.f32.partialorder %v3755_v23, 5.0 }
  0xfe   : > { %v2607_v9 = vsel %vm2479_vm5, 0.0, %v2351_v8  ;;  %v1841_v35 = vmul.f32 %v1713_v48, %v3784_v24  ;;  %v437_v50 = vand.u32 2147483647, %v309_v41  ;;  %v310_v43 = vmul.f32 0.31415927, %v3843_v22 }
  0xff   : > { %2735 = vst [vmem:[%s3321_s17 + $0x128] sm:$0xff] %v2607_v9  ;;  %v2352_v44 = vmul.f32 %v2224_v39, %v2224_v39  ;;  %v1074_v63 = vmul.f32 %v946_v61, %v3832_v12  ;;  %v819_v54 = vmul.f32 2.0876756e-09, %v3850_v52  ;;  %v3859_v0 = vmul.f32 %v564_v1, %v564_v1 }
 0x100   : > { %v1969_v47 = vadd.f32 -0.5, %v1841_v35  ;;  %v565_v5 = vmin.f32 %v437_v50, 1.5707964  ;;  %v438_v11 = vand.u32 2147483647, %v310_v43  ;;  %vm2482_vm8 = vcmp.ge.f32.partialorder %v3801_v62, 5.0 }
 0x101   : > { %v2608_v51 = vsel %vm2480_vm6, 0.0, %v2352_v44  ;;  %v1202_v19 = vadd.f32 2.4801588e-05, %v1074_v63  ;;  %v947_v53 = vadd.f32 -2.755732e-07, %v819_v54  ;;  %vm2483_vm9 = vcmp.ge.f32.partialorder %v3816_v27, 5.0 }
 0x102   : > { %2736 = vst [vmem:[%s3321_s17 + $0x130] sm:$0xff] %v2608_v51  ;;  %v2097_v21 = vmul.f32 %v1969_v47, %v3784_v24  ;;  %v820_v14 = vmul.f32 2.0876756e-09, %v3859_v0  ;;  %v3873_v55 = vmul.f32 %v565_v5, %v565_v5  ;;  %v566_v33 = vmin.f32 %v438_v11, 1.5707964 }
 0x103   : > { %v1330_v2 = vmul.f32 %v1202_v19, %v3832_v12  ;;  %v1075_v58 = vmul.f32 %v947_v53, %v3850_v52  ;;  %v311_v15 = vmul.f32 0.31415927, %v3862_v45  ;;  %v312_v32 = vmul.f32 0.31415927, %v3865_v60 }
 0x104   : > { %v2225_v59 = vadd.f32 1.0, %v2097_v21  ;;  %v948_v20 = vadd.f32 -2.755732e-07, %v820_v14  ;;  %v821_v18 = vmul.f32 2.0876756e-09, %v3873_v55  ;;  %v3880_v30 = vmul.f32 %v566_v33, %v566_v33 }
 0x105   : > { %v1458_v24 = vadd.f32 -0.0013888889, %v1330_v2  ;;  %v1203_v3 = vadd.f32 2.4801588e-05, %v1075_v58  ;;  %v439_v17 = vand.u32 2147483647, %v311_v15 }
 0x106   : > { %v2353_v4 = vmul.f32 %v2225_v59, %v2225_v59  ;;  %v1076_v25 = vmul.f32 %v948_v20, %v3859_v0  ;;  %v949_v31 = vadd.f32 -2.755732e-07, %v821_v18  ;;  %v822_v13 = vmul.f32 2.0876756e-09, %v3880_v30 }
 0x107   : > { %v1586_v42 = vmul.f32 %v1458_v24, %v3832_v12  ;;  %v1331_v36 = vmul.f32 %v1203_v3, %v3850_v52  ;;  %v567_v46 = vmin.f32 %v439_v17, 1.5707964  ;;  %v440_v34 = vand.u32 2147483647, %v312_v32 }
 0x108   : > { %v2609_v16 = vsel %vm2481_vm7, 0.0, %v2353_v4  ;;  %v1204_v29 = vadd.f32 2.4801588e-05, %v1076_v25  ;;  %v1077_v40 = vmul.f32 %v949_v31, %v3873_v55  ;;  %v950_v6 = vadd.f32 -2.755732e-07, %v822_v13 }
 0x109   : > { %2737 = vst [vmem:[%s3321_s17 + $0x138] sm:$0xff] %v2609_v16  ;;  %v1714_v37 = vadd.f32 0.041666668, %v1586_v42  ;;  %v1459_v57 = vadd.f32 -0.0013888889, %v1331_v36  ;;  %v3893_v49 = vmul.f32 %v567_v46, %v567_v46  ;;  %vm2484_vm10 = vcmp.ge.f32.partialorder %v3823_v38, 5.0 }
 0x10a   : > { %v568_v26 = vmin.f32 %v440_v34, 1.5707964  ;;  %v1332_v28 = vmul.f32 %v1204_v29, %v3859_v0  ;;  %v1205_v56 = vadd.f32 2.4801588e-05, %v1077_v40  ;;  %v1078_v8 = vmul.f32 %v950_v6, %v3880_v30  ;;  %v3924_v46 = vld [vmem:[%s3208_s30 + $0x180] sm:$0xff] }
 0x10b   : > { %v1842_v23 = vmul.f32 %v1714_v37, %v3832_v12  ;;  %v1587_v48 = vmul.f32 %v1459_v57, %v3850_v52  ;;  %v823_v41 = vmul.f32 2.0876756e-09, %v3893_v49  ;;  %v313_v35 = vmul.f32 0.31415927, %v3890_v7 }
 0x10c   : > { %v3900_v39 = vmul.f32 %v568_v26, %v568_v26  ;;  %v1460_v61 = vadd.f32 -0.0013888889, %v1332_v28  ;;  %v1333_v1 = vmul.f32 %v1205_v56, %v3873_v55  ;;  %v1206_v9 = vadd.f32 2.4801588e-05, %v1078_v8 }
 0x10d   : > { %v1970_v50 = vadd.f32 -0.5, %v1842_v23  ;;  %v1715_v43 = vadd.f32 0.041666668, %v1587_v48  ;;  %v951_v44 = vadd.f32 -2.755732e-07, %v823_v41  ;;  %vm2485_vm11 = vcmp.ge.f32.partialorder %v3836_v10, 5.0 }
 0x10e   : > { %v1588_v63 = vmul.f32 %v1460_v61, %v3859_v0  ;;  %v1461_v54 = vadd.f32 -0.0013888889, %v1333_v1  ;;  %v1334_v47 = vmul.f32 %v1206_v9, %v3880_v30  ;;  %v824_v5 = vmul.f32 2.0876756e-09, %v3900_v39 }
 0x10f   : > { %v2098_v11 = vmul.f32 %v1970_v50, %v3832_v12  ;;  %v1843_v51 = vmul.f32 %v1715_v43, %v3850_v52  ;;  %v1079_v19 = vmul.f32 %v951_v44, %v3893_v49  ;;  %v441_v53 = vand.u32 2147483647, %v313_v35 }
 0x110   : > { %v1716_v21 = vadd.f32 0.041666668, %v1588_v63  ;;  %v1589_v14 = vmul.f32 %v1461_v54, %v3873_v55  ;;  %v1462_v33 = vadd.f32 -0.0013888889, %v1334_v47  ;;  %v952_v2 = vadd.f32 -2.755732e-07, %v824_v5 }
 0x111   : > { %v2226_v58 = vadd.f32 1.0, %v2098_v11  ;;  %v1971_v15 = vadd.f32 -0.5, %v1843_v51  ;;  %v1207_v32 = vadd.f32 2.4801588e-05, %v1079_v19  ;;  %v569_v59 = vmin.f32 %v441_v53, 1.5707964 }
 0x112   : > { %v1844_v20 = vmul.f32 %v1716_v21, %v3859_v0  ;;  %v1717_v12 = vadd.f32 0.041666668, %v1589_v14  ;;  %v1590_v18 = vmul.f32 %v1462_v33, %v3880_v30  ;;  %v1080_v24 = vmul.f32 %v952_v2, %v3900_v39  ;;  %v3943_v63 = vld [vmem:[%s3208_s30 + $0x188] sm:$0xff]  ;;  %v3955_v14 = vld [vmem:[%s3208_s30 + $0x190] sm:$0xff] }
 0x113   : > { %v2354_v3 = vmul.f32 %v2226_v58, %v2226_v58  ;;  %v2099_v17 = vmul.f32 %v1971_v15, %v3850_v52  ;;  %v1335_v4 = vmul.f32 %v1207_v32, %v3893_v49  ;;  %v3920_v25 = vmul.f32 %v569_v59, %v569_v59  ;;  %v3961_v58 = vld [vmem:[%s3208_s30 + $0x198] sm:$0xff] }
 0x114   : > { %v1972_v31 = vadd.f32 -0.5, %v1844_v20  ;;  %v1845_v13 = vmul.f32 %v1717_v12, %v3873_v55  ;;  %v1718_v42 = vadd.f32 0.041666668, %v1590_v18  ;;  %v1208_v36 = vadd.f32 2.4801588e-05, %v1080_v24 }
 0x115   : > { %v2610_v34 = vsel %vm2482_vm8, 0.0, %v2354_v3  ;;  %v2227_v16 = vadd.f32 1.0, %v2099_v17  ;;  %v1463_v29 = vadd.f32 -0.0013888889, %v1335_v4  ;;  %v825_v52 = vmul.f32 2.0876756e-09, %v3920_v25 }
 0x116   : > { %2738 = vst [vmem:[%s3321_s17 + $0x140] sm:$0xff] %v2610_v34  ;;  %v2100_v40 = vmul.f32 %v1972_v31, %v3859_v0  ;;  %v1973_v6 = vadd.f32 -0.5, %v1845_v13  ;;  %v1846_v37 = vmul.f32 %v1718_v42, %v3880_v30  ;;  %v1336_v57 = vmul.f32 %v1208_v36, %v3900_v39 }
 0x117   : > { %v2355_v26 = vmul.f32 %v2227_v16, %v2227_v16  ;;  %v1591_v28 = vmul.f32 %v1463_v29, %v3893_v49  ;;  %v953_v56 = vadd.f32 -2.755732e-07, %v825_v52  ;;  %v314_v62 = vmul.f32 0.31415927, %v3924_v46  ;;  %v3978_v16 = vld [vmem:[%s3208_s30 + $0x1a0] sm:$0xff]  ;;  %v3981_v29 = vld [vmem:[%s3208_s30 + $0x1a8] sm:$0xff] }
 0x118   : > { %v2228_v8 = vadd.f32 1.0, %v2100_v40  ;;  %v2101_v23 = vmul.f32 %v1973_v6, %v3873_v55  ;;  %v1974_v48 = vadd.f32 -0.5, %v1846_v37  ;;  %v1464_v41 = vadd.f32 -0.0013888889, %v1336_v57 }
 0x119   : > { %v2611_v0 = vsel %vm2483_vm9, 0.0, %v2355_v26  ;;  %v1719_v61 = vadd.f32 0.041666668, %v1591_v28  ;;  %v1081_v1 = vmul.f32 %v953_v56, %v3920_v25  ;;  %v442_v9 = vand.u32 2147483647, %v314_v62 }
 0x11a   : > { %2739 = vst [vmem:[%s3321_s17 + $0x148] sm:$0xff] %v2611_v0  ;;  %v2356_v35 = vmul.f32 %v2228_v8, %v2228_v8  ;;  %v2229_v50 = vadd.f32 1.0, %v2101_v23  ;;  %v2102_v43 = vmul.f32 %v1974_v48, %v3880_v30  ;;  %v1592_v44 = vmul.f32 %v1464_v41, %v3900_v39 }
 0x11b   : > { %vm2486_vm12 = vcmp.ge.f32.partialorder %v3843_v22, 5.0  ;;  %v1847_v27 = vmul.f32 %v1719_v61, %v3893_v49  ;;  %v1209_v55 = vadd.f32 2.4801588e-05, %v1081_v1  ;;  %v570_v54 = vmin.f32 %v442_v9, 1.5707964 }
 0x11c   : > { %v2612_v47 = vsel %vm2484_vm10, 0.0, %v2356_v35  ;;  %v2357_v5 = vmul.f32 %v2229_v50, %v2229_v50  ;;  %v2230_v11 = vadd.f32 1.0, %v2102_v43  ;;  %v1720_v51 = vadd.f32 0.041666668, %v1592_v44 }
 0x11d   : > { %2740 = vst [vmem:[%s3321_s17 + $0x150] sm:$0xff] %v2612_v47  ;;  %v1975_v30 = vadd.f32 -0.5, %v1847_v27  ;;  %v1337_v19 = vmul.f32 %v1209_v55, %v3920_v25  ;;  %v3951_v53 = vmul.f32 %v570_v54, %v570_v54  ;;  %v315_v21 = vmul.f32 0.31415927, %v3943_v63 }
 0x11e   : > { %v2613_v33 = vsel %vm2485_vm11, 0.0, %v2357_v5  ;;  %v2358_v2 = vmul.f32 %v2230_v11, %v2230_v11  ;;  %v1848_v38 = vmul.f32 %v1720_v51, %v3900_v39  ;;  %v316_v10 = vmul.f32 0.31415927, %v3955_v14  ;;  %v4003_v51 = vld [vmem:[%s3208_s30 + $0x1b0] sm:$0xff] }
 0x11f   : > { %2741 = vst [vmem:[%s3321_s17 + $0x158] sm:$0xff] %v2613_v33  ;;  %v2103_v15 = vmul.f32 %v1975_v30, %v3893_v49  ;;  %v1465_v32 = vadd.f32 -0.0013888889, %v1337_v19  ;;  %v826_v59 = vmul.f32 2.0876756e-09, %v3951_v53  ;;  %vm2487_vm13 = vcmp.ge.f32.partialorder %v3862_v45, 5.0 }
 0x120   : > { %v443_v20 = vand.u32 2147483647, %v315_v21  ;;  %v2614_v12 = vsel %vm2486_vm12, 0.0, %v2358_v2  ;;  %v1976_v18 = vadd.f32 -0.5, %v1848_v38  ;;  %v444_v31 = vand.u32 2147483647, %v316_v10 }
 0x121   : > { %2742 = vst [vmem:[%s3321_s17 + $0x160] sm:$0xff] %v2614_v12  ;;  %v2231_v24 = vadd.f32 1.0, %v2103_v15  ;;  %v1593_v3 = vmul.f32 %v1465_v32, %v3920_v25  ;;  %v954_v17 = vadd.f32 -2.755732e-07, %v826_v59  ;;  %v317_v22 = vmul.f32 0.31415927, %v3961_v58 }
 0x122   : > { %v571_v4 = vmin.f32 %v443_v20, 1.5707964  ;;  %v2104_v49 = vmul.f32 %v1976_v18, %v3900_v39  ;;  %vm2488_vm14 = vcmp.ge.f32.partialorder %v3865_v60, 5.0  ;;  %v572_v45 = vmin.f32 %v444_v31, 1.5707964 }
 0x123   : > { %v2359_v13 = vmul.f32 %v2231_v24, %v2231_v24  ;;  %v1721_v42 = vadd.f32 0.041666668, %v1593_v3  ;;  %v1082_v36 = vmul.f32 %v954_v17, %v3951_v53  ;;  %v445_v40 = vand.u32 2147483647, %v317_v22  ;;  %v4018_v24 = vld [vmem:[%s3208_s30 + $0x1b8] sm:$0xff] }
 0x124   : > { %v3975_v34 = vmul.f32 %v571_v4, %v571_v4  ;;  %v2232_v52 = vadd.f32 1.0, %v2104_v49  ;;  %v3987_v28 = vmul.f32 %v572_v45, %v572_v45  ;;  %v318_v62 = vmul.f32 0.31415927, %v3978_v16 }
 0x125   : > { %v2615_v39 = vsel %vm2487_vm13, 0.0, %v2359_v13  ;;  %v1849_v6 = vmul.f32 %v1721_v42, %v3920_v25  ;;  %v1210_v37 = vadd.f32 2.4801588e-05, %v1082_v36  ;;  %v573_v56 = vmin.f32 %v445_v40, 1.5707964 }
 0x126   : > { %v827_v57 = vmul.f32 2.0876756e-09, %v3975_v34  ;;  %2743 = vst [vmem:[%s3321_s17 + $0x168] sm:$0xff] %v2615_v39  ;;  %v2360_v26 = vmul.f32 %v2232_v52, %v2232_v52  ;;  %v319_v41 = vmul.f32 0.31415927, %v3981_v29  ;;  %vm2489_vm15 = vcmp.ge.f32.partialorder %v3890_v7, 5.0 }
 0x127   : > { %v1977_v8 = vadd.f32 -0.5, %v1849_v6  ;;  %v1338_v23 = vmul.f32 %v1210_v37, %v3951_v53  ;;  %v828_v61 = vmul.f32 2.0876756e-09, %v3987_v28  ;;  %v3995_v1 = vmul.f32 %v573_v56, %v573_v56 }
 0x128   : > { %v955_v48 = vadd.f32 -2.755732e-07, %v827_v57  ;;  %v2616_v0 = vsel %vm2488_vm14, 0.0, %v2360_v26  ;;  %v446_v9 = vand.u32 2147483647, %v318_v62  ;;  %vm2490_vm0 = vcmp.ge.f32.partialorder %v3924_v46, 5.0 }
 0x129   : > { %2744 = vst [vmem:[%s3321_s17 + $0x170] sm:$0xff] %v2616_v0  ;;  %v2105_v35 = vmul.f32 %v1977_v8, %v3920_v25  ;;  %v1466_v50 = vadd.f32 -0.0013888889, %v1338_v23  ;;  %v447_v44 = vand.u32 2147483647, %v319_v41  ;;  %vm2491_vm1 = vcmp.ge.f32.partialorder %v3943_v63, 5.0 }
 0x12a   : > { %v1083_v43 = vmul.f32 %v955_v48, %v3975_v34  ;;  %v956_v27 = vadd.f32 -2.755732e-07, %v828_v61  ;;  %v829_v55 = vmul.f32 2.0876756e-09, %v3995_v1  ;;  %v574_v54 = vmin.f32 %v446_v9, 1.5707964 }
 0x12b   : > { %v2233_v47 = vadd.f32 1.0, %v2105_v35  ;;  %v1594_v60 = vmul.f32 %v1466_v50, %v3951_v53  ;;  %v575_v11 = vmin.f32 %v447_v44, 1.5707964  ;;  %v320_v7 = vmul.f32 0.31415927, %v4003_v51 }
 0x12c   : > { %v1211_v5 = vadd.f32 2.4801588e-05, %v1083_v43  ;;  %v1084_v25 = vmul.f32 %v956_v27, %v3987_v28  ;;  %v957_v30 = vadd.f32 -2.755732e-07, %v829_v55  ;;  %v4007_v19 = vmul.f32 %v574_v54, %v574_v54 }
 0x12d   : > { %v2361_v21 = vmul.f32 %v2233_v47, %v2233_v47  ;;  %v1722_v33 = vadd.f32 0.041666668, %v1594_v60  ;;  %v4010_v38 = vmul.f32 %v575_v11, %v575_v11  ;;  %v448_v49 = vand.u32 2147483647, %v320_v7 }
 0x12e   : > { %v1339_v2 = vmul.f32 %v1211_v5, %v3975_v34  ;;  %v1212_v15 = vadd.f32 2.4801588e-05, %v1084_v25  ;;  %v1085_v32 = vmul.f32 %v957_v30, %v3995_v1  ;;  %v830_v59 = vmul.f32 2.0876756e-09, %v4007_v19 }
 0x12f   : > { %v2617_v20 = vsel %vm2489_vm15, 0.0, %v2361_v21  ;;  %v1850_v12 = vmul.f32 %v1722_v33, %v3951_v53  ;;  %v831_v10 = vmul.f32 2.0876756e-09, %v4010_v38  ;;  %v576_v45 = vmin.f32 %v448_v49, 1.5707964 }
 0x130   : > { %v1467_v18 = vadd.f32 -0.0013888889, %v1339_v2  ;;  %2745 = vst [vmem:[%s3321_s17 + $0x178] sm:$0xff] %v2617_v20  ;;  %v1340_v3 = vmul.f32 %v1212_v15, %v3987_v28  ;;  %v1213_v17 = vadd.f32 2.4801588e-05, %v1085_v32  ;;  %v4049_v15 = vld [vmem:[%s3208_s30 + $0x1c0] sm:$0xff] }
 0x131   : > { %v958_v4 = vadd.f32 -2.755732e-07, %v830_v59  ;;  %v1978_v31 = vadd.f32 -0.5, %v1850_v12  ;;  %v959_v13 = vadd.f32 -2.755732e-07, %v831_v10  ;;  %v4031_v62 = vmul.f32 %v576_v45, %v576_v45 }
 0x132   : > { %v1595_v22 = vmul.f32 %v1467_v18, %v3975_v34  ;;  %v1468_v42 = vadd.f32 -0.0013888889, %v1340_v3  ;;  %v1341_v36 = vmul.f32 %v1213_v17, %v3995_v1  ;;  %v321_v37 = vmul.f32 0.31415927, %v4018_v24 }
 0x133   : > { %v1086_v52 = vmul.f32 %v958_v4, %v4007_v19  ;;  %v2106_v40 = vmul.f32 %v1978_v31, %v3951_v53  ;;  %v1087_v6 = vmul.f32 %v959_v13, %v4010_v38  ;;  %v832_v9 = vmul.f32 2.0876756e-09, %v4031_v62 }
 0x134   : > { %v1723_v39 = vadd.f32 0.041666668, %v1595_v22  ;;  %v1596_v57 = vmul.f32 %v1468_v42, %v3987_v28  ;;  %v1469_v26 = vadd.f32 -0.0013888889, %v1341_v36  ;;  %v449_v41 = vand.u32 2147483647, %v321_v37 }
 0x135   : > { %v1214_v56 = vadd.f32 2.4801588e-05, %v1086_v52  ;;  %v2234_v8 = vadd.f32 1.0, %v2106_v40  ;;  %v1215_v48 = vadd.f32 2.4801588e-05, %v1087_v6  ;;  %vm2492_vm2 = vcmp.ge.f32.partialorder %v3955_v14, 5.0 }
 0x136   : > { %v1851_v23 = vmul.f32 %v1723_v39, %v3975_v34  ;;  %v1724_v0 = vadd.f32 0.041666668, %v1596_v57  ;;  %v1597_v53 = vmul.f32 %v1469_v26, %v3995_v1  ;;  %v577_v44 = vmin.f32 %v449_v41, 1.5707964 }
 0x137   : > { %v1342_v61 = vmul.f32 %v1214_v56, %v4007_v19  ;;  %v2362_v35 = vmul.f32 %v2234_v8, %v2234_v8  ;;  %v1343_v43 = vmul.f32 %v1215_v48, %v4010_v38  ;;  %v960_v47 = vadd.f32 -2.755732e-07, %v832_v9 }
 0x138   : > { %v1979_v50 = vadd.f32 -0.5, %v1851_v23  ;;  %v1852_v27 = vmul.f32 %v1724_v0, %v3987_v28  ;;  %v1725_v55 = vadd.f32 0.041666668, %v1597_v53  ;;  %v4042_v25 = vmul.f32 %v577_v44, %v577_v44  ;;  %v4079_v0 = vld [vmem:[%s3208_s30 + $0x1d0] sm:$0xff] }
 0x139   : > { %v1470_v54 = vadd.f32 -0.0013888889, %v1342_v61  ;;  %v2618_v60 = vsel %vm2490_vm0, 0.0, %v2362_v35  ;;  %v1471_v11 = vadd.f32 -0.0013888889, %v1343_v43  ;;  %v1088_v2 = vmul.f32 %v960_v47, %v4031_v62 }
 0x13a   : > { %v2107_v5 = vmul.f32 %v1979_v50, %v3975_v34  ;;  %2746 = vst [vmem:[%s3321_s17 + $0x180] sm:$0xff] %v2618_v60  ;;  %v1980_v30 = vadd.f32 -0.5, %v1852_v27  ;;  %v1853_v21 = vmul.f32 %v1725_v55, %v3995_v1  ;;  %v833_v34 = vmul.f32 2.0876756e-09, %v4042_v25 }
 0x13b   : > { %v1598_v33 = vmul.f32 %v1470_v54, %v4007_v19  ;;  %v1599_v46 = vmul.f32 %v1471_v11, %v4010_v38  ;;  %v1216_v12 = vadd.f32 2.4801588e-05, %v1088_v2  ;;  %v322_v17 = vmul.f32 0.31415927, %v4049_v15 }
 0x13c   : > { %v2235_v32 = vadd.f32 1.0, %v2107_v5  ;;  %v2108_v59 = vmul.f32 %v1980_v30, %v3987_v28  ;;  %v1981_v7 = vadd.f32 -0.5, %v1853_v21  ;;  %v961_v3 = vadd.f32 -2.755732e-07, %v833_v34  ;;  %v4093_v5 = vld [vmem:[%s3208_s30 + $0x1e0] sm:$0xff] }
 0x13d   : > { %v1726_v20 = vadd.f32 0.041666668, %v1598_v33  ;;  %v1727_v10 = vadd.f32 0.041666668, %v1599_v46  ;;  %v1344_v22 = vmul.f32 %v1216_v12, %v4031_v62  ;;  %v450_v36 = vand.u32 2147483647, %v322_v17 }
 0x13e   : > { %v2363_v18 = vmul.f32 %v2235_v32, %v2235_v32  ;;  %v2236_v4 = vadd.f32 1.0, %v2108_v59  ;;  %v2109_v49 = vmul.f32 %v1981_v7, %v3995_v1  ;;  %v1089_v42 = vmul.f32 %v961_v3, %v4042_v25  ;;  %v4065_v1 = vld [vmem:[%s3208_s30 + $0x1c8] sm:$0xff] }
 0x13f   : > { %v1854_v31 = vmul.f32 %v1726_v20, %v4007_v19  ;;  %v1855_v13 = vmul.f32 %v1727_v10, %v4010_v38  ;;  %v1472_v39 = vadd.f32 -0.0013888889, %v1344_v22  ;;  %vm2493_vm3 = vcmp.ge.f32.partialorder %v3961_v58, 5.0  ;;  %v4106_v12 = vld [vmem:[%s3208_s30 + $0x1e8] sm:$0xff] }
 0x140   : > { %v2619_v28 = vsel %vm2491_vm1, 0.0, %v2363_v18  ;;  %v2364_v52 = vmul.f32 %v2236_v4, %v2236_v4  ;;  %v2237_v45 = vadd.f32 1.0, %v2109_v49  ;;  %v1217_v37 = vadd.f32 2.4801588e-05, %v1089_v42 }
 0x141   : > { %2747 = vst [vmem:[%s3321_s17 + $0x188] sm:$0xff] %v2619_v28  ;;  %v1982_v40 = vadd.f32 -0.5, %v1854_v31  ;;  %v1983_v6 = vadd.f32 -0.5, %v1855_v13  ;;  %v578_v63 = vmin.f32 %v450_v36, 1.5707964  ;;  %v1600_v8 = vmul.f32 %v1472_v39, %v4031_v62 }
 0x142   : > { %v2620_v57 = vsel %vm2492_vm2, 0.0, %v2364_v52  ;;  %v2365_v26 = vmul.f32 %v2237_v45, %v2237_v45  ;;  %v1345_v48 = vmul.f32 %v1217_v37, %v4042_v25  ;;  %v323_v58 = vmul.f32 0.31415927, %v4065_v1 }
 0x143   : > { %v2110_v56 = vmul.f32 %v1982_v40, %v4007_v19  ;;  %2748 = vst [vmem:[%s3321_s17 + $0x190] sm:$0xff] %v2620_v57  ;;  %v2111_v23 = vmul.f32 %v1983_v6, %v4010_v38  ;;  %v4075_v41 = vmul.f32 %v578_v63, %v578_v63  ;;  %vm2494_vm4 = vcmp.ge.f32.partialorder %v3978_v16, 5.0  ;;  %v4083_v19 = vld [vmem:[%s3208_s30 + $0x1d8] sm:$0xff] }
 0x144   : > { %v2621_v53 = vsel %vm2493_vm3, 0.0, %v2365_v26  ;;  %v1728_v61 = vadd.f32 0.041666668, %v1600_v8  ;;  %vm2495_vm5 = vcmp.ge.f32.partialorder %v3981_v29, 5.0  ;;  %v1473_v38 = vadd.f32 -0.0013888889, %v1345_v48 }
 0x145   : > { %v2238_v14 = vadd.f32 1.0, %v2110_v56  ;;  %2749 = vst [vmem:[%s3321_s17 + $0x198] sm:$0xff] %v2621_v53  ;;  %v2239_v9 = vadd.f32 1.0, %v2111_v23  ;;  %v834_v35 = vmul.f32 2.0876756e-09, %v4075_v41  ;;  %vm2496_vm6 = vcmp.ge.f32.partialorder %v4003_v51, 5.0 }
 0x146   : > { %v1856_v43 = vmul.f32 %v1728_v61, %v4031_v62  ;;  %v451_v44 = vand.u32 2147483647, %v323_v58  ;;  %v324_v27 = vmul.f32 0.31415927, %v4079_v0  ;;  %v1601_v54 = vmul.f32 %v1473_v38, %v4042_v25  ;;  %v4127_v23 = vld [vmem:[%s3208_s30 + $0x1f0] sm:$0xff] }
 0x147   : > { %v2366_v50 = vmul.f32 %v2238_v14, %v2238_v14  ;;  %v2367_v55 = vmul.f32 %v2239_v9, %v2239_v9  ;;  %v962_v47 = vadd.f32 -2.755732e-07, %v834_v35  ;;  %v325_v60 = vmul.f32 0.31415927, %v4083_v19 }
 0x148   : > { %v1984_v30 = vadd.f32 -0.5, %v1856_v43  ;;  %v579_v21 = vmin.f32 %v451_v44, 1.5707964  ;;  %v452_v33 = vand.u32 2147483647, %v324_v27  ;;  %vm2497_vm7 = vcmp.ge.f32.partialorder %v4018_v24, 5.0 }
 0x149   : > { %v2622_v11 = vsel %vm2494_vm4, 0.0, %v2366_v50  ;;  %v2623_v2 = vsel %vm2495_vm5, 0.0, %v2367_v55  ;;  %v1729_v32 = vadd.f32 0.041666668, %v1601_v54  ;;  %v1090_v46 = vmul.f32 %v962_v47, %v4075_v41  ;;  %v4139_v54 = vld [vmem:[%s3208_s30 + $0x1f8] sm:$0xff] }
 0x14a   : > { %2750 = vst [vmem:[%s3321_s17 + $0x1a0] sm:$0xff] %v2622_v11  ;;  %v453_v34 = vand.u32 2147483647, %v325_v60  ;;  %2751 = vst [vmem:[%s3321_s17 + $0x1a8] sm:$0xff] %v2623_v2  ;;  %v2112_v59 = vmul.f32 %v1984_v30, %v4031_v62  ;;  %v4103_v7 = vmul.f32 %v579_v21, %v579_v21  ;;  %v580_v20 = vmin.f32 %v452_v33, 1.5707964 }
 0x14b   : > { %v1857_v16 = vmul.f32 %v1729_v32, %v4042_v25  ;;  %v1218_v18 = vadd.f32 2.4801588e-05, %v1090_v46  ;;  %v326_v3 = vmul.f32 0.31415927, %v4093_v5  ;;  %v327_v36 = vmul.f32 0.31415927, %v4106_v12 }
 0x14c   : > { %v581_v10 = vmin.f32 %v453_v34, 1.5707964  ;;  %v2240_v29 = vadd.f32 1.0, %v2112_v59  ;;  %v835_v17 = vmul.f32 2.0876756e-09, %v4103_v7  ;;  %v4112_v4 = vmul.f32 %v580_v20, %v580_v20 }
 0x14d   : > { %v1985_v49 = vadd.f32 -0.5, %v1857_v16  ;;  %v1346_v62 = vmul.f32 %v1218_v18, %v4075_v41  ;;  %v454_v22 = vand.u32 2147483647, %v326_v3  ;;  %v455_v63 = vand.u32 2147483647, %v327_v36 }
 0x14e   : > { %v4115_v31 = vmul.f32 %v581_v10, %v581_v10  ;;  %v2368_v28 = vmul.f32 %v2240_v29, %v2240_v29  ;;  %v963_v13 = vadd.f32 -2.755732e-07, %v835_v17  ;;  %v836_v42 = vmul.f32 2.0876756e-09, %v4112_v4 }
 0x14f   : > { %v2113_v51 = vmul.f32 %v1985_v49, %v4042_v25  ;;  %v1474_v52 = vadd.f32 -0.0013888889, %v1346_v62  ;;  %v582_v40 = vmin.f32 %v454_v22, 1.5707964  ;;  %v583_v58 = vmin.f32 %v455_v63, 1.5707964 }
 0x150   : > { %v837_v45 = vmul.f32 2.0876756e-09, %v4115_v31  ;;  %v2624_v39 = vsel %vm2496_vm6, 0.0, %v2368_v28  ;;  %v1091_v6 = vmul.f32 %v963_v13, %v4103_v7  ;;  %v964_v37 = vadd.f32 -2.755732e-07, %v836_v42 }
 0x151   : > { %2752 = vst [vmem:[%s3321_s17 + $0x1b0] sm:$0xff] %v2624_v39  ;;  %v2241_v57 = vadd.f32 1.0, %v2113_v51  ;;  %v1602_v26 = vmul.f32 %v1474_v52, %v4075_v41  ;;  %v4124_v8 = vmul.f32 %v582_v40, %v582_v40  ;;  %v4134_v50 = vmul.f32 %v583_v58, %v583_v58 }
 0x152   : > { %v965_v56 = vadd.f32 -2.755732e-07, %v837_v45  ;;  %v1219_v25 = vadd.f32 2.4801588e-05, %v1091_v6  ;;  %v1092_v48 = vmul.f32 %v964_v37, %v4112_v4  ;;  %v328_v43 = vmul.f32 0.31415927, %v4127_v23 }
 0x153   : > { %v2369_v53 = vmul.f32 %v2241_v57, %v2241_v57  ;;  %v1730_v14 = vadd.f32 0.041666668, %v1602_v26  ;;  %v838_v9 = vmul.f32 2.0876756e-09, %v4124_v8  ;;  %v839_v11 = vmul.f32 2.0876756e-09, %v4134_v50 }
 0x154   : > { %v1093_v61 = vmul.f32 %v965_v56, %v4115_v31  ;;  %v1347_v38 = vmul.f32 %v1219_v25, %v4103_v7  ;;  %v1220_v35 = vadd.f32 2.4801588e-05, %v1092_v48  ;;  %v456_v30 = vand.u32 2147483647, %v328_v43 }
 0x155   : > { %v2625_v24 = vsel %vm2497_vm7, 0.0, %v2369_v53  ;;  %v1858_v44 = vmul.f32 %v1730_v14, %v4075_v41  ;;  %v966_v55 = vadd.f32 -2.755732e-07, %v838_v9  ;;  %vm2498_vm8 = vcmp.ge.f32.partialorder %v4049_v15, 5.0  ;;  %v4172_v9 = vld [vmem:[%s3208_s30 + $0x200] sm:$0xff] }
 0x156   : > { %v1221_v27 = vadd.f32 2.4801588e-05, %v1093_v61  ;;  %2753 = vst [vmem:[%s3321_s17 + $0x1b8] sm:$0xff] %v2625_v24  ;;  %v1475_v47 = vadd.f32 -0.0013888889, %v1347_v38  ;;  %v1348_v60 = vmul.f32 %v1220_v35, %v4112_v4  ;;  %vm2499_vm9 = vcmp.ge.f32.partialorder %v4065_v1, 5.0 }
 0x157   : > { %v1986_v21 = vadd.f32 -0.5, %v1858_v44  ;;  %v1094_v2 = vmul.f32 %v966_v55, %v4124_v8  ;;  %v967_v34 = vadd.f32 -2.755732e-07, %v839_v11  ;;  %v584_v59 = vmin.f32 %v456_v30, 1.5707964 }
 0x158   : > { %v1349_v33 = vmul.f32 %v1221_v27, %v4115_v31  ;;  %v1603_v32 = vmul.f32 %v1475_v47, %v4103_v7  ;;  %v1476_v46 = vadd.f32 -0.0013888889, %v1348_v60  ;;  %v329_v10 = vmul.f32 0.31415927, %v4139_v54 }
 0x159   : > { %v2114_v20 = vmul.f32 %v1986_v21, %v4075_v41  ;;  %v1222_v18 = vadd.f32 2.4801588e-05, %v1094_v2  ;;  %v1095_v17 = vmul.f32 %v967_v34, %v4134_v50  ;;  %v4152_v49 = vmul.f32 %v584_v59, %v584_v59 }
 0x15a   : > { %v1477_v16 = vadd.f32 -0.0013888889, %v1349_v33  ;;  %v1731_v3 = vadd.f32 0.041666668, %v1603_v32  ;;  %v1604_v29 = vmul.f32 %v1476_v46, %v4112_v4  ;;  %v457_v13 = vand.u32 2147483647, %v329_v10 }
 0x15b   : > { %v2242_v62 = vadd.f32 1.0, %v2114_v20  ;;  %v1350_v28 = vmul.f32 %v1222_v18, %v4124_v8  ;;  %v1223_v36 = vadd.f32 2.4801588e-05, %v1095_v17  ;;  %v840_v51 = vmul.f32 2.0876756e-09, %v4152_v49 }
 0x15c   : > { %v1605_v22 = vmul.f32 %v1477_v16, %v4115_v31  ;;  %v1859_v41 = vmul.f32 %v1731_v3, %v4103_v7  ;;  %v1732_v42 = vadd.f32 0.041666668, %v1604_v29  ;;  %vm2500_vm10 = vcmp.ge.f32.partialorder %v4079_v0, 5.0  ;;  %v4189_v29 = vld [vmem:[%s3208_s30 + $0x208] sm:$0xff] }
 0x15d   : > { %v2370_v52 = vmul.f32 %v2242_v62, %v2242_v62  ;;  %v1478_v40 = vadd.f32 -0.0013888889, %v1350_v28  ;;  %v585_v39 = vmin.f32 %v457_v13, 1.5707964  ;;  %v1351_v63 = vmul.f32 %v1223_v36, %v4134_v50 }
 0x15e   : > { %v1733_v45 = vadd.f32 0.041666668, %v1605_v22  ;;  %v1987_v6 = vadd.f32 -0.5, %v1859_v41  ;;  %v1860_v37 = vmul.f32 %v1732_v42, %v4112_v4  ;;  %v968_v57 = vadd.f32 -2.755732e-07, %v840_v51  ;;  %v4195_v22 = vld [vmem:[%s3208_s30 + $0x210] sm:$0xff] }
 0x15f   : > { %v2626_v26 = vsel %vm2498_vm8, 0.0, %v2370_v52  ;;  %v1606_v25 = vmul.f32 %v1478_v40, %v4124_v8  ;;  %v4166_v48 = vmul.f32 %v585_v39, %v585_v39  ;;  %v1479_v14 = vadd.f32 -0.0013888889, %v1351_v63  ;;  %v4208_v51 = vld [vmem:[%s3208_s30 + $0x218] sm:$0xff] }
 0x160   : > { %v1861_v56 = vmul.f32 %v1733_v45, %v4115_v31  ;;  %2754 = vst [vmem:[%s3321_s17 + $0x1c0] sm:$0xff] %v2626_v26  ;;  %v2115_v58 = vmul.f32 %v1987_v6, %v4103_v7  ;;  %v1988_v53 = vadd.f32 -0.5, %v1860_v37  ;;  %v1096_v61 = vmul.f32 %v968_v57, %v4152_v49 }
 0x161   : > { %vm2501_vm11 = vcmp.ge.f32.partialorder %v4083_v19, 5.0  ;;  %v1734_v15 = vadd.f32 0.041666668, %v1606_v25  ;;  %v841_v35 = vmul.f32 2.0876756e-09, %v4166_v48  ;;  %v1607_v44 = vmul.f32 %v1479_v14, %v4134_v50 }
 0x162   : > { %v1989_v38 = vadd.f32 -0.5, %v1861_v56  ;;  %v2243_v43 = vadd.f32 1.0, %v2115_v58  ;;  %v2116_v24 = vmul.f32 %v1988_v53, %v4112_v4  ;;  %v1224_v27 = vadd.f32 2.4801588e-05, %v1096_v61  ;;  %v4218_v53 = vld [vmem:[%s3208_s30 + $0x220] sm:$0xff] }
 0x163   : > { %v1862_v55 = vmul.f32 %v1734_v15, %v4124_v8  ;;  %v969_v47 = vadd.f32 -2.755732e-07, %v841_v35  ;;  %v330_v60 = vmul.f32 0.31415927, %v4172_v9  ;;  %v1735_v21 = vadd.f32 0.041666668, %v1607_v44 }
 0x164   : > { %v2117_v7 = vmul.f32 %v1989_v38, %v4115_v31  ;;  %v2371_v11 = vmul.f32 %v2243_v43, %v2243_v43  ;;  %v2244_v30 = vadd.f32 1.0, %v2116_v24  ;;  %v1352_v33 = vmul.f32 %v1224_v27, %v4152_v49 }
 0x165   : > { %v1990_v32 = vadd.f32 -0.5, %v1862_v55  ;;  %v1097_v4 = vmul.f32 %v969_v47, %v4166_v48  ;;  %v458_v46 = vand.u32 2147483647, %v330_v60  ;;  %v1863_v59 = vmul.f32 %v1735_v21, %v4134_v50  ;;  %v4233_v47 = vld [vmem:[%s3208_s30 + $0x228] sm:$0xff] }
 0x166   : > { %v2245_v2 = vadd.f32 1.0, %v2117_v7  ;;  %v2627_v31 = vsel %vm2499_vm9, 0.0, %v2371_v11  ;;  %v2372_v34 = vmul.f32 %v2244_v30, %v2244_v30  ;;  %v1480_v20 = vadd.f32 -0.0013888889, %v1352_v33 }
 0x167   : > { %2755 = vst [vmem:[%s3321_s17 + $0x1c8] sm:$0xff] %v2627_v31  ;;  %v2118_v18 = vmul.f32 %v1990_v32, %v4124_v8  ;;  %v1225_v10 = vadd.f32 2.4801588e-05, %v1097_v4  ;;  %v586_v3 = vmin.f32 %v458_v46, 1.5707964  ;;  %v1991_v62 = vadd.f32 -0.5, %v1863_v59 }
 0x168   : > { %v2373_v16 = vmul.f32 %v2245_v2, %v2245_v2  ;;  %v2628_v17 = vsel %vm2500_vm10, 0.0, %v2372_v34  ;;  %v1608_v1 = vmul.f32 %v1480_v20, %v4152_v49  ;;  %vm2502_vm12 = vcmp.ge.f32.partialorder %v4093_v5, 5.0 }
 0x169   : > { %2756 = vst [vmem:[%s3321_s17 + $0x1d0] sm:$0xff] %v2628_v17  ;;  %v2246_v13 = vadd.f32 1.0, %v2118_v18  ;;  %v1353_v8 = vmul.f32 %v1225_v10, %v4166_v48  ;;  %v4201_v41 = vmul.f32 %v586_v3, %v586_v3  ;;  %v2119_v0 = vmul.f32 %v1991_v62, %v4134_v50 }
 0x16a   : > { %v2629_v28 = vsel %vm2501_vm11, 0.0, %v2373_v16  ;;  %v1736_v42 = vadd.f32 0.041666668, %v1608_v1  ;;  %v331_v36 = vmul.f32 0.31415927, %v4189_v29  ;;  %vm2503_vm13 = vcmp.ge.f32.partialorder %v4106_v12, 5.0 }
 0x16b   : > { %2757 = vst [vmem:[%s3321_s17 + $0x1d8] sm:$0xff] %v2629_v28  ;;  %v2374_v52 = vmul.f32 %v2246_v13, %v2246_v13  ;;  %v1481_v45 = vadd.f32 -0.0013888889, %v1353_v8  ;;  %v842_v19 = vmul.f32 2.0876756e-09, %v4201_v41  ;;  %v2247_v39 = vadd.f32 1.0, %v2119_v0 }
 0x16c   : > { %v332_v40 = vmul.f32 0.31415927, %v4195_v22  ;;  %v1864_v5 = vmul.f32 %v1736_v42, %v4152_v49  ;;  %v459_v6 = vand.u32 2147483647, %v331_v36  ;;  %v333_v58 = vmul.f32 0.31415927, %v4208_v51 }
 0x16d   : > { %v2630_v50 = vsel %vm2502_vm12, 0.0, %v2374_v52  ;;  %v1609_v37 = vmul.f32 %v1481_v45, %v4166_v48  ;;  %v970_v63 = vadd.f32 -2.755732e-07, %v842_v19  ;;  %v2375_v26 = vmul.f32 %v2247_v39, %v2247_v39 }
 0x16e   : > { %v460_v57 = vand.u32 2147483647, %v332_v40  ;;  %2758 = vst [vmem:[%s3321_s17 + $0x1e0] sm:$0xff] %v2630_v50  ;;  %v1992_v56 = vadd.f32 -0.5, %v1864_v5  ;;  %v587_v25 = vmin.f32 %v459_v6, 1.5707964 }
 0x16f   : > { %vm2504_vm14 = vcmp.ge.f32.partialorder %v4127_v23, 5.0  ;;  %v1737_v14 = vadd.f32 0.041666668, %v1609_v37  ;;  %v1098_v61 = vmul.f32 %v970_v63, %v4201_v41  ;;  %v2631_v15 = vsel %vm2503_vm13, 0.0, %v2375_v26  ;;  %v4258_v40 = vld [vmem:[%s3208_s30 + $0x230] sm:$0xff] }
 0x170   : > { %v588_v38 = vmin.f32 %v460_v57, 1.5707964  ;;  %v2120_v35 = vmul.f32 %v1992_v56, %v4152_v49  ;;  %v4225_v43 = vmul.f32 %v587_v25, %v587_v25  ;;  %v461_v24 = vand.u32 2147483647, %v333_v58  ;;  %2759 = vst [vmem:[%s3321_s17 + $0x1e8] sm:$0xff] %v2631_v15 }
 0x171   : > { %v1865_v44 = vmul.f32 %v1737_v14, %v4166_v48  ;;  %v1226_v27 = vadd.f32 2.4801588e-05, %v1098_v61  ;;  %v334_v55 = vmul.f32 0.31415927, %v4218_v53  ;;  %vm2505_vm15 = vcmp.ge.f32.partialorder %v4139_v54, 5.0  ;;  %v4269_v14 = vld [vmem:[%s3208_s30 + $0x238] sm:$0xff] }
 0x172   : > { %v4229_v7 = vmul.f32 %v588_v38, %v588_v38  ;;  %v2248_v60 = vadd.f32 1.0, %v2120_v35  ;;  %v843_v12 = vmul.f32 2.0876756e-09, %v4225_v43  ;;  %v589_v11 = vmin.f32 %v461_v24, 1.5707964 }
 0x173   : > { %v1993_v49 = vadd.f32 -0.5, %v1865_v44  ;;  %v1354_v30 = vmul.f32 %v1226_v27, %v4201_v41  ;;  %v462_v33 = vand.u32 2147483647, %v334_v55  ;;  %v335_v46 = vmul.f32 0.31415927, %v4233_v47 }
 0x174   : > { %v844_v21 = vmul.f32 2.0876756e-09, %v4229_v7  ;;  %v2376_v2 = vmul.f32 %v2248_v60, %v2248_v60  ;;  %v971_v32 = vadd.f32 -2.755732e-07, %v843_v12  ;;  %v4239_v4 = vmul.f32 %v589_v11, %v589_v11 }
 0x175   : > { %v2121_v31 = vmul.f32 %v1993_v49, %v4166_v48  ;;  %v1482_v34 = vadd.f32 -0.0013888889, %v1354_v30  ;;  %v590_v20 = vmin.f32 %v462_v33, 1.5707964  ;;  %v463_v3 = vand.u32 2147483647, %v335_v46 }
 0x176   : > { %v972_v59 = vadd.f32 -2.755732e-07, %v844_v21  ;;  %v2632_v16 = vsel %vm2504_vm14, 0.0, %v2376_v2  ;;  %v1099_v18 = vmul.f32 %v971_v32, %v4225_v43  ;;  %v845_v10 = vmul.f32 2.0876756e-09, %v4239_v4 }
 0x177   : > { %2760 = vst [vmem:[%s3321_s17 + $0x1f0] sm:$0xff] %v2632_v16  ;;  %v2249_v17 = vadd.f32 1.0, %v2121_v31  ;;  %v1610_v62 = vmul.f32 %v1482_v34, %v4201_v41  ;;  %v4250_v28 = vmul.f32 %v590_v20, %v590_v20  ;;  %v591_v8 = vmin.f32 %v463_v3, 1.5707964 }
 0x178   : > { %v1100_v1 = vmul.f32 %v972_v59, %v4229_v7  ;;  %v1227_v48 = vadd.f32 2.4801588e-05, %v1099_v18  ;;  %v973_v13 = vadd.f32 -2.755732e-07, %v845_v10  ;;  %v336_v58 = vmul.f32 0.31415927, %v4258_v40 }
 0x179   : > { %v2377_v23 = vmul.f32 %v2249_v17, %v2249_v17  ;;  %v1738_v0 = vadd.f32 0.041666668, %v1610_v62  ;;  %v846_v36 = vmul.f32 2.0876756e-09, %v4250_v28  ;;  %v4255_v19 = vmul.f32 %v591_v8, %v591_v8 }
 0x17a   : > { %v1228_v42 = vadd.f32 2.4801588e-05, %v1100_v1  ;;  %v1355_v52 = vmul.f32 %v1227_v48, %v4225_v43  ;;  %v1101_v45 = vmul.f32 %v973_v13, %v4239_v4  ;;  %vm2506_vm0 = vcmp.ge.f32.partialorder %v4172_v9, 5.0 }
 0x17b   : > { %v2633_v39 = vsel %vm2505_vm15, 0.0, %v2377_v23  ;;  %v1866_v5 = vmul.f32 %v1738_v0, %v4201_v41  ;;  %v974_v50 = vadd.f32 -2.755732e-07, %v846_v36  ;;  %v847_v57 = vmul.f32 2.0876756e-09, %v4255_v19  ;;  %v4297_v0 = vld [vmem:[%s3208_s30 + $0x240] sm:$0xff] }
 0x17c   : > { %v1356_v6 = vmul.f32 %v1228_v42, %v4229_v7  ;;  %2761 = vst [vmem:[%s3321_s17 + $0x1f8] sm:$0xff] %v2633_v39  ;;  %v1483_v37 = vadd.f32 -0.0013888889, %v1355_v52  ;;  %v1229_v63 = vadd.f32 2.4801588e-05, %v1101_v45  ;;  %vm2507_vm1 = vcmp.ge.f32.partialorder %v4189_v29, 5.0 }
 0x17d   : > { %v1994_v26 = vadd.f32 -0.5, %v1866_v5  ;;  %v1102_v25 = vmul.f32 %v974_v50, %v4250_v28  ;;  %v975_v38 = vadd.f32 -2.755732e-07, %v847_v57  ;;  %v464_v44 = vand.u32 2147483647, %v336_v58 }
 0x17e   : > { %v1484_v56 = vadd.f32 -0.0013888889, %v1356_v6  ;;  %v1611_v54 = vmul.f32 %v1483_v37, %v4225_v43  ;;  %v1357_v61 = vmul.f32 %v1229_v63, %v4239_v4  ;;  %v337_v12 = vmul.f32 0.31415927, %v4269_v14 }
 0x17f   : > { %v2122_v15 = vmul.f32 %v1994_v26, %v4201_v41  ;;  %v1230_v24 = vadd.f32 2.4801588e-05, %v1102_v25  ;;  %v1103_v60 = vmul.f32 %v975_v38, %v4255_v19  ;;  %v592_v21 = vmin.f32 %v464_v44, 1.5707964 }
 0x180   : > { %v1612_v35 = vmul.f32 %v1484_v56, %v4229_v7  ;;  %v1739_v27 = vadd.f32 0.041666668, %v1611_v54  ;;  %v1485_v55 = vadd.f32 -0.0013888889, %v1357_v61  ;;  %vm2508_vm2 = vcmp.ge.f32.partialorder %v4195_v22, 5.0  ;;  %v4324_v22 = vld [vmem:[%s3208_s30 + $0x250] sm:$0xff] }
 0x181   : > { %v2250_v11 = vadd.f32 1.0, %v2122_v15  ;;  %v1358_v30 = vmul.f32 %v1230_v24, %v4250_v28  ;;  %v1231_v2 = vadd.f32 2.4801588e-05, %v1103_v60  ;;  %v465_v32 = vand.u32 2147483647, %v337_v12  ;;  %v4312_v24 = vld [vmem:[%s3208_s30 + $0x248] sm:$0xff] }
 0x182   : > { %v1740_v49 = vadd.f32 0.041666668, %v1612_v35  ;;  %v1867_v33 = vmul.f32 %v1739_v27, %v4225_v43  ;;  %v1613_v41 = vmul.f32 %v1485_v55, %v4239_v4  ;;  %v4284_v59 = vmul.f32 %v592_v21, %v592_v21 }
 0x183   : > { %v2378_v46 = vmul.f32 %v2250_v11, %v2250_v11  ;;  %v1486_v34 = vadd.f32 -0.0013888889, %v1358_v30  ;;  %v1359_v18 = vmul.f32 %v1231_v2, %v4255_v19  ;;  %v593_v10 = vmin.f32 %v465_v32, 1.5707964 }
 0x184   : > { %v1868_v31 = vmul.f32 %v1740_v49, %v4229_v7  ;;  %v1995_v20 = vadd.f32 -0.5, %v1867_v33  ;;  %v1741_v16 = vadd.f32 0.041666668, %v1613_v41  ;;  %v848_v1 = vmul.f32 2.0876756e-09, %v4284_v59 }
 0x185   : > { %v2634_v3 = vsel %vm2506_vm0, 0.0, %v2378_v46  ;;  %v1614_v62 = vmul.f32 %v1486_v34, %v4250_v28  ;;  %v1487_v8 = vadd.f32 -0.0013888889, %v1359_v18  ;;  %v4294_v23 = vmul.f32 %v593_v10, %v593_v10  ;;  %v4335_v34 = vld [vmem:[%s3208_s30 + $0x258] sm:$0xff]  ;;  %v4339_v18 = vld [vmem:[%s3208_s30 + $0x260] sm:$0xff] }
 0x186   : > { %v1996_v17 = vadd.f32 -0.5, %v1868_v31  ;;  %2762 = vst [vmem:[%s3321_s17 + $0x200] sm:$0xff] %v2634_v3  ;;  %v2123_v48 = vmul.f32 %v1995_v20, %v4225_v43  ;;  %v1869_v13 = vmul.f32 %v1741_v16, %v4239_v4  ;;  %vm2509_vm3 = vcmp.ge.f32.partialorder %v4208_v51, 5.0 }
 0x187   : > { %v1742_v9 = vadd.f32 0.041666668, %v1614_v62  ;;  %v976_v36 = vadd.f32 -2.755732e-07, %v848_v1  ;;  %v1615_v39 = vmul.f32 %v1487_v8, %v4255_v19  ;;  %v849_v5 = vmul.f32 2.0876756e-09, %v4294_v23 }
 0x188   : > { %v2124_v42 = vmul.f32 %v1996_v17, %v4229_v7  ;;  %v2251_v52 = vadd.f32 1.0, %v2123_v48  ;;  %v1997_v45 = vadd.f32 -0.5, %v1869_v13  ;;  %v338_v37 = vmul.f32 0.31415927, %v4297_v0 }
 0x189   : > { %v1870_v6 = vmul.f32 %v1742_v9, %v4250_v28  ;;  %v1104_v50 = vmul.f32 %v976_v36, %v4284_v59  ;;  %v1743_v57 = vadd.f32 0.041666668, %v1615_v39  ;;  %v977_v26 = vadd.f32 -2.755732e-07, %v849_v5 }
 0x18a   : > { %v2252_v43 = vadd.f32 1.0, %v2124_v42  ;;  %v2379_v7 = vmul.f32 %v2251_v52, %v2251_v52  ;;  %v2125_v63 = vmul.f32 %v1997_v45, %v4239_v4  ;;  %v466_v54 = vand.u32 2147483647, %v338_v37  ;;  %v4351_v45 = vld [vmem:[%s3208_s30 + $0x268] sm:$0xff] }
 0x18b   : > { %v1998_v25 = vadd.f32 -0.5, %v1870_v6  ;;  %v1232_v58 = vadd.f32 2.4801588e-05, %v1104_v50  ;;  %v1871_v15 = vmul.f32 %v1743_v57, %v4255_v19  ;;  %v1105_v35 = vmul.f32 %v977_v26, %v4294_v23 }
 0x18c   : > { %v2380_v56 = vmul.f32 %v2252_v43, %v2252_v43  ;;  %v2635_v61 = vsel %vm2507_vm1, 0.0, %v2379_v7  ;;  %v2253_v38 = vadd.f32 1.0, %v2125_v63  ;;  %v594_v55 = vmin.f32 %v466_v54, 1.5707964 }
 0x18d   : > { %2763 = vst [vmem:[%s3321_s17 + $0x208] sm:$0xff] %v2635_v61  ;;  %v2126_v44 = vmul.f32 %v1998_v25, %v4250_v28  ;;  %v1360_v27 = vmul.f32 %v1232_v58, %v4284_v59  ;;  %v1999_v60 = vadd.f32 -0.5, %v1871_v15  ;;  %v1233_v12 = vadd.f32 2.4801588e-05, %v1105_v35 }
 0x18e   : > { %v2636_v4 = vsel %vm2508_vm2, 0.0, %v2380_v56  ;;  %v2381_v29 = vmul.f32 %v2253_v38, %v2253_v38  ;;  %v4320_v30 = vmul.f32 %v594_v55, %v594_v55  ;;  %v339_v21 = vmul.f32 0.31415927, %v4312_v24 }
 0x18f   : > { %2764 = vst [vmem:[%s3321_s17 + $0x210] sm:$0xff] %v2636_v4  ;;  %v2254_v11 = vadd.f32 1.0, %v2126_v44  ;;  %v1488_v49 = vadd.f32 -0.0013888889, %v1360_v27  ;;  %vm2510_vm4 = vcmp.ge.f32.partialorder %v4218_v53, 5.0  ;;  %v2127_v33 = vmul.f32 %v1999_v60, %v4255_v19 }
 0x190   : > { %v2637_v28 = vsel %vm2509_vm3, 0.0, %v2381_v29  ;;  %v1361_v41 = vmul.f32 %v1233_v12, %v4294_v23  ;;  %v850_v46 = vmul.f32 2.0876756e-09, %v4320_v30  ;;  %v467_v31 = vand.u32 2147483647, %v339_v21 }
 0x191   : > { %2765 = vst [vmem:[%s3321_s17 + $0x218] sm:$0xff] %v2637_v28  ;;  %v2382_v2 = vmul.f32 %v2254_v11, %v2254_v11  ;;  %v1616_v32 = vmul.f32 %v1488_v49, %v4284_v59  ;;  %v2255_v20 = vadd.f32 1.0, %v2127_v33  ;;  %v340_v51 = vmul.f32 0.31415927, %v4324_v22  ;;  %v4373_v33 = vld [vmem:[%s3208_s30 + $0x270] sm:$0xff] }
 0x192   : > { %v1489_v16 = vadd.f32 -0.0013888889, %v1361_v41  ;;  %vm2511_vm5 = vcmp.ge.f32.partialorder %v4233_v47, 5.0  ;;  %v978_v10 = vadd.f32 -2.755732e-07, %v850_v46  ;;  %vm2512_vm6 = vcmp.ge.f32.partialorder %v4258_v40, 5.0 }
 0x193   : > { %v2638_v53 = vsel %vm2510_vm4, 0.0, %v2382_v2  ;;  %v1744_v19 = vadd.f32 0.041666668, %v1616_v32  ;;  %v2383_v3 = vmul.f32 %v2255_v20, %v2255_v20  ;;  %v595_v62 = vmin.f32 %v467_v31, 1.5707964 }
 0x194   : > { %2766 = vst [vmem:[%s3321_s17 + $0x220] sm:$0xff] %v2638_v53  ;;  %v1617_v17 = vmul.f32 %v1489_v16, %v4294_v23  ;;  %v468_v1 = vand.u32 2147483647, %v340_v51  ;;  %v1106_v13 = vmul.f32 %v978_v10, %v4320_v30  ;;  %v341_v8 = vmul.f32 0.31415927, %v4335_v34 }
 0x195   : > { %v1872_v48 = vmul.f32 %v1744_v19, %v4284_v59  ;;  %v342_v42 = vmul.f32 0.31415927, %v4339_v18  ;;  %v2639_v9 = vsel %vm2511_vm5, 0.0, %v2383_v3  ;;  %v4348_v36 = vmul.f32 %v595_v62, %v595_v62 }
 0x196   : > { %v1745_v47 = vadd.f32 0.041666668, %v1617_v17  ;;  %v596_v52 = vmin.f32 %v468_v1, 1.5707964  ;;  %2767 = vst [vmem:[%s3321_s17 + $0x228] sm:$0xff] %v2639_v9  ;;  %vm2513_vm7 = vcmp.ge.f32.partialorder %v4269_v14, 5.0 }
 0x197   : > { %v2000_v39 = vadd.f32 -0.5, %v1872_v48  ;;  %v1234_v5 = vadd.f32 2.4801588e-05, %v1106_v13  ;;  %v469_v43 = vand.u32 2147483647, %v341_v8  ;;  %v4388_v17 = vld [vmem:[%s3208_s30 + $0x278] sm:$0xff] }
 0x198   : > { %v1873_v6 = vmul.f32 %v1745_v47, %v4294_v23  ;;  %v851_v50 = vmul.f32 2.0876756e-09, %v4348_v36  ;;  %v4356_v37 = vmul.f32 %v596_v52, %v596_v52  ;;  %v470_v7 = vand.u32 2147483647, %v342_v42 }
 0x199   : > { %v2128_v63 = vmul.f32 %v2000_v39, %v4284_v59  ;;  %v1362_v57 = vmul.f32 %v1234_v5, %v4320_v30  ;;  %v597_v26 = vmin.f32 %v469_v43, 1.5707964  ;;  %v343_v56 = vmul.f32 0.31415927, %v4351_v45 }
 0x19a   : > { %v2001_v25 = vadd.f32 -0.5, %v1873_v6  ;;  %v979_v58 = vadd.f32 -2.755732e-07, %v851_v50  ;;  %v852_v54 = vmul.f32 2.0876756e-09, %v4356_v37  ;;  %vm2514_vm8 = vcmp.ge.f32.partialorder %v4297_v0, 5.0 }
 0x19b   : > { %v2256_v61 = vadd.f32 1.0, %v2128_v63  ;;  %v1490_v38 = vadd.f32 -0.0013888889, %v1362_v57  ;;  %v4363_v15 = vmul.f32 %v597_v26, %v597_v26  ;;  %v598_v35 = vmin.f32 %v470_v7, 1.5707964 }
 0x19c   : > { %v2129_v4 = vmul.f32 %v2001_v25, %v4294_v23  ;;  %v1107_v59 = vmul.f32 %v979_v58, %v4348_v36  ;;  %v980_v44 = vadd.f32 -2.755732e-07, %v852_v54  ;;  %v471_v27 = vand.u32 2147483647, %v343_v56 }
 0x19d   : > { %v2384_v55 = vmul.f32 %v2256_v61, %v2256_v61  ;;  %v1618_v29 = vmul.f32 %v1490_v38, %v4320_v30  ;;  %v853_v60 = vmul.f32 2.0876756e-09, %v4363_v15  ;;  %v4369_v12 = vmul.f32 %v598_v35, %v598_v35 }
 0x19e   : > { %v2257_v11 = vadd.f32 1.0, %v2129_v4  ;;  %v1235_v49 = vadd.f32 2.4801588e-05, %v1107_v59  ;;  %v1108_v21 = vmul.f32 %v980_v44, %v4356_v37  ;;  %v599_v28 = vmin.f32 %v471_v27, 1.5707964 }
 0x19f   : > { %v2640_v23 = vsel %vm2512_vm6, 0.0, %v2384_v55  ;;  %v1746_v41 = vadd.f32 0.041666668, %v1618_v29  ;;  %v981_v2 = vadd.f32 -2.755732e-07, %v853_v60  ;;  %vm2515_vm9 = vcmp.ge.f32.partialorder %v4312_v24, 5.0 }
 0x1a0   : > { %2768 = vst [vmem:[%s3321_s17 + $0x230] sm:$0xff] %v2640_v23  ;;  %v2385_v32 = vmul.f32 %v2257_v11, %v2257_v11  ;;  %v1363_v46 = vmul.f32 %v1235_v49, %v4348_v36  ;;  %v1236_v31 = vadd.f32 2.4801588e-05, %v1108_v21  ;;  %v854_v20 = vmul.f32 2.0876756e-09, %v4369_v12  ;;  %v4410_v29 = vld [vmem:[%s3208_s30 + $0x280] sm:$0xff] }
 0x1a1   : > { %v1874_v16 = vmul.f32 %v1746_v41, %v4320_v30  ;;  %v1109_v51 = vmul.f32 %v981_v2, %v4363_v15  ;;  %v4383_v53 = vmul.f32 %v599_v28, %v599_v28  ;;  %v344_v40 = vmul.f32 0.31415927, %v4373_v33 }
 0x1a2   : > { %v2641_v14 = vsel %vm2513_vm7, 0.0, %v2385_v32  ;;  %v1491_v19 = vadd.f32 -0.0013888889, %v1363_v46  ;;  %v1364_v10 = vmul.f32 %v1236_v31, %v4356_v37  ;;  %v982_v3 = vadd.f32 -2.755732e-07, %v854_v20 }
 0x1a3   : > { %2769 = vst [vmem:[%s3321_s17 + $0x238] sm:$0xff] %v2641_v14  ;;  %v2002_v62 = vadd.f32 -0.5, %v1874_v16  ;;  %v1237_v1 = vadd.f32 2.4801588e-05, %v1109_v51  ;;  %v855_v48 = vmul.f32 2.0876756e-09, %v4383_v53 }
 0x1a4   : > { %v1619_v13 = vmul.f32 %v1491_v19, %v4348_v36  ;;  %v1492_v8 = vadd.f32 -0.0013888889, %v1364_v10  ;;  %v1110_v42 = vmul.f32 %v982_v3, %v4369_v12  ;;  %v472_v9 = vand.u32 2147483647, %v344_v40 }
 0x1a5   : > { %v2130_v47 = vmul.f32 %v2002_v62, %v4320_v30  ;;  %v1365_v52 = vmul.f32 %v1237_v1, %v4363_v15  ;;  %v983_v39 = vadd.f32 -2.755732e-07, %v855_v48  ;;  %v345_v5 = vmul.f32 0.31415927, %v4388_v17 }
 0x1a6   : > { %v1747_v43 = vadd.f32 0.041666668, %v1619_v13  ;;  %v1620_v6 = vmul.f32 %v1492_v8, %v4356_v37  ;;  %v1238_v50 = vadd.f32 2.4801588e-05, %v1110_v42  ;;  %v600_v7 = vmin.f32 %v472_v9, 1.5707964 }
 0x1a7   : > { %v2258_v63 = vadd.f32 1.0, %v2130_v47  ;;  %v1493_v57 = vadd.f32 -0.0013888889, %v1365_v52  ;;  %v1111_v26 = vmul.f32 %v983_v39, %v4383_v53  ;;  %v473_v56 = vand.u32 2147483647, %v345_v5 }
 0x1a8   : > { %v1875_v30 = vmul.f32 %v1747_v43, %v4348_v36  ;;  %v1748_v25 = vadd.f32 0.041666668, %v1620_v6  ;;  %v1366_v58 = vmul.f32 %v1238_v50, %v4369_v12  ;;  %v4403_v54 = vmul.f32 %v600_v7, %v600_v7 }
 0x1a9   : > { %v2386_v61 = vmul.f32 %v2258_v63, %v2258_v63  ;;  %vm2516_vm10 = vcmp.ge.f32.partialorder %v4324_v22, 5.0  ;;  %v1621_v38 = vmul.f32 %v1493_v57, %v4363_v15  ;;  %v1239_v35 = vadd.f32 2.4801588e-05, %v1111_v26 }
 0x1aa   : > { %v601_v4 = vmin.f32 %v473_v56, 1.5707964  ;;  %v2003_v59 = vadd.f32 -0.5, %v1875_v30  ;;  %v1876_v44 = vmul.f32 %v1748_v25, %v4356_v37  ;;  %v1494_v27 = vadd.f32 -0.0013888889, %v1366_v58  ;;  %v4447_v25 = vld [vmem:[%s3208_s30 + $0x290] sm:$0xff] }
 0x1ab   : > { %v856_v55 = vmul.f32 2.0876756e-09, %v4403_v54  ;;  %v2642_v60 = vsel %vm2514_vm8, 0.0, %v2386_v61  ;;  %v1749_v11 = vadd.f32 0.041666668, %v1621_v38  ;;  %v1367_v49 = vmul.f32 %v1239_v35, %v4383_v53 }
 0x1ac   : > { %v4415_v21 = vmul.f32 %v601_v4, %v601_v4  ;;  %2770 = vst [vmem:[%s3321_s17 + $0x240] sm:$0xff] %v2642_v60  ;;  %v2131_v28 = vmul.f32 %v2003_v59, %v4348_v36  ;;  %v2004_v23 = vadd.f32 -0.5, %v1876_v44  ;;  %v1622_v41 = vmul.f32 %v1494_v27, %v4369_v12  ;;  %v4454_v4 = vld [vmem:[%s3208_s30 + $0x298] sm:$0xff] }
 0x1ad   : > { %v984_v2 = vadd.f32 -2.755732e-07, %v856_v55  ;;  %v1877_v32 = vmul.f32 %v1749_v11, %v4363_v15  ;;  %v1495_v46 = vadd.f32 -0.0013888889, %v1367_v49  ;;  %v346_v0 = vmul.f32 0.31415927, %v4410_v29 }
 0x1ae   : > { %v857_v31 = vmul.f32 2.0876756e-09, %v4415_v21  ;;  %v2259_v20 = vadd.f32 1.0, %v2131_v28  ;;  %v2132_v16 = vmul.f32 %v2004_v23, %v4356_v37  ;;  %v1750_v51 = vadd.f32 0.041666668, %v1622_v41 }
 0x1af   : > { %v1112_v40 = vmul.f32 %v984_v2, %v4403_v54  ;;  %v2005_v14 = vadd.f32 -0.5, %v1877_v32  ;;  %v1623_v36 = vmul.f32 %v1495_v46, %v4383_v53  ;;  %v474_v10 = vand.u32 2147483647, %v346_v0  ;;  %v4465_v2 = vld [vmem:[%s3208_s30 + $0x2a0] sm:$0xff] }
 0x1b0   : > { %v985_v19 = vadd.f32 -2.755732e-07, %v857_v31  ;;  %v2387_v3 = vmul.f32 %v2259_v20, %v2259_v20  ;;  %v2260_v62 = vadd.f32 1.0, %v2132_v16  ;;  %v1878_v1 = vmul.f32 %v1750_v51, %v4369_v12 }
 0x1b1   : > { %v1240_v48 = vadd.f32 2.4801588e-05, %v1112_v40  ;;  %v2133_v13 = vmul.f32 %v2005_v14, %v4363_v15  ;;  %v1751_v8 = vadd.f32 0.041666668, %v1623_v36  ;;  %v602_v42 = vmin.f32 %v474_v10, 1.5707964 }
 0x1b2   : > { %v1113_v37 = vmul.f32 %v985_v19, %v4415_v21  ;;  %v2643_v9 = vsel %vm2515_vm9, 0.0, %v2387_v3  ;;  %v2388_v47 = vmul.f32 %v2260_v62, %v2260_v62  ;;  %v2006_v52 = vadd.f32 -0.5, %v1878_v1  ;;  %v4437_v15 = vld [vmem:[%s3208_s30 + $0x288] sm:$0xff] }
 0x1b3   : > { %v1368_v39 = vmul.f32 %v1240_v48, %v4403_v54  ;;  %2771 = vst [vmem:[%s3321_s17 + $0x248] sm:$0xff] %v2643_v9  ;;  %v2261_v5 = vadd.f32 1.0, %v2133_v13  ;;  %v1879_v43 = vmul.f32 %v1751_v8, %v4383_v53  ;;  %v4434_v50 = vmul.f32 %v602_v42, %v602_v42 }
 0x1b4   : > { %v1241_v6 = vadd.f32 2.4801588e-05, %v1113_v37  ;;  %v2644_v7 = vsel %vm2516_vm10, 0.0, %v2388_v47  ;;  %vm2517_vm11 = vcmp.ge.f32.partialorder %v4335_v34, 5.0  ;;  %v2134_v24 = vmul.f32 %v2006_v52, %v4369_v12 }
 0x1b5   : > { %v1496_v63 = vadd.f32 -0.0013888889, %v1368_v39  ;;  %2772 = vst [vmem:[%s3321_s17 + $0x250] sm:$0xff] %v2644_v7  ;;  %v2389_v57 = vmul.f32 %v2261_v5, %v2261_v5  ;;  %v2007_v26 = vadd.f32 -0.5, %v1879_v43  ;;  %v858_v30 = vmul.f32 2.0876756e-09, %v4434_v50 }
 0x1b6   : > { %v1369_v56 = vmul.f32 %v1241_v6, %v4415_v21  ;;  %v2262_v58 = vadd.f32 1.0, %v2134_v24  ;;  %vm2518_vm12 = vcmp.ge.f32.partialorder %v4339_v18, 5.0  ;;  %v347_v34 = vmul.f32 0.31415927, %v4437_v15  ;;  %v4493_v7 = vld [vmem:[%s3208_s30 + $0x2b0] sm:$0xff] }
 0x1b7   : > { %v1624_v22 = vmul.f32 %v1496_v63, %v4403_v54  ;;  %v2645_v12 = vsel %vm2517_vm11, 0.0, %v2389_v57  ;;  %v2135_v61 = vmul.f32 %v2007_v26, %v4383_v53  ;;  %v986_v35 = vadd.f32 -2.755732e-07, %v858_v30 }
 0x1b8   : > { %v1497_v38 = vadd.f32 -0.0013888889, %v1369_v56  ;;  %2773 = vst [vmem:[%s3321_s17 + $0x258] sm:$0xff] %v2645_v12  ;;  %v2390_v59 = vmul.f32 %v2262_v58, %v2262_v58  ;;  %v475_v27 = vand.u32 2147483647, %v347_v34  ;;  %vm2519_vm13 = vcmp.ge.f32.partialorder %v4351_v45, 5.0 }
 0x1b9   : > { %v1752_v44 = vadd.f32 0.041666668, %v1624_v22  ;;  %v348_v55 = vmul.f32 0.31415927, %v4447_v25  ;;  %v2263_v60 = vadd.f32 1.0, %v2135_v61  ;;  %v1114_v49 = vmul.f32 %v986_v35, %v4434_v50  ;;  %v4482_v45 = vld [vmem:[%s3208_s30 + $0x2a8] sm:$0xff] }
 0x1ba   : > { %v1625_v11 = vmul.f32 %v1497_v38, %v4415_v21  ;;  %v2646_v53 = vsel %vm2518_vm12, 0.0, %v2390_v59  ;;  %v603_v23 = vmin.f32 %v475_v27, 1.5707964  ;;  %v349_v0 = vmul.f32 0.31415927, %v4454_v4  ;;  %v4508_v59 = vld [vmem:[%s3208_s30 + $0x2b8] sm:$0xff] }
 0x1bb   : > { %v1880_v28 = vmul.f32 %v1752_v44, %v4403_v54  ;;  %v476_v41 = vand.u32 2147483647, %v348_v55  ;;  %2774 = vst [vmem:[%s3321_s17 + $0x260] sm:$0xff] %v2646_v53  ;;  %v2391_v32 = vmul.f32 %v2263_v60, %v2263_v60  ;;  %v1242_v31 = vadd.f32 2.4801588e-05, %v1114_v49 }
 0x1bc   : > { %v1753_v46 = vadd.f32 0.041666668, %v1625_v11  ;;  %v4469_v16 = vmul.f32 %v603_v23, %v603_v23  ;;  %v477_v36 = vand.u32 2147483647, %v349_v0  ;;  %v350_v62 = vmul.f32 0.31415927, %v4465_v2 }
 0x1bd   : > { %v2008_v20 = vadd.f32 -0.5, %v1880_v28  ;;  %v604_v51 = vmin.f32 %v476_v41, 1.5707964  ;;  %v2647_v18 = vsel %vm2519_vm13, 0.0, %v2391_v32  ;;  %v1370_v14 = vmul.f32 %v1242_v31, %v4434_v50 }
 0x1be   : > { %v1881_v40 = vmul.f32 %v1753_v46, %v4415_v21  ;;  %2775 = vst [vmem:[%s3321_s17 + $0x268] sm:$0xff] %v2647_v18  ;;  %v859_v10 = vmul.f32 2.0876756e-09, %v4469_v16  ;;  %v605_v13 = vmin.f32 %v477_v36, 1.5707964  ;;  %vm2520_vm14 = vcmp.ge.f32.partialorder %v4373_v33, 5.0 }
 0x1bf   : > { %v2136_v19 = vmul.f32 %v2008_v20, %v4403_v54  ;;  %v4478_v3 = vmul.f32 %v604_v51, %v604_v51  ;;  %v1498_v48 = vadd.f32 -0.0013888889, %v1370_v14  ;;  %v478_v52 = vand.u32 2147483647, %v350_v62 }
 0x1c0   : > { %v2009_v1 = vadd.f32 -0.5, %v1881_v40  ;;  %v987_v37 = vadd.f32 -2.755732e-07, %v859_v10  ;;  %v4488_v47 = vmul.f32 %v605_v13, %v605_v13  ;;  %v351_v6 = vmul.f32 0.31415927, %v4482_v45 }
 0x1c1   : > { %v2264_v8 = vadd.f32 1.0, %v2136_v19  ;;  %v860_v42 = vmul.f32 2.0876756e-09, %v4478_v3  ;;  %v1626_v9 = vmul.f32 %v1498_v48, %v4434_v50  ;;  %vm2521_vm15 = vcmp.ge.f32.partialorder %v4388_v17, 5.0 }
 0x1c2   : > { %v2137_v54 = vmul.f32 %v2009_v1, %v4415_v21  ;;  %v1115_v5 = vmul.f32 %v987_v37, %v4469_v16  ;;  %v861_v21 = vmul.f32 2.0876756e-09, %v4488_v47  ;;  %vm2522_vm0 = vcmp.ge.f32.partialorder %v4410_v29, 5.0 }
 0x1c3   : > { %v2392_v39 = vmul.f32 %v2264_v8, %v2264_v8  ;;  %v988_v43 = vadd.f32 -2.755732e-07, %v860_v42  ;;  %v1754_v63 = vadd.f32 0.041666668, %v1626_v9  ;;  %v606_v30 = vmin.f32 %v478_v52, 1.5707964 }
 0x1c4   : > { %v2265_v24 = vadd.f32 1.0, %v2137_v54  ;;  %v1243_v26 = vadd.f32 2.4801588e-05, %v1115_v5  ;;  %v989_v34 = vadd.f32 -2.755732e-07, %v861_v21  ;;  %vm2523_vm1 = vcmp.ge.f32.partialorder %v4437_v15, 5.0 }
 0x1c5   : > { %v2648_v57 = vsel %vm2520_vm14, 0.0, %v2392_v39  ;;  %v1116_v56 = vmul.f32 %v988_v43, %v4478_v3  ;;  %v1882_v22 = vmul.f32 %v1754_v63, %v4434_v50  ;;  %v479_v12 = vand.u32 2147483647, %v351_v6 }
 0x1c6   : > { %2776 = vst [vmem:[%s3321_s17 + $0x270] sm:$0xff] %v2648_v57  ;;  %v2393_v58 = vmul.f32 %v2265_v24, %v2265_v24  ;;  %v1371_v61 = vmul.f32 %v1243_v26, %v4469_v16  ;;  %v4504_v35 = vmul.f32 %v606_v30, %v606_v30  ;;  %v352_v33 = vmul.f32 0.31415927, %v4493_v7 }
 0x1c7   : > { %v1244_v38 = vadd.f32 2.4801588e-05, %v1116_v56  ;;  %v2010_v27 = vadd.f32 -0.5, %v1882_v22  ;;  %v1117_v55 = vmul.f32 %v989_v34, %v4488_v47  ;;  %v607_v60 = vmin.f32 %v479_v12, 1.5707964  ;;  %v4543_v22 = vld [vmem:[%s3208_s30 + $0x2c0] sm:$0xff] }
 0x1c8   : > { %v2649_v44 = vsel %vm2521_vm15, 0.0, %v2393_v58  ;;  %v1499_v11 = vadd.f32 -0.0013888889, %v1371_v61  ;;  %v862_v53 = vmul.f32 2.0876756e-09, %v4504_v35  ;;  %vm2524_vm2 = vcmp.ge.f32.partialorder %v4447_v25, 5.0 }
 0x1c9   : > { %2777 = vst [vmem:[%s3321_s17 + $0x278] sm:$0xff] %v2649_v44  ;;  %v1372_v49 = vmul.f32 %v1244_v38, %v4478_v3  ;;  %v480_v28 = vand.u32 2147483647, %v352_v33  ;;  %v2138_v23 = vmul.f32 %v2010_v27, %v4434_v50  ;;  %v1245_v41 = vadd.f32 2.4801588e-05, %v1117_v55 }
 0x1ca   : > { %v4517_v32 = vmul.f32 %v607_v60, %v607_v60  ;;  %v353_v46 = vmul.f32 0.31415927, %v4508_v59  ;;  %v1627_v17 = vmul.f32 %v1499_v11, %v4469_v16  ;;  %v990_v0 = vadd.f32 -2.755732e-07, %v862_v53 }
 0x1cb   : > { %v1500_v31 = vadd.f32 -0.0013888889, %v1372_v49  ;;  %v608_v20 = vmin.f32 %v480_v28, 1.5707964  ;;  %v2266_v51 = vadd.f32 1.0, %v2138_v23  ;;  %v1373_v18 = vmul.f32 %v1245_v41, %v4488_v47 }
 0x1cc   : > { %v863_v40 = vmul.f32 2.0876756e-09, %v4517_v32  ;;  %v481_v14 = vand.u32 2147483647, %v353_v46  ;;  %v1755_v36 = vadd.f32 0.041666668, %v1627_v17  ;;  %v1118_v50 = vmul.f32 %v990_v0, %v4504_v35 }
 0x1cd   : > { %v1628_v19 = vmul.f32 %v1500_v31, %v4478_v3  ;;  %v4525_v10 = vmul.f32 %v608_v20, %v608_v20  ;;  %v2394_v62 = vmul.f32 %v2266_v51, %v2266_v51  ;;  %v1501_v1 = vadd.f32 -0.0013888889, %v1373_v18 }
 0x1ce   : > { %v991_v48 = vadd.f32 -2.755732e-07, %v863_v40  ;;  %v609_v13 = vmin.f32 %v481_v14, 1.5707964  ;;  %v1883_v8 = vmul.f32 %v1755_v36, %v4469_v16  ;;  %v1246_v42 = vadd.f32 2.4801588e-05, %v1118_v50 }
 0x1cf   : > { %v1756_v37 = vadd.f32 0.041666668, %v1628_v19  ;;  %v864_v54 = vmul.f32 2.0876756e-09, %v4525_v10  ;;  %v2650_v9 = vsel %vm2522_vm0, 0.0, %v2394_v62  ;;  %v1629_v52 = vmul.f32 %v1501_v1, %v4488_v47 }
 0x1d0   : > { %v1119_v39 = vmul.f32 %v991_v48, %v4517_v32  ;;  %v4534_v5 = vmul.f32 %v609_v13, %v609_v13  ;;  %2778 = vst [vmem:[%s3321_s17 + $0x280] sm:$0xff] %v2650_v9  ;;  %v2011_v43 = vadd.f32 -0.5, %v1883_v8  ;;  %v1374_v24 = vmul.f32 %v1246_v42, %v4504_v35  ;;  %v4572_v8 = vld [vmem:[%s3208_s30 + $0x2d0] sm:$0xff] }
 0x1d1   : > { %v1884_v6 = vmul.f32 %v1756_v37, %v4478_v3  ;;  %v992_v63 = vadd.f32 -2.755732e-07, %v864_v54  ;;  %v1757_v21 = vadd.f32 0.041666668, %v1629_v52  ;;  %v354_v11 = vmul.f32 0.31415927, %v4543_v22 }
 0x1d2   : > { %v1247_v57 = vadd.f32 2.4801588e-05, %v1119_v39  ;;  %v865_v26 = vmul.f32 2.0876756e-09, %v4534_v5  ;;  %v2139_v29 = vmul.f32 %v2011_v43, %v4469_v16  ;;  %v1502_v30 = vadd.f32 -0.0013888889, %v1374_v24 }
 0x1d3   : > { %v2012_v56 = vadd.f32 -0.5, %v1884_v6  ;;  %v1120_v58 = vmul.f32 %v992_v63, %v4525_v10  ;;  %v1885_v34 = vmul.f32 %v1757_v21, %v4488_v47  ;;  %v482_v17 = vand.u32 2147483647, %v354_v11  ;;  %v4583_v63 = vld [vmem:[%s3208_s30 + $0x2d8] sm:$0xff]  ;;  %v4597_v11 = vld [vmem:[%s3208_s30 + $0x2e0] sm:$0xff] }
 0x1d4   : > { %v1375_v12 = vmul.f32 %v1247_v57, %v4517_v32  ;;  %v993_v61 = vadd.f32 -2.755732e-07, %v865_v26  ;;  %v2267_v38 = vadd.f32 1.0, %v2139_v29  ;;  %v1630_v44 = vmul.f32 %v1502_v30, %v4504_v35 }
 0x1d5   : > { %v2140_v33 = vmul.f32 %v2012_v56, %v4478_v3  ;;  %v1248_v27 = vadd.f32 2.4801588e-05, %v1120_v58  ;;  %v2013_v16 = vadd.f32 -0.5, %v1885_v34  ;;  %v610_v36 = vmin.f32 %v482_v17, 1.5707964 }
 0x1d6   : > { %v1503_v55 = vadd.f32 -0.0013888889, %v1375_v12  ;;  %v1121_v60 = vmul.f32 %v993_v61, %v4534_v5  ;;  %v2395_v49 = vmul.f32 %v2267_v38, %v2267_v38  ;;  %v1758_v28 = vadd.f32 0.041666668, %v1630_v44 }
 0x1d7   : > { %v2268_v53 = vadd.f32 1.0, %v2140_v33  ;;  %v1376_v23 = vmul.f32 %v1248_v27, %v4525_v10  ;;  %v2141_v41 = vmul.f32 %v2013_v16, %v4488_v47  ;;  %v4561_v47 = vld [vmem:[%s3208_s30 + $0x2c8] sm:$0xff]  ;;  %vm2525_vm3 = vcmp.ge.f32.partialorder %v4454_v4, 5.0 }
 0x1d8   : > { %v1631_v3 = vmul.f32 %v1503_v55, %v4517_v32  ;;  %v1249_v46 = vadd.f32 2.4801588e-05, %v1121_v60  ;;  %v2651_v31 = vsel %vm2523_vm1, 0.0, %v2395_v49  ;;  %v1886_v20 = vmul.f32 %v1758_v28, %v4504_v35 }
 0x1d9   : > { %v2396_v0 = vmul.f32 %v2268_v53, %v2268_v53  ;;  %v1504_v51 = vadd.f32 -0.0013888889, %v1376_v23  ;;  %2779 = vst [vmem:[%s3321_s17 + $0x288] sm:$0xff] %v2651_v31  ;;  %v2269_v18 = vadd.f32 1.0, %v2141_v41  ;;  %v4569_v13 = vmul.f32 %v610_v36, %v610_v36 }
 0x1da   : > { %v1759_v40 = vadd.f32 0.041666668, %v1631_v3  ;;  %v1377_v14 = vmul.f32 %v1249_v46, %v4534_v5  ;;  %v2014_v15 = vadd.f32 -0.5, %v1886_v20  ;;  %vm2526_vm4 = vcmp.ge.f32.partialorder %v4465_v2, 5.0  ;;  %v4608_v3 = vld [vmem:[%s3208_s30 + $0x2e8] sm:$0xff] }
 0x1db   : > { %v2652_v19 = vsel %vm2524_vm2, 0.0, %v2396_v0  ;;  %v1632_v50 = vmul.f32 %v1504_v51, %v4525_v10  ;;  %v2397_v62 = vmul.f32 %v2269_v18, %v2269_v18  ;;  %v355_v4 = vmul.f32 0.31415927, %v4561_v47 }
 0x1dc   : > { %2780 = vst [vmem:[%s3321_s17 + $0x290] sm:$0xff] %v2652_v19  ;;  %v1887_v1 = vmul.f32 %v1759_v40, %v4517_v32  ;;  %v1505_v48 = vadd.f32 -0.0013888889, %v1377_v14  ;;  %v2142_v37 = vmul.f32 %v2014_v15, %v4504_v35  ;;  %v866_v52 = vmul.f32 2.0876756e-09, %v4569_v13 }
 0x1dd   : > { %v1760_v25 = vadd.f32 0.041666668, %v1632_v50  ;;  %v2653_v42 = vsel %vm2525_vm3, 0.0, %v2397_v62  ;;  %v483_v6 = vand.u32 2147483647, %v355_v4  ;;  %vm2527_vm5 = vcmp.ge.f32.partialorder %v4482_v45, 5.0 }
 0x1de   : > { %v2015_v54 = vadd.f32 -0.5, %v1887_v1  ;;  %v1633_v9 = vmul.f32 %v1505_v48, %v4534_v5  ;;  %2781 = vst [vmem:[%s3321_s17 + $0x298] sm:$0xff] %v2653_v42  ;;  %v2270_v39 = vadd.f32 1.0, %v2142_v37  ;;  %v356_v24 = vmul.f32 0.31415927, %v4572_v8  ;;  %v4625_v37 = vld [vmem:[%s3208_s30 + $0x2f0] sm:$0xff] }
 0x1df   : > { %v1888_v43 = vmul.f32 %v1760_v25, %v4525_v10  ;;  %v994_v57 = vadd.f32 -2.755732e-07, %v866_v52  ;;  %v611_v56 = vmin.f32 %v483_v6, 1.5707964  ;;  %v357_v61 = vmul.f32 0.31415927, %v4583_v63 }
 0x1e0   : > { %v2143_v35 = vmul.f32 %v2015_v54, %v4517_v32  ;;  %v1761_v21 = vadd.f32 0.041666668, %v1633_v9  ;;  %v2398_v26 = vmul.f32 %v2270_v39, %v2270_v39  ;;  %v484_v30 = vand.u32 2147483647, %v356_v24 }
 0x1e1   : > { %v2016_v29 = vadd.f32 -0.5, %v1888_v43  ;;  %v1122_v12 = vmul.f32 %v994_v57, %v4569_v13  ;;  %v4593_v33 = vmul.f32 %v611_v56, %v611_v56  ;;  %v485_v60 = vand.u32 2147483647, %v357_v61 }
 0x1e2   : > { %v2271_v58 = vadd.f32 1.0, %v2143_v35  ;;  %v1889_v34 = vmul.f32 %v1761_v21, %v4534_v5  ;;  %v2654_v32 = vsel %vm2526_vm4, 0.0, %v2398_v26  ;;  %v612_v44 = vmin.f32 %v484_v30, 1.5707964 }
 0x1e3   : > { %v2144_v38 = vmul.f32 %v2016_v29, %v4525_v10  ;;  %2782 = vst [vmem:[%s3321_s17 + $0x2a0] sm:$0xff] %v2654_v32  ;;  %v1250_v55 = vadd.f32 2.4801588e-05, %v1122_v12  ;;  %vm2528_vm6 = vcmp.ge.f32.partialorder %v4493_v7, 5.0  ;;  %v867_v2 = vmul.f32 2.0876756e-09, %v4593_v33 }
 0x1e4   : > { %v2399_v27 = vmul.f32 %v2271_v58, %v2271_v58  ;;  %v2017_v16 = vadd.f32 -0.5, %v1889_v34  ;;  %v4601_v53 = vmul.f32 %v612_v44, %v612_v44  ;;  %v613_v41 = vmin.f32 %v485_v60, 1.5707964  ;;  %v4628_v7 = vld [vmem:[%s3208_s30 + $0x2f8] sm:$0xff] }
 0x1e5   : > { %v2272_v49 = vadd.f32 1.0, %v2144_v38  ;;  %v1378_v23 = vmul.f32 %v1250_v55, %v4569_v13  ;;  %v995_v17 = vadd.f32 -2.755732e-07, %v867_v2  ;;  %v358_v0 = vmul.f32 0.31415927, %v4597_v11 }
 0x1e6   : > { %v2655_v10 = vsel %vm2527_vm5, 0.0, %v2399_v27  ;;  %v2145_v28 = vmul.f32 %v2017_v16, %v4534_v5  ;;  %v868_v31 = vmul.f32 2.0876756e-09, %v4601_v53  ;;  %vm2529_vm7 = vcmp.ge.f32.partialorder %v4508_v59, 5.0 }
 0x1e7   : > { %2783 = vst [vmem:[%s3321_s17 + $0x2a8] sm:$0xff] %v2655_v10  ;;  %v2400_v46 = vmul.f32 %v2272_v49, %v2272_v49  ;;  %v1506_v45 = vadd.f32 -0.0013888889, %v1378_v23  ;;  %v4614_v5 = vmul.f32 %v613_v41, %v613_v41  ;;  %v1123_v18 = vmul.f32 %v995_v17, %v4593_v33 }
 0x1e8   : > { %v2273_v20 = vadd.f32 1.0, %v2145_v28  ;;  %v996_v40 = vadd.f32 -2.755732e-07, %v868_v31  ;;  %v486_v14 = vand.u32 2147483647, %v358_v0  ;;  %vm2530_vm8 = vcmp.ge.f32.partialorder %v4543_v22, 5.0 }
 0x1e9   : > { %v2656_v51 = vsel %vm2528_vm6, 0.0, %v2400_v46  ;;  %v1634_v19 = vmul.f32 %v1506_v45, %v4569_v13  ;;  %v869_v15 = vmul.f32 2.0876756e-09, %v4614_v5  ;;  %v359_v50 = vmul.f32 0.31415927, %v4608_v3 }
 0x1ea   : > { %2784 = vst [vmem:[%s3321_s17 + $0x2b0] sm:$0xff] %v2656_v51  ;;  %v2401_v36 = vmul.f32 %v2273_v20, %v2273_v20  ;;  %v1251_v62 = vadd.f32 2.4801588e-05, %v1123_v18  ;;  %v1124_v1 = vmul.f32 %v996_v40, %v4601_v53  ;;  %v614_v48 = vmin.f32 %v486_v14, 1.5707964 }
 0x1eb   : > { %v1762_v4 = vadd.f32 0.041666668, %v1634_v19  ;;  %v997_v42 = vadd.f32 -2.755732e-07, %v869_v15  ;;  %v487_v39 = vand.u32 2147483647, %v359_v50 }
 0x1ec   : > { %v2657_v25 = vsel %vm2529_vm7, 0.0, %v2401_v36  ;;  %v1379_v54 = vmul.f32 %v1251_v62, %v4593_v33  ;;  %v1252_v9 = vadd.f32 2.4801588e-05, %v1124_v1  ;;  %v4634_v52 = vmul.f32 %v614_v48, %v614_v48  ;;  %v4663_v36 = vld [vmem:[%s3208_s30 + $0x300] sm:$0xff] }
 0x1ed   : > { %2785 = vst [vmem:[%s3321_s17 + $0x2b8] sm:$0xff] %v2657_v25  ;;  %v1890_v43 = vmul.f32 %v1762_v4, %v4569_v13  ;;  %v1125_v6 = vmul.f32 %v997_v42, %v4614_v5  ;;  %v360_v24 = vmul.f32 0.31415927, %v4625_v37  ;;  %v361_v35 = vmul.f32 0.31415927, %v4628_v7 }
 0x1ee   : > { %v1507_v21 = vadd.f32 -0.0013888889, %v1379_v54  ;;  %v1380_v59 = vmul.f32 %v1252_v9, %v4601_v53  ;;  %v870_v57 = vmul.f32 2.0876756e-09, %v4634_v52  ;;  %v615_v26 = vmin.f32 %v487_v39, 1.5707964 }
 0x1ef   : > { %v2018_v29 = vadd.f32 -0.5, %v1890_v43  ;;  %v1253_v56 = vadd.f32 2.4801588e-05, %v1125_v6  ;;  %v488_v30 = vand.u32 2147483647, %v360_v24  ;;  %vm2531_vm9 = vcmp.ge.f32.partialorder %v4561_v47, 5.0 }
 0x1f0   : > { %v1635_v58 = vmul.f32 %v1507_v21, %v4593_v33  ;;  %v1508_v34 = vadd.f32 -0.0013888889, %v1380_v59  ;;  %v998_v12 = vadd.f32 -2.755732e-07, %v870_v57  ;;  %v4644_v61 = vmul.f32 %v615_v26, %v615_v26 }
 0x1f1   : > { %v2146_v32 = vmul.f32 %v2018_v29, %v4569_v13  ;;  %v1381_v38 = vmul.f32 %v1253_v56, %v4614_v5  ;;  %v616_v44 = vmin.f32 %v488_v30, 1.5707964  ;;  %v489_v27 = vand.u32 2147483647, %v361_v35 }
 0x1f2   : > { %v1763_v16 = vadd.f32 0.041666668, %v1635_v58  ;;  %v1636_v55 = vmul.f32 %v1508_v34, %v4601_v53  ;;  %v1126_v60 = vmul.f32 %v998_v12, %v4634_v52  ;;  %v871_v49 = vmul.f32 2.0876756e-09, %v4644_v61 }
 0x1f3   : > { %v2274_v2 = vadd.f32 1.0, %v2146_v32  ;;  %v1509_v10 = vadd.f32 -0.0013888889, %v1381_v38  ;;  %v4652_v28 = vmul.f32 %v616_v44, %v616_v44  ;;  %v617_v23 = vmin.f32 %v489_v27, 1.5707964  ;;  %v4686_v38 = vld [vmem:[%s3208_s30 + $0x308] sm:$0xff] }
 0x1f4   : > { %v1891_v13 = vmul.f32 %v1763_v16, %v4593_v33  ;;  %v1764_v41 = vadd.f32 0.041666668, %v1636_v55  ;;  %v1254_v46 = vadd.f32 2.4801588e-05, %v1126_v60  ;;  %v999_v17 = vadd.f32 -2.755732e-07, %v871_v49 }
 0x1f5   : > { %v2402_v31 = vmul.f32 %v2274_v2, %v2274_v2  ;;  %v1637_v0 = vmul.f32 %v1509_v10, %v4614_v5  ;;  %v872_v20 = vmul.f32 2.0876756e-09, %v4652_v28  ;;  %v4657_v45 = vmul.f32 %v617_v23, %v617_v23  ;;  %v4689_v44 = vld [vmem:[%s3208_s30 + $0x310] sm:$0xff] }
 0x1f6   : > { %v2019_v51 = vadd.f32 -0.5, %v1891_v13  ;;  %v1892_v18 = vmul.f32 %v1764_v41, %v4601_v53  ;;  %v1382_v40 = vmul.f32 %v1254_v46, %v4634_v52  ;;  %v1127_v14 = vmul.f32 %v999_v17, %v4644_v61 }
 0x1f7   : > { %v2658_v19 = vsel %vm2530_vm8, 0.0, %v2402_v31  ;;  %vm2532_vm10 = vcmp.ge.f32.partialorder %v4572_v8, 5.0  ;;  %v1765_v15 = vadd.f32 0.041666668, %v1637_v0  ;;  %v1000_v50 = vadd.f32 -2.755732e-07, %v872_v20 }
 0x1f8   : > { %2786 = vst [vmem:[%s3321_s17 + $0x2c0] sm:$0xff] %v2658_v19  ;;  %v2147_v62 = vmul.f32 %v2019_v51, %v4593_v33  ;;  %v2020_v1 = vadd.f32 -0.5, %v1892_v18  ;;  %v1510_v48 = vadd.f32 -0.0013888889, %v1382_v40  ;;  %v1255_v25 = vadd.f32 2.4801588e-05, %v1127_v14 }
 0x1f9   : > { %v1893_v4 = vmul.f32 %v1765_v15, %v4614_v5  ;;  %v1128_v42 = vmul.f32 %v1000_v50, %v4652_v28  ;;  %v873_v54 = vmul.f32 2.0876756e-09, %v4657_v45  ;;  %v362_v9 = vmul.f32 0.31415927, %v4663_v36  ;;  %v4705_v31 = vld [vmem:[%s3208_s30 + $0x318] sm:$0xff] }
 0x1fa   : > { %v2275_v22 = vadd.f32 1.0, %v2147_v62  ;;  %v2148_v39 = vmul.f32 %v2020_v1, %v4601_v53  ;;  %v1638_v43 = vmul.f32 %v1510_v48, %v4634_v52  ;;  %v1383_v6 = vmul.f32 %v1255_v25, %v4644_v61 }
 0x1fb   : > { %v2021_v24 = vadd.f32 -0.5, %v1893_v4  ;;  %vm2533_vm11 = vcmp.ge.f32.partialorder %v4583_v63, 5.0  ;;  %v1256_v33 = vadd.f32 2.4801588e-05, %v1128_v42  ;;  %v1001_v35 = vadd.f32 -2.755732e-07, %v873_v54 }
 0x1fc   : > { %v2403_v21 = vmul.f32 %v2275_v22, %v2275_v22  ;;  %v2276_v59 = vadd.f32 1.0, %v2148_v39  ;;  %v1766_v57 = vadd.f32 0.041666668, %v1638_v43  ;;  %v1511_v26 = vadd.f32 -0.0013888889, %v1383_v6  ;;  %v4717_v4 = vld [vmem:[%s3208_s30 + $0x320] sm:$0xff] }
 0x1fd   : > { %v2149_v29 = vmul.f32 %v2021_v24, %v4614_v5  ;;  %v1384_v53 = vmul.f32 %v1256_v33, %v4652_v28  ;;  %v1129_v56 = vmul.f32 %v1001_v35, %v4657_v45  ;;  %v490_v30 = vand.u32 2147483647, %v362_v9 }
 0x1fe   : > { %v2659_v58 = vsel %vm2531_vm9, 0.0, %v2403_v21  ;;  %v2404_v34 = vmul.f32 %v2276_v59, %v2276_v59  ;;  %v1894_v12 = vmul.f32 %v1766_v57, %v4634_v52  ;;  %v1639_v32 = vmul.f32 %v1511_v26, %v4644_v61  ;;  %v4732_v21 = vld [vmem:[%s3208_s30 + $0x328] sm:$0xff] }
 0x1ff   : > { %2787 = vst [vmem:[%s3321_s17 + $0x2c8] sm:$0xff] %v2659_v58  ;;  %v2277_v5 = vadd.f32 1.0, %v2149_v29  ;;  %vm2534_vm12 = vcmp.ge.f32.partialorder %v4597_v11, 5.0  ;;  %v1512_v27 = vadd.f32 -0.0013888889, %v1384_v53  ;;  %vm2535_vm13 = vcmp.ge.f32.partialorder %v4608_v3, 5.0 }
 0x200   : > { %v1257_v16 = vadd.f32 2.4801588e-05, %v1129_v56  ;;  %v2660_v47 = vsel %vm2532_vm10, 0.0, %v2404_v34  ;;  %v2022_v55 = vadd.f32 -0.5, %v1894_v12  ;;  %v1767_v60 = vadd.f32 0.041666668, %v1639_v32 }
 0x201   : > { %v618_v49 = vmin.f32 %v490_v30, 1.5707964  ;;  %2788 = vst [vmem:[%s3321_s17 + $0x2d0] sm:$0xff] %v2660_v47  ;;  %v2405_v2 = vmul.f32 %v2277_v5, %v2277_v5  ;;  %v1640_v10 = vmul.f32 %v1512_v27, %v4652_v28  ;;  %v363_v13 = vmul.f32 0.31415927, %v4686_v38 }
 0x202   : > { %v1385_v23 = vmul.f32 %v1257_v16, %v4657_v45  ;;  %v2150_v41 = vmul.f32 %v2022_v55, %v4634_v52  ;;  %v1895_v46 = vmul.f32 %v1767_v60, %v4644_v61  ;;  %v364_v8 = vmul.f32 0.31415927, %v4689_v44 }
 0x203   : > { %v4701_v17 = vmul.f32 %v618_v49, %v618_v49  ;;  %v2661_v0 = vsel %vm2533_vm11, 0.0, %v2405_v2  ;;  %v1768_v20 = vadd.f32 0.041666668, %v1640_v10  ;;  %v491_v14 = vand.u32 2147483647, %v363_v13 }
 0x204   : > { %v1513_v51 = vadd.f32 -0.0013888889, %v1385_v23  ;;  %2789 = vst [vmem:[%s3321_s17 + $0x2d8] sm:$0xff] %v2661_v0  ;;  %v2278_v18 = vadd.f32 1.0, %v2150_v41  ;;  %v2023_v40 = vadd.f32 -0.5, %v1895_v46  ;;  %vm2536_vm14 = vcmp.ge.f32.partialorder %v4625_v37, 5.0 }
 0x205   : > { %v874_v52 = vmul.f32 2.0876756e-09, %v4701_v17  ;;  %v1896_v19 = vmul.f32 %v1768_v20, %v4652_v28  ;;  %v492_v50 = vand.u32 2147483647, %v364_v8  ;;  %v365_v63 = vmul.f32 0.31415927, %v4705_v31 }
 0x206   : > { %v1641_v15 = vmul.f32 %v1513_v51, %v4657_v45  ;;  %v2406_v62 = vmul.f32 %v2278_v18, %v2278_v18  ;;  %v2151_v1 = vmul.f32 %v2023_v40, %v4644_v61  ;;  %v619_v25 = vmin.f32 %v491_v14, 1.5707964  ;;  %v4755_v8 = vld [vmem:[%s3208_s30 + $0x330] sm:$0xff] }
 0x207   : > { %v1002_v48 = vadd.f32 -2.755732e-07, %v874_v52  ;;  %v2024_v42 = vadd.f32 -0.5, %v1896_v19  ;;  %v620_v9 = vmin.f32 %v492_v50, 1.5707964  ;;  %vm2537_vm15 = vcmp.ge.f32.partialorder %v4628_v7, 5.0 }
 0x208   : > { %v1769_v54 = vadd.f32 0.041666668, %v1641_v15  ;;  %v2662_v22 = vsel %vm2534_vm12, 0.0, %v2406_v62  ;;  %v2279_v39 = vadd.f32 1.0, %v2151_v1  ;;  %v4724_v6 = vmul.f32 %v619_v25, %v619_v25 }
 0x209   : > { %v1130_v43 = vmul.f32 %v1002_v48, %v4701_v17  ;;  %2790 = vst [vmem:[%s3321_s17 + $0x2e0] sm:$0xff] %v2662_v22  ;;  %v2152_v61 = vmul.f32 %v2024_v42, %v4652_v28  ;;  %v4729_v33 = vmul.f32 %v620_v9, %v620_v9  ;;  %v493_v35 = vand.u32 2147483647, %v365_v63 }
 0x20a   : > { %v1897_v24 = vmul.f32 %v1769_v54, %v4657_v45  ;;  %v2407_v11 = vmul.f32 %v2279_v39, %v2279_v39  ;;  %v875_v57 = vmul.f32 2.0876756e-09, %v4724_v6  ;;  %v366_v26 = vmul.f32 0.31415927, %v4717_v4 }
 0x20b   : > { %v1258_v59 = vadd.f32 2.4801588e-05, %v1130_v43  ;;  %v2280_v29 = vadd.f32 1.0, %v2152_v61  ;;  %v876_v56 = vmul.f32 2.0876756e-09, %v4729_v33  ;;  %v4772_v43 = vld [vmem:[%s3208_s30 + $0x338] sm:$0xff] }
 0x20c   : > { %v2025_v53 = vadd.f32 -0.5, %v1897_v24  ;;  %v621_v30 = vmin.f32 %v493_v35, 1.5707964  ;;  %v2663_v28 = vsel %vm2535_vm13, 0.0, %v2407_v11  ;;  %v1003_v34 = vadd.f32 -2.755732e-07, %v875_v57 }
 0x20d   : > { %v1386_v58 = vmul.f32 %v1258_v59, %v4701_v17  ;;  %v494_v12 = vand.u32 2147483647, %v366_v26  ;;  %2791 = vst [vmem:[%s3321_s17 + $0x2e8] sm:$0xff] %v2663_v28  ;;  %v2408_v32 = vmul.f32 %v2280_v29, %v2280_v29  ;;  %v1004_v27 = vadd.f32 -2.755732e-07, %v876_v56 }
 0x20e   : > { %v2153_v5 = vmul.f32 %v2025_v53, %v4657_v45  ;;  %v4742_v16 = vmul.f32 %v621_v30, %v621_v30  ;;  %v1131_v55 = vmul.f32 %v1003_v34, %v4724_v6  ;;  %v367_v3 = vmul.f32 0.31415927, %v4732_v21 }
 0x20f   : > { %v1514_v47 = vadd.f32 -0.0013888889, %v1386_v58  ;;  %v622_v60 = vmin.f32 %v494_v12, 1.5707964  ;;  %v2664_v49 = vsel %vm2536_vm14, 0.0, %v2408_v32  ;;  %v1132_v10 = vmul.f32 %v1004_v27, %v4729_v33 }
 0x210   : > { %v2281_v2 = vadd.f32 1.0, %v2153_v5  ;;  %v877_v23 = vmul.f32 2.0876756e-09, %v4742_v16  ;;  %2792 = vst [vmem:[%s3321_s17 + $0x2f0] sm:$0xff] %v2664_v49  ;;  %v1259_v13 = vadd.f32 2.4801588e-05, %v1131_v55 }
 0x211   : > { %v1642_v45 = vmul.f32 %v1514_v47, %v4701_v17  ;;  %v4752_v41 = vmul.f32 %v622_v60, %v622_v60  ;;  %v495_v46 = vand.u32 2147483647, %v367_v3  ;;  %v1260_v20 = vadd.f32 2.4801588e-05, %v1132_v10 }
 0x212   : > { %v2409_v0 = vmul.f32 %v2281_v2, %v2281_v2  ;;  %v1005_v51 = vadd.f32 -2.755732e-07, %v877_v23  ;;  %v1387_v18 = vmul.f32 %v1259_v13, %v4724_v6  ;;  %v368_v50 = vmul.f32 0.31415927, %v4755_v8 }
 0x213   : > { %v1770_v37 = vadd.f32 0.041666668, %v1642_v45  ;;  %v878_v40 = vmul.f32 2.0876756e-09, %v4752_v41  ;;  %v623_v52 = vmin.f32 %v495_v46, 1.5707964  ;;  %v1388_v19 = vmul.f32 %v1260_v20, %v4729_v33 }
 0x214   : > { %v2665_v14 = vsel %vm2537_vm15, 0.0, %v2409_v0  ;;  %v1133_v15 = vmul.f32 %v1005_v51, %v4742_v16  ;;  %v1515_v62 = vadd.f32 -0.0013888889, %v1387_v18  ;;  %v496_v54 = vand.u32 2147483647, %v368_v50  ;;  %v4799_v18 = vld [vmem:[%s3208_s30 + $0x340] sm:$0xff] }
 0x215   : > { %2793 = vst [vmem:[%s3321_s17 + $0x2f8] sm:$0xff] %v2665_v14  ;;  %v1898_v63 = vmul.f32 %v1770_v37, %v4701_v17  ;;  %v1006_v1 = vadd.f32 -2.755732e-07, %v878_v40  ;;  %v4766_v48 = vmul.f32 %v623_v52, %v623_v52  ;;  %v1516_v25 = vadd.f32 -0.0013888889, %v1388_v19 }
 0x216   : > { %v1261_v42 = vadd.f32 2.4801588e-05, %v1133_v15  ;;  %v1643_v7 = vmul.f32 %v1515_v62, %v4724_v6  ;;  %vm2538_vm0 = vcmp.ge.f32.partialorder %v4663_v36, 5.0  ;;  %v624_v35 = vmin.f32 %v496_v54, 1.5707964 }
 0x217   : > { %v2026_v9 = vadd.f32 -0.5, %v1898_v63  ;;  %v1134_v22 = vmul.f32 %v1006_v1, %v4752_v41  ;;  %v879_v39 = vmul.f32 2.0876756e-09, %v4766_v48  ;;  %v1644_v61 = vmul.f32 %v1516_v25, %v4729_v33 }
 0x218   : > { %v1389_v24 = vmul.f32 %v1261_v42, %v4742_v16  ;;  %v1771_v59 = vadd.f32 0.041666668, %v1643_v7  ;;  %vm2539_vm1 = vcmp.ge.f32.partialorder %v4686_v38, 5.0  ;;  %v4779_v56 = vmul.f32 %v624_v35, %v624_v35 }
 0x219   : > { %v2154_v11 = vmul.f32 %v2026_v9, %v4701_v17  ;;  %v1262_v57 = vadd.f32 2.4801588e-05, %v1134_v22  ;;  %v1007_v26 = vadd.f32 -2.755732e-07, %v879_v39  ;;  %v1772_v29 = vadd.f32 0.041666668, %v1644_v61 }
 0x21a   : > { %v1517_v53 = vadd.f32 -0.0013888889, %v1389_v24  ;;  %v369_v30 = vmul.f32 0.31415927, %v4772_v43  ;;  %v1899_v58 = vmul.f32 %v1771_v59, %v4724_v6  ;;  %v880_v5 = vmul.f32 2.0876756e-09, %v4779_v56 }
 0x21b   : > { %v2282_v28 = vadd.f32 1.0, %v2154_v11  ;;  %v1390_v34 = vmul.f32 %v1262_v57, %v4752_v41  ;;  %v1135_v12 = vmul.f32 %v1007_v26, %v4766_v48  ;;  %v1900_v17 = vmul.f32 %v1772_v29, %v4729_v33  ;;  %v4811_v9 = vld [vmem:[%s3208_s30 + $0x348] sm:$0xff] }
 0x21c   : > { %v1645_v32 = vmul.f32 %v1517_v53, %v4742_v16  ;;  %v497_v27 = vand.u32 2147483647, %v369_v30  ;;  %v2027_v55 = vadd.f32 -0.5, %v1899_v58  ;;  %vm2540_vm2 = vcmp.ge.f32.partialorder %v4689_v44, 5.0 }
 0x21d   : > { %v2410_v47 = vmul.f32 %v2282_v28, %v2282_v28  ;;  %v1518_v60 = vadd.f32 -0.0013888889, %v1390_v34  ;;  %v1263_v3 = vadd.f32 2.4801588e-05, %v1135_v12  ;;  %v2028_v49 = vadd.f32 -0.5, %v1900_v17  ;;  %v4827_v12 = vld [vmem:[%s3208_s30 + $0x350] sm:$0xff] }
 0x21e   : > { %v1773_v2 = vadd.f32 0.041666668, %v1645_v32  ;;  %v1008_v10 = vadd.f32 -2.755732e-07, %v880_v5  ;;  %v2155_v45 = vmul.f32 %v2027_v55, %v4724_v6  ;;  %v625_v37 = vmin.f32 %v497_v27, 1.5707964 }
 0x21f   : > { %v2666_v23 = vsel %vm2538_vm0, 0.0, %v2410_v47  ;;  %v1646_v13 = vmul.f32 %v1518_v60, %v4752_v41  ;;  %v1391_v46 = vmul.f32 %v1263_v3, %v4766_v48  ;;  %v2156_v0 = vmul.f32 %v2028_v49, %v4729_v33  ;;  %v4830_v17 = vld [vmem:[%s3208_s30 + $0x358] sm:$0xff] }
 0x220   : > { %2794 = vst [vmem:[%s3321_s17 + $0x300] sm:$0xff] %v2666_v23  ;;  %v1901_v20 = vmul.f32 %v1773_v2, %v4742_v16  ;;  %v1136_v51 = vmul.f32 %v1008_v10, %v4779_v56  ;;  %v2283_v40 = vadd.f32 1.0, %v2155_v45  ;;  %vm2541_vm3 = vcmp.ge.f32.partialorder %v4705_v31, 5.0 }
 0x221   : > { %v1774_v36 = vadd.f32 0.041666668, %v1646_v13  ;;  %v1519_v6 = vadd.f32 -0.0013888889, %v1391_v46  ;;  %v2284_v52 = vadd.f32 1.0, %v2156_v0  ;;  %v4802_v15 = vmul.f32 %v625_v37, %v625_v37  ;;  %v4845_v13 = vld [vmem:[%s3208_s30 + $0x360] sm:$0xff] }
 0x222   : > { %v2029_v14 = vadd.f32 -0.5, %v1901_v20  ;;  %v1264_v19 = vadd.f32 2.4801588e-05, %v1136_v51  ;;  %v2411_v33 = vmul.f32 %v2283_v40, %v2283_v40  ;;  %v370_v62 = vmul.f32 0.31415927, %v4799_v18 }
 0x223   : > { %v1902_v50 = vmul.f32 %v1774_v36, %v4752_v41  ;;  %v1647_v63 = vmul.f32 %v1519_v6, %v4766_v48  ;;  %v2412_v1 = vmul.f32 %v2284_v52, %v2284_v52  ;;  %v881_v54 = vmul.f32 2.0876756e-09, %v4802_v15 }
 0x224   : > { %v2157_v25 = vmul.f32 %v2029_v14, %v4742_v16  ;;  %v1392_v42 = vmul.f32 %v1264_v19, %v4779_v56  ;;  %v2667_v7 = vsel %vm2539_vm1, 0.0, %v2411_v33  ;;  %v498_v61 = vand.u32 2147483647, %v370_v62  ;;  %v4855_v19 = vld [vmem:[%s3208_s30 + $0x368] sm:$0xff] }
 0x225   : > { %v2030_v22 = vadd.f32 -0.5, %v1902_v50  ;;  %v1775_v39 = vadd.f32 0.041666668, %v1647_v63  ;;  %2795 = vst [vmem:[%s3321_s17 + $0x308] sm:$0xff] %v2667_v7  ;;  %v2668_v24 = vsel %vm2540_vm2, 0.0, %v2412_v1  ;;  %vm2542_vm4 = vcmp.ge.f32.partialorder %v4717_v4, 5.0 }
 0x226   : > { %v2285_v35 = vadd.f32 1.0, %v2157_v25  ;;  %v1520_v16 = vadd.f32 -0.0013888889, %v1392_v42  ;;  %v1009_v11 = vadd.f32 -2.755732e-07, %v881_v54  ;;  %2796 = vst [vmem:[%s3321_s17 + $0x310] sm:$0xff] %v2668_v24 }
 0x227   : > { %v2158_v59 = vmul.f32 %v2030_v22, %v4752_v41  ;;  %v1903_v57 = vmul.f32 %v1775_v39, %v4766_v48  ;;  %v626_v38 = vmin.f32 %v498_v61, 1.5707964  ;;  %v371_v26 = vmul.f32 0.31415927, %v4811_v9 }
 0x228   : > { %v2413_v29 = vmul.f32 %v2285_v35, %v2285_v35  ;;  %v1648_v53 = vmul.f32 %v1520_v16, %v4779_v56  ;;  %v1137_v44 = vmul.f32 %v1009_v11, %v4802_v15  ;;  %v372_v31 = vmul.f32 0.31415927, %v4827_v12 }
 0x229   : > { %v2286_v30 = vadd.f32 1.0, %v2158_v59  ;;  %v2031_v28 = vadd.f32 -0.5, %v1903_v57  ;;  %v4824_v58 = vmul.f32 %v626_v38, %v626_v38  ;;  %v499_v34 = vand.u32 2147483647, %v371_v26 }
 0x22a   : > { %v2669_v41 = vsel %vm2541_vm3, 0.0, %v2413_v29  ;;  %v1776_v32 = vadd.f32 0.041666668, %v1648_v53  ;;  %v1265_v5 = vadd.f32 2.4801588e-05, %v1137_v44  ;;  %vm2543_vm5 = vcmp.ge.f32.partialorder %v4732_v21, 5.0 }
 0x22b   : > { %2797 = vst [vmem:[%s3321_s17 + $0x318] sm:$0xff] %v2669_v41  ;;  %v2414_v27 = vmul.f32 %v2286_v30, %v2286_v30  ;;  %v2159_v47 = vmul.f32 %v2031_v28, %v4766_v48  ;;  %v882_v55 = vmul.f32 2.0876756e-09, %v4824_v58  ;;  %v627_v60 = vmin.f32 %v499_v34, 1.5707964  ;;  %v4880_v41 = vld [vmem:[%s3208_s30 + $0x370] sm:$0xff] }
 0x22c   : > { %v1904_v3 = vmul.f32 %v1776_v32, %v4779_v56  ;;  %v1393_v49 = vmul.f32 %v1265_v5, %v4802_v15  ;;  %v373_v2 = vmul.f32 0.31415927, %v4830_v17  ;;  %v500_v0 = vand.u32 2147483647, %v372_v31 }
 0x22d   : > { %v2670_v4 = vsel %vm2542_vm4, 0.0, %v2414_v27  ;;  %v2287_v10 = vadd.f32 1.0, %v2159_v47  ;;  %v1010_v23 = vadd.f32 -2.755732e-07, %v882_v55  ;;  %v4842_v45 = vmul.f32 %v627_v60, %v627_v60 }
 0x22e   : > { %2798 = vst [vmem:[%s3321_s17 + $0x320] sm:$0xff] %v2670_v4  ;;  %v2032_v48 = vadd.f32 -0.5, %v1904_v3  ;;  %v1521_v46 = vadd.f32 -0.0013888889, %v1393_v49  ;;  %v501_v40 = vand.u32 2147483647, %v373_v2 }
 0x22f   : > { %v2415_v20 = vmul.f32 %v2287_v10, %v2287_v10  ;;  %v1138_v51 = vmul.f32 %v1010_v23, %v4824_v58  ;;  %v883_v37 = vmul.f32 2.0876756e-09, %v4842_v45  ;;  %v628_v52 = vmin.f32 %v500_v0, 1.5707964 }
 0x230   : > { %v2160_v36 = vmul.f32 %v2032_v48, %v4779_v56  ;;  %v1649_v6 = vmul.f32 %v1521_v46, %v4802_v15  ;;  %v374_v14 = vmul.f32 0.31415927, %v4845_v13  ;;  %vm2544_vm6 = vcmp.ge.f32.partialorder %v4755_v8, 5.0 }
 0x231   : > { %v2671_v21 = vsel %vm2543_vm5, 0.0, %v2415_v20  ;;  %v1266_v33 = vadd.f32 2.4801588e-05, %v1138_v51  ;;  %v1011_v50 = vadd.f32 -2.755732e-07, %v883_v37  ;;  %v4859_v1 = vmul.f32 %v628_v52, %v628_v52 }
 0x232   : > { %2799 = vst [vmem:[%s3321_s17 + $0x328] sm:$0xff] %v2671_v21  ;;  %v2288_v63 = vadd.f32 1.0, %v2160_v36  ;;  %v1777_v62 = vadd.f32 0.041666668, %v1649_v6  ;;  %v629_v25 = vmin.f32 %v501_v40, 1.5707964 }
 0x233   : > { %v1394_v56 = vmul.f32 %v1266_v33, %v4824_v58  ;;  %v1139_v42 = vmul.f32 %v1011_v50, %v4842_v45  ;;  %v502_v54 = vand.u32 2147483647, %v374_v14  ;;  %v375_v7 = vmul.f32 0.31415927, %v4855_v19  ;;  %v4900_v50 = vld [vmem:[%s3208_s30 + $0x378] sm:$0xff] }
 0x234   : > { %v2416_v22 = vmul.f32 %v2288_v63, %v2288_v63  ;;  %v1905_v39 = vmul.f32 %v1777_v62, %v4802_v15  ;;  %v884_v61 = vmul.f32 2.0876756e-09, %v4859_v1  ;;  %v4866_v24 = vmul.f32 %v629_v25, %v629_v25 }
 0x235   : > { %v1522_v35 = vadd.f32 -0.0013888889, %v1394_v56  ;;  %v1267_v16 = vadd.f32 2.4801588e-05, %v1139_v42  ;;  %v630_v11 = vmin.f32 %v502_v54, 1.5707964 }
 0x236   : > { %v2672_v59 = vsel %vm2544_vm6, 0.0, %v2416_v22  ;;  %v2033_v57 = vadd.f32 -0.5, %v1905_v39  ;;  %v1012_v38 = vadd.f32 -2.755732e-07, %v884_v61  ;;  %v885_v26 = vmul.f32 2.0876756e-09, %v4866_v24 }
 0x237   : > { %2800 = vst [vmem:[%s3321_s17 + $0x330] sm:$0xff] %v2672_v59  ;;  %v1650_v29 = vmul.f32 %v1522_v35, %v4824_v58  ;;  %v1395_v53 = vmul.f32 %v1267_v16, %v4842_v45  ;;  %v4874_v44 = vmul.f32 %v630_v11, %v630_v11  ;;  %v503_v30 = vand.u32 2147483647, %v375_v7 }
 0x238   : > { %v2161_v28 = vmul.f32 %v2033_v57, %v4802_v15  ;;  %vm2545_vm7 = vcmp.ge.f32.partialorder %v4772_v43, 5.0  ;;  %v1140_v34 = vmul.f32 %v1012_v38, %v4859_v1  ;;  %v1013_v8 = vadd.f32 -2.755732e-07, %v885_v26 }
 0x239   : > { %v1778_v32 = vadd.f32 0.041666668, %v1650_v29  ;;  %v1523_v5 = vadd.f32 -0.0013888889, %v1395_v53  ;;  %v886_v27 = vmul.f32 2.0876756e-09, %v4874_v44 }
 0x23a   : > { %v2289_v47 = vadd.f32 1.0, %v2161_v28  ;;  %vm2546_vm8 = vcmp.ge.f32.partialorder %v4799_v18, 5.0  ;;  %v1268_v55 = vadd.f32 2.4801588e-05, %v1140_v34  ;;  %v1141_v60 = vmul.f32 %v1013_v8, %v4866_v24 }
 0x23b   : > { %v631_v3 = vmin.f32 %v503_v30, 1.5707964  ;;  %v1906_v15 = vmul.f32 %v1778_v32, %v4824_v58  ;;  %v1651_v49 = vmul.f32 %v1523_v5, %v4842_v45  ;;  %v1014_v31 = vadd.f32 -2.755732e-07, %v886_v27  ;;  %v4920_v5 = vld [vmem:[%s3208_s30 + $0x380] sm:$0xff] }
 0x23c   : > { %v376_v2 = vmul.f32 0.31415927, %v4880_v41  ;;  %v2417_v4 = vmul.f32 %v2289_v47, %v2289_v47  ;;  %v1396_v10 = vmul.f32 %v1268_v55, %v4859_v1  ;;  %v1269_v23 = vadd.f32 2.4801588e-05, %v1141_v60 }
 0x23d   : > { %v4889_v48 = vmul.f32 %v631_v3, %v631_v3  ;;  %v2034_v46 = vadd.f32 -0.5, %v1906_v15  ;;  %v1779_v0 = vadd.f32 0.041666668, %v1651_v49  ;;  %v1142_v20 = vmul.f32 %v1014_v31, %v4874_v44 }
 0x23e   : > { %v504_v51 = vand.u32 2147483647, %v376_v2  ;;  %v2673_v37 = vsel %vm2545_vm7, 0.0, %v2417_v4  ;;  %v1524_v40 = vadd.f32 -0.0013888889, %v1396_v10  ;;  %v1397_v36 = vmul.f32 %v1269_v23, %v4866_v24 }
 0x23f   : > { %v887_v6 = vmul.f32 2.0876756e-09, %v4889_v48  ;;  %2801 = vst [vmem:[%s3321_s17 + $0x338] sm:$0xff] %v2673_v37  ;;  %v2162_v52 = vmul.f32 %v2034_v46, %v4824_v58  ;;  %v1907_v14 = vmul.f32 %v1779_v0, %v4842_v45  ;;  %v1270_v21 = vadd.f32 2.4801588e-05, %v1142_v20  ;;  %v4936_v0 = vld [vmem:[%s3208_s30 + $0x388] sm:$0xff] }
 0x240   : > { %v632_v33 = vmin.f32 %v504_v51, 1.5707964  ;;  %vm2547_vm9 = vcmp.ge.f32.partialorder %v4811_v9, 5.0  ;;  %v1652_v63 = vmul.f32 %v1524_v40, %v4859_v1  ;;  %v1525_v43 = vadd.f32 -0.0013888889, %v1397_v36 }
 0x241   : > { %v1015_v62 = vadd.f32 -2.755732e-07, %v887_v6  ;;  %v2290_v25 = vadd.f32 1.0, %v2162_v52  ;;  %v2035_v56 = vadd.f32 -0.5, %v1907_v14  ;;  %v1398_v42 = vmul.f32 %v1270_v21, %v4874_v44 }
 0x242   : > { %v4905_v54 = vmul.f32 %v632_v33, %v632_v33  ;;  %v1780_v7 = vadd.f32 0.041666668, %v1652_v63  ;;  %v1653_v58 = vmul.f32 %v1525_v43, %v4866_v24  ;;  %v377_v39 = vmul.f32 0.31415927, %v4900_v50 }
 0x243   : > { %v1143_v22 = vmul.f32 %v1015_v62, %v4889_v48  ;;  %v2418_v61 = vmul.f32 %v2290_v25, %v2290_v25  ;;  %v2163_v35 = vmul.f32 %v2035_v56, %v4842_v45  ;;  %v1526_v16 = vadd.f32 -0.0013888889, %v1398_v42 }
 0x244   : > { %v888_v11 = vmul.f32 2.0876756e-09, %v4905_v54  ;;  %v1908_v59 = vmul.f32 %v1780_v7, %v4859_v1  ;;  %v1781_v57 = vadd.f32 0.041666668, %v1653_v58  ;;  %v505_v26 = vand.u32 2147483647, %v377_v39 }
 0x245   : > { %v1271_v38 = vadd.f32 2.4801588e-05, %v1143_v22  ;;  %v2674_v29 = vsel %vm2546_vm8, 0.0, %v2418_v61  ;;  %v2291_v53 = vadd.f32 1.0, %v2163_v35  ;;  %v1654_v30 = vmul.f32 %v1526_v16, %v4874_v44  ;;  %v4951_v7 = vld [vmem:[%s3208_s30 + $0x390] sm:$0xff] }
 0x246   : > { %v1016_v28 = vadd.f32 -2.755732e-07, %v888_v11  ;;  %2802 = vst [vmem:[%s3321_s17 + $0x340] sm:$0xff] %v2674_v29  ;;  %v2036_v34 = vadd.f32 -0.5, %v1908_v59  ;;  %v1909_v45 = vmul.f32 %v1781_v57, %v4866_v24  ;;  %v633_v32 = vmin.f32 %v505_v26, 1.5707964 }
 0x247   : > { %v1399_v8 = vmul.f32 %v1271_v38, %v4889_v48  ;;  %v2419_v27 = vmul.f32 %v2291_v53, %v2291_v53  ;;  %vm2548_vm10 = vcmp.ge.f32.partialorder %v4827_v12, 5.0  ;;  %v1782_v18 = vadd.f32 0.041666668, %v1654_v30  ;;  %v4963_v57 = vld [vmem:[%s3208_s30 + $0x398] sm:$0xff]  ;;  %v4969_v53 = vld [vmem:[%s3208_s30 + $0x3a0] sm:$0xff] }
 0x248   : > { %v1144_v47 = vmul.f32 %v1016_v28, %v4905_v54  ;;  %v2164_v55 = vmul.f32 %v2036_v34, %v4859_v1  ;;  %v2037_v60 = vadd.f32 -0.5, %v1909_v45  ;;  %v4925_v15 = vmul.f32 %v633_v32, %v633_v32 }
 0x249   : > { %v1527_v3 = vadd.f32 -0.0013888889, %v1399_v8  ;;  %v2675_v49 = vsel %vm2547_vm9, 0.0, %v2419_v27  ;;  %v1910_v31 = vmul.f32 %v1782_v18, %v4874_v44  ;;  %v378_v4 = vmul.f32 0.31415927, %v4920_v5 }
 0x24a   : > { %v1272_v2 = vadd.f32 2.4801588e-05, %v1144_v47  ;;  %2803 = vst [vmem:[%s3321_s17 + $0x348] sm:$0xff] %v2675_v49  ;;  %v2292_v10 = vadd.f32 1.0, %v2164_v55  ;;  %v2165_v23 = vmul.f32 %v2037_v60, %v4866_v24  ;;  %v889_v1 = vmul.f32 2.0876756e-09, %v4925_v15 }
 0x24b   : > { %v1655_v46 = vmul.f32 %v1527_v3, %v4889_v48  ;;  %vm2549_vm11 = vcmp.ge.f32.partialorder %v4830_v17, 5.0  ;;  %v2038_v9 = vadd.f32 -0.5, %v1910_v31  ;;  %v506_v51 = vand.u32 2147483647, %v378_v4 }
 0x24c   : > { %v1400_v20 = vmul.f32 %v1272_v2, %v4905_v54  ;;  %v2420_v37 = vmul.f32 %v2292_v10, %v2292_v10  ;;  %v2293_v40 = vadd.f32 1.0, %v2165_v23  ;;  %v1017_v6 = vadd.f32 -2.755732e-07, %v889_v1 }
 0x24d   : > { %v1783_v36 = vadd.f32 0.041666668, %v1655_v46  ;;  %v2166_v24 = vmul.f32 %v2038_v9, %v4874_v44  ;;  %v634_v14 = vmin.f32 %v506_v51, 1.5707964  ;;  %v379_v21 = vmul.f32 0.31415927, %v4936_v0 }
 0x24e   : > { %v1528_v52 = vadd.f32 -0.0013888889, %v1400_v20  ;;  %v2676_v33 = vsel %vm2548_vm10, 0.0, %v2420_v37  ;;  %v2421_v63 = vmul.f32 %v2293_v40, %v2293_v40  ;;  %v1145_v62 = vmul.f32 %v1017_v6, %v4925_v15  ;;  %v4987_v51 = vld [vmem:[%s3208_s30 + $0x3a8] sm:$0xff] }
 0x24f   : > { %v1911_v43 = vmul.f32 %v1783_v36, %v4889_v48  ;;  %2804 = vst [vmem:[%s3321_s17 + $0x350] sm:$0xff] %v2676_v33  ;;  %v2294_v25 = vadd.f32 1.0, %v2166_v24  ;;  %v4948_v42 = vmul.f32 %v634_v14, %v634_v14  ;;  %v507_v44 = vand.u32 2147483647, %v379_v21 }
 0x250   : > { %v1656_v56 = vmul.f32 %v1528_v52, %v4905_v54  ;;  %v2677_v58 = vsel %vm2549_vm11, 0.0, %v2421_v63  ;;  %vm2550_vm12 = vcmp.ge.f32.partialorder %v4845_v13, 5.0  ;;  %v1273_v22 = vadd.f32 2.4801588e-05, %v1145_v62 }
 0x251   : > { %v2039_v12 = vadd.f32 -0.5, %v1911_v43  ;;  %2805 = vst [vmem:[%s3321_s17 + $0x358] sm:$0xff] %v2677_v58  ;;  %v2422_v39 = vmul.f32 %v2294_v25, %v2294_v25  ;;  %v890_v35 = vmul.f32 2.0876756e-09, %v4948_v42  ;;  %v635_v16 = vmin.f32 %v507_v44, 1.5707964 }
 0x252   : > { %v1784_v61 = vadd.f32 0.041666668, %v1656_v56  ;;  %vm2551_vm13 = vcmp.ge.f32.partialorder %v4855_v19, 5.0  ;;  %v1401_v59 = vmul.f32 %v1273_v22, %v4925_v15  ;;  %v380_v17 = vmul.f32 0.31415927, %v4951_v7  ;;  %v5007_v22 = vld [vmem:[%s3208_s30 + $0x3b0] sm:$0xff] }
 0x253   : > { %v2167_v11 = vmul.f32 %v2039_v12, %v4889_v48  ;;  %v2678_v13 = vsel %vm2550_vm12, 0.0, %v2422_v39  ;;  %v1018_v26 = vadd.f32 -2.755732e-07, %v890_v35  ;;  %v4966_v29 = vmul.f32 %v635_v16, %v635_v16 }
 0x254   : > { %v1912_v38 = vmul.f32 %v1784_v61, %v4905_v54  ;;  %2806 = vst [vmem:[%s3321_s17 + $0x360] sm:$0xff] %v2678_v13  ;;  %vm2552_vm14 = vcmp.ge.f32.partialorder %v4880_v41, 5.0  ;;  %v1529_v48 = vadd.f32 -0.0013888889, %v1401_v59  ;;  %v508_v28 = vand.u32 2147483647, %v380_v17 }
 0x255   : > { %v2295_v30 = vadd.f32 1.0, %v2167_v11  ;;  %v1146_v45 = vmul.f32 %v1018_v26, %v4948_v42  ;;  %v891_v8 = vmul.f32 2.0876756e-09, %v4966_v29  ;;  %v381_v32 = vmul.f32 0.31415927, %v4963_v57 }
 0x256   : > { %v2040_v34 = vadd.f32 -0.5, %v1912_v38  ;;  %v1657_v18 = vmul.f32 %v1529_v48, %v4925_v15  ;;  %v636_v47 = vmin.f32 %v508_v28, 1.5707964  ;;  %v382_v55 = vmul.f32 0.31415927, %v4969_v53 }
 0x257   : > { %v2423_v27 = vmul.f32 %v2295_v30, %v2295_v30  ;;  %v1274_v3 = vadd.f32 2.4801588e-05, %v1146_v45  ;;  %v1019_v49 = vadd.f32 -2.755732e-07, %v891_v8  ;;  %v509_v31 = vand.u32 2147483647, %v381_v32 }
 0x258   : > { %v2168_v60 = vmul.f32 %v2040_v34, %v4905_v54  ;;  %v1785_v4 = vadd.f32 0.041666668, %v1657_v18  ;;  %v4981_v10 = vmul.f32 %v636_v47, %v636_v47  ;;  %v510_v23 = vand.u32 2147483647, %v382_v55  ;;  %v5019_v32 = vld [vmem:[%s3208_s30 + $0x3b8] sm:$0xff] }
 0x259   : > { %v2679_v2 = vsel %vm2551_vm13, 0.0, %v2423_v27  ;;  %v1402_v1 = vmul.f32 %v1274_v3, %v4948_v42  ;;  %v1147_v9 = vmul.f32 %v1019_v49, %v4966_v29  ;;  %v637_v20 = vmin.f32 %v509_v31, 1.5707964 }
 0x25a   : > { %2807 = vst [vmem:[%s3321_s17 + $0x368] sm:$0xff] %v2679_v2  ;;  %v2296_v46 = vadd.f32 1.0, %v2168_v60  ;;  %v1913_v54 = vmul.f32 %v1785_v4, %v4925_v15  ;;  %vm2553_vm15 = vcmp.ge.f32.partialorder %v4900_v50, 5.0  ;;  %v892_v19 = vmul.f32 2.0876756e-09, %v4981_v10 }
 0x25b   : > { %v638_v37 = vmin.f32 %v510_v23, 1.5707964  ;;  %v1530_v36 = vadd.f32 -0.0013888889, %v1402_v1  ;;  %v1275_v6 = vadd.f32 2.4801588e-05, %v1147_v9  ;;  %v4992_v24 = vmul.f32 %v637_v20, %v637_v20 }
 0x25c   : > { %v2424_v40 = vmul.f32 %v2296_v46, %v2296_v46  ;;  %v2041_v52 = vadd.f32 -0.5, %v1913_v54  ;;  %v1020_v14 = vadd.f32 -2.755732e-07, %v892_v19  ;;  %v383_v33 = vmul.f32 0.31415927, %v4987_v51 }
 0x25d   : > { %v4994_v21 = vmul.f32 %v638_v37, %v638_v37  ;;  %v1658_v43 = vmul.f32 %v1530_v36, %v4948_v42  ;;  %v1403_v62 = vmul.f32 %v1275_v6, %v4966_v29  ;;  %v893_v25 = vmul.f32 2.0876756e-09, %v4992_v24 }
 0x25e   : > { %v2680_v63 = vsel %vm2552_vm14, 0.0, %v2424_v40  ;;  %v2169_v56 = vmul.f32 %v2041_v52, %v4925_v15  ;;  %v1148_v44 = vmul.f32 %v1020_v14, %v4981_v10  ;;  %v511_v12 = vand.u32 2147483647, %v383_v33 }
 0x25f   : > { %2808 = vst [vmem:[%s3321_s17 + $0x370] sm:$0xff] %v2680_v63  ;;  %v894_v58 = vmul.f32 2.0876756e-09, %v4994_v21  ;;  %v1786_v39 = vadd.f32 0.041666668, %v1658_v43  ;;  %vm2554_vm0 = vcmp.ge.f32.partialorder %v4920_v5, 5.0 }
 0x260   : > { %v1531_v61 = vadd.f32 -0.0013888889, %v1403_v62  ;;  %v1021_v41 = vadd.f32 -2.755732e-07, %v893_v25  ;;  %v2297_v35 = vadd.f32 1.0, %v2169_v56  ;;  %vm2555_vm1 = vcmp.ge.f32.partialorder %v4936_v0, 5.0 }
 0x261   : > { %v1276_v16 = vadd.f32 2.4801588e-05, %v1148_v44  ;;  %v1022_v11 = vadd.f32 -2.755732e-07, %v894_v58  ;;  %v1914_v59 = vmul.f32 %v1786_v39, %v4948_v42  ;;  %v639_v13 = vmin.f32 %v511_v12, 1.5707964 }
 0x262   : > { %v1659_v15 = vmul.f32 %v1531_v61, %v4966_v29  ;;  %v1149_v17 = vmul.f32 %v1021_v41, %v4992_v24  ;;  %v2425_v38 = vmul.f32 %v2297_v35, %v2297_v35  ;;  %v384_v48 = vmul.f32 0.31415927, %v5007_v22  ;;  %v5040_v63 = vld [vmem:[%s3208_s30 + $0x3c0] sm:$0xff] }
 0x263   : > { %v1404_v26 = vmul.f32 %v1276_v16, %v4981_v10  ;;  %v1150_v30 = vmul.f32 %v1022_v11, %v4994_v21  ;;  %v2042_v28 = vadd.f32 -0.5, %v1914_v59  ;;  %v5016_v8 = vmul.f32 %v639_v13, %v639_v13 }
 0x264   : > { %v1787_v34 = vadd.f32 0.041666668, %v1659_v15  ;;  %v1277_v45 = vadd.f32 2.4801588e-05, %v1149_v17  ;;  %v2681_v27 = vsel %vm2553_vm15, 0.0, %v2425_v38  ;;  %vm2556_vm2 = vcmp.ge.f32.partialorder %v4951_v7, 5.0 }
 0x265   : > { %v1532_v18 = vadd.f32 -0.0013888889, %v1404_v26  ;;  %v1278_v47 = vadd.f32 2.4801588e-05, %v1150_v30  ;;  %2809 = vst [vmem:[%s3321_s17 + $0x378] sm:$0xff] %v2681_v27  ;;  %v2170_v55 = vmul.f32 %v2042_v28, %v4948_v42  ;;  %vm2557_vm3 = vcmp.ge.f32.partialorder %v4963_v57, 5.0 }
 0x266   : > { %v1915_v60 = vmul.f32 %v1787_v34, %v4966_v29  ;;  %v1405_v3 = vmul.f32 %v1277_v45, %v4992_v24  ;;  %v895_v49 = vmul.f32 2.0876756e-09, %v5016_v8  ;;  %v512_v4 = vand.u32 2147483647, %v384_v48 }
 0x267   : > { %v1660_v31 = vmul.f32 %v1532_v18, %v4981_v10  ;;  %v1406_v2 = vmul.f32 %v1278_v47, %v4994_v21  ;;  %v385_v50 = vmul.f32 0.31415927, %v5019_v32  ;;  %v2298_v23 = vadd.f32 1.0, %v2170_v55  ;;  %v5064_v47 = vld [vmem:[%s3208_s30 + $0x3c8] sm:$0xff]  ;;  %v5067_v55 = vld [vmem:[%s3208_s30 + $0x3d0] sm:$0xff] }
 0x268   : > { %v2043_v46 = vadd.f32 -0.5, %v1915_v60  ;;  %v1533_v1 = vadd.f32 -0.0013888889, %v1405_v3  ;;  %v1023_v9 = vadd.f32 -2.755732e-07, %v895_v49  ;;  %vm2558_vm4 = vcmp.ge.f32.partialorder %v4969_v53, 5.0 }
 0x269   : > { %v1788_v20 = vadd.f32 0.041666668, %v1660_v31  ;;  %v1534_v42 = vadd.f32 -0.0013888889, %v1406_v2  ;;  %v640_v54 = vmin.f32 %v512_v4, 1.5707964  ;;  %v2426_v19 = vmul.f32 %v2298_v23, %v2298_v23 }
 0x26a   : > { %v2171_v37 = vmul.f32 %v2043_v46, %v4966_v29  ;;  %v1661_v40 = vmul.f32 %v1533_v1, %v4992_v24  ;;  %v1151_v36 = vmul.f32 %v1023_v9, %v5016_v8  ;;  %v513_v33 = vand.u32 2147483647, %v385_v50  ;;  %v5080_v1 = vld [vmem:[%s3208_s30 + $0x3d8] sm:$0xff] }
 0x26b   : > { %v1916_v6 = vmul.f32 %v1788_v20, %v4981_v10  ;;  %v1662_v52 = vmul.f32 %v1534_v42, %v4994_v21  ;;  %v5037_v14 = vmul.f32 %v640_v54, %v640_v54  ;;  %v2682_v43 = vsel %vm2554_vm0, 0.0, %v2426_v19 }
 0x26c   : > { %v2299_v62 = vadd.f32 1.0, %v2171_v37  ;;  %v1789_v25 = vadd.f32 0.041666668, %v1661_v40  ;;  %v1279_v56 = vadd.f32 2.4801588e-05, %v1151_v36  ;;  %2810 = vst [vmem:[%s3321_s17 + $0x380] sm:$0xff] %v2682_v43 }
 0x26d   : > { %v2044_v29 = vadd.f32 -0.5, %v1916_v6  ;;  %v1790_v44 = vadd.f32 0.041666668, %v1662_v52  ;;  %v896_v58 = vmul.f32 2.0876756e-09, %v5037_v14  ;;  %vm2559_vm5 = vcmp.ge.f32.partialorder %v4987_v51, 5.0 }
 0x26e   : > { %v2427_v12 = vmul.f32 %v2299_v62, %v2299_v62  ;;  %v1917_v39 = vmul.f32 %v1789_v25, %v4992_v24  ;;  %v1407_v61 = vmul.f32 %v1279_v56, %v5016_v8  ;;  %v641_v41 = vmin.f32 %v513_v33, 1.5707964  ;;  %v5094_v56 = vld [vmem:[%s3208_s30 + $0x3e0] sm:$0xff] }
 0x26f   : > { %v2172_v5 = vmul.f32 %v2044_v29, %v4981_v10  ;;  %v1918_v35 = vmul.f32 %v1790_v44, %v4994_v21  ;;  %v1024_v16 = vadd.f32 -2.755732e-07, %v896_v58  ;;  %v386_v11 = vmul.f32 0.31415927, %v5040_v63 }
 0x270   : > { %v2683_v59 = vsel %vm2555_vm1, 0.0, %v2427_v12  ;;  %v2045_v15 = vadd.f32 -0.5, %v1917_v39  ;;  %v1535_v17 = vadd.f32 -0.0013888889, %v1407_v61  ;;  %v5054_v13 = vmul.f32 %v641_v41, %v641_v41 }
 0x271   : > { %2811 = vst [vmem:[%s3321_s17 + $0x388] sm:$0xff] %v2683_v59  ;;  %v2300_v38 = vadd.f32 1.0, %v2172_v5  ;;  %v2046_v26 = vadd.f32 -0.5, %v1918_v35  ;;  %v1152_v30 = vmul.f32 %v1024_v16, %v5037_v14  ;;  %v514_v10 = vand.u32 2147483647, %v386_v11 }
 0x272   : > { %v2173_v48 = vmul.f32 %v2045_v15, %v4992_v24  ;;  %v1663_v28 = vmul.f32 %v1535_v17, %v5016_v8  ;;  %v897_v0 = vmul.f32 2.0876756e-09, %v5054_v13  ;;  %v387_v46 = vmul.f32 0.31415927, %v5064_v47 }
 0x273   : > { %v2428_v34 = vmul.f32 %v2300_v38, %v2300_v38  ;;  %v2174_v45 = vmul.f32 %v2046_v26, %v4994_v21  ;;  %v1280_v27 = vadd.f32 2.4801588e-05, %v1152_v30  ;;  %v642_v18 = vmin.f32 %v514_v10, 1.5707964  ;;  %v5110_v30 = vld [vmem:[%s3208_s30 + $0x3e8] sm:$0xff] }
 0x274   : > { %v2301_v60 = vadd.f32 1.0, %v2173_v48  ;;  %v1791_v24 = vadd.f32 0.041666668, %v1663_v28  ;;  %v1025_v3 = vadd.f32 -2.755732e-07, %v897_v0  ;;  %vm2560_vm6 = vcmp.ge.f32.partialorder %v5007_v22, 5.0 }
 0x275   : > { %v2684_v49 = vsel %vm2556_vm2, 0.0, %v2428_v34  ;;  %v2302_v31 = vadd.f32 1.0, %v2174_v45  ;;  %v1408_v2 = vmul.f32 %v1280_v27, %v5037_v14  ;;  %v5073_v21 = vmul.f32 %v642_v18, %v642_v18 }
 0x276   : > { %2812 = vst [vmem:[%s3321_s17 + $0x390] sm:$0xff] %v2684_v49  ;;  %v2429_v4 = vmul.f32 %v2301_v60, %v2301_v60  ;;  %v1919_v50 = vmul.f32 %v1791_v24, %v5016_v8  ;;  %v1153_v23 = vmul.f32 %v1025_v3, %v5054_v13  ;;  %v388_v42 = vmul.f32 0.31415927, %v5067_v55 }
 0x277   : > { %v2430_v9 = vmul.f32 %v2302_v31, %v2302_v31  ;;  %v1536_v7 = vadd.f32 -0.0013888889, %v1408_v2  ;;  %v898_v20 = vmul.f32 2.0876756e-09, %v5073_v21  ;;  %v515_v40 = vand.u32 2147483647, %v387_v46 }
 0x278   : > { %v2685_v54 = vsel %vm2557_vm3, 0.0, %v2429_v4  ;;  %v2047_v19 = vadd.f32 -0.5, %v1919_v50  ;;  %v1281_v37 = vadd.f32 2.4801588e-05, %v1153_v23  ;;  %v516_v33 = vand.u32 2147483647, %v388_v42 }
 0x279   : > { %2813 = vst [vmem:[%s3321_s17 + $0x398] sm:$0xff] %v2685_v54  ;;  %v2686_v36 = vsel %vm2558_vm4, 0.0, %v2430_v9  ;;  %v1664_v6 = vmul.f32 %v1536_v7, %v5037_v14  ;;  %v1026_v52 = vadd.f32 -2.755732e-07, %v898_v20  ;;  %v643_v25 = vmin.f32 %v515_v40, 1.5707964 }
 0x27a   : > { %2814 = vst [vmem:[%s3321_s17 + $0x3a0] sm:$0xff] %v2686_v36  ;;  %v2175_v43 = vmul.f32 %v2047_v19, %v5016_v8  ;;  %v1409_v62 = vmul.f32 %v1281_v37, %v5054_v13  ;;  %v644_v44 = vmin.f32 %v516_v33, 1.5707964  ;;  %v389_v58 = vmul.f32 0.31415927, %v5080_v1 }
 0x27b   : > { %v1792_v57 = vadd.f32 0.041666668, %v1664_v6  ;;  %v1154_v29 = vmul.f32 %v1026_v52, %v5073_v21  ;;  %v5099_v39 = vmul.f32 %v643_v25, %v643_v25  ;;  %v390_v59 = vmul.f32 0.31415927, %v5094_v56 }
 0x27c   : > { %v2303_v53 = vadd.f32 1.0, %v2175_v43  ;;  %v1537_v12 = vadd.f32 -0.0013888889, %v1409_v62  ;;  %v5102_v41 = vmul.f32 %v644_v44, %v644_v44  ;;  %v517_v5 = vand.u32 2147483647, %v389_v58  ;;  %v5135_v43 = vld [vmem:[%s3208_s30 + $0x3f0] sm:$0xff] }
 0x27d   : > { %v1920_v8 = vmul.f32 %v1792_v57, %v5037_v14  ;;  %v1282_v61 = vadd.f32 2.4801588e-05, %v1154_v29  ;;  %v899_v11 = vmul.f32 2.0876756e-09, %v5099_v39  ;;  %v518_v24 = vand.u32 2147483647, %v390_v59 }
 0x27e   : > { %v2431_v35 = vmul.f32 %v2303_v53, %v2303_v53  ;;  %v1665_v16 = vmul.f32 %v1537_v12, %v5054_v13  ;;  %v900_v38 = vmul.f32 2.0876756e-09, %v5102_v41  ;;  %v645_v26 = vmin.f32 %v517_v5, 1.5707964 }
 0x27f   : > { %v2048_v15 = vadd.f32 -0.5, %v1920_v8  ;;  %v1410_v17 = vmul.f32 %v1282_v61, %v5073_v21  ;;  %v1027_v28 = vadd.f32 -2.755732e-07, %v899_v11  ;;  %v391_v3 = vmul.f32 0.31415927, %v5110_v30  ;;  %v5147_v11 = vld [vmem:[%s3208_s30 + $0x3f8] sm:$0xff] }
 0x280   : > { %v2687_v10 = vsel %vm2559_vm5, 0.0, %v2431_v35  ;;  %v1793_v48 = vadd.f32 0.041666668, %v1665_v16  ;;  %v1028_v45 = vadd.f32 -2.755732e-07, %v900_v38  ;;  %v5116_v27 = vmul.f32 %v645_v26, %v645_v26 }
 0x281   : > { %2815 = vst [vmem:[%s3321_s17 + $0x3a8] sm:$0xff] %v2687_v10  ;;  %v2176_v0 = vmul.f32 %v2048_v15, %v5037_v14  ;;  %v1538_v34 = vadd.f32 -0.0013888889, %v1410_v17  ;;  %v1155_v60 = vmul.f32 %v1027_v28, %v5099_v39  ;;  %v646_v50 = vmin.f32 %v518_v24, 1.5707964 }
 0x282   : > { %v1921_v18 = vmul.f32 %v1793_v48, %v5054_v13  ;;  %v1156_v31 = vmul.f32 %v1028_v45, %v5102_v41  ;;  %v901_v2 = vmul.f32 2.0876756e-09, %v5116_v27  ;;  %v519_v19 = vand.u32 2147483647, %v391_v3 }
 0x283   : > { %v2304_v49 = vadd.f32 1.0, %v2176_v0  ;;  %v1666_v51 = vmul.f32 %v1538_v34, %v5073_v21  ;;  %v1283_v4 = vadd.f32 2.4801588e-05, %v1155_v60  ;;  %v5127_v54 = vmul.f32 %v646_v50, %v646_v50 }
 0x284   : > { %v2049_v14 = vadd.f32 -0.5, %v1921_v18  ;;  %v1284_v9 = vadd.f32 2.4801588e-05, %v1156_v31  ;;  %v1029_v7 = vadd.f32 -2.755732e-07, %v901_v2  ;;  %vm2561_vm7 = vcmp.ge.f32.partialorder %v5019_v32, 5.0 }
 0x285   : > { %v2432_v23 = vmul.f32 %v2304_v49, %v2304_v49  ;;  %v1794_v46 = vadd.f32 0.041666668, %v1666_v51  ;;  %v1411_v42 = vmul.f32 %v1283_v4, %v5099_v39  ;;  %v902_v33 = vmul.f32 2.0876756e-09, %v5127_v54 }
 0x286   : > { %v2177_v20 = vmul.f32 %v2049_v14, %v5054_v13  ;;  %v1412_v22 = vmul.f32 %v1284_v9, %v5102_v41  ;;  %v1157_v36 = vmul.f32 %v1029_v7, %v5116_v27  ;;  %v647_v58 = vmin.f32 %v519_v19, 1.5707964 }
 0x287   : > { %v2688_v37 = vsel %vm2560_vm6, 0.0, %v2432_v23  ;;  %v1922_v40 = vmul.f32 %v1794_v46, %v5073_v21  ;;  %v1539_v52 = vadd.f32 -0.0013888889, %v1411_v42  ;;  %v1030_v44 = vadd.f32 -2.755732e-07, %v902_v33 }
 0x288   : > { %2816 = vst [vmem:[%s3321_s17 + $0x3b0] sm:$0xff] %v2688_v37  ;;  %v2305_v6 = vadd.f32 1.0, %v2177_v20  ;;  %v1540_v62 = vadd.f32 -0.0013888889, %v1412_v22  ;;  %v1285_v25 = vadd.f32 2.4801588e-05, %v1157_v36  ;;  %v5144_v16 = vmul.f32 %v647_v58, %v647_v58 }
 0x289   : > { %v2050_v13 = vadd.f32 -0.5, %v1922_v40  ;;  %v1667_v29 = vmul.f32 %v1539_v52, %v5099_v39  ;;  %v392_v61 = vmul.f32 0.31415927, %v5135_v43  ;;  %v1158_v35 = vmul.f32 %v1030_v44, %v5127_v54 }
 0x28a   : > { %v2433_v57 = vmul.f32 %v2305_v6, %v2305_v6  ;;  %v1668_v12 = vmul.f32 %v1540_v62, %v5102_v41  ;;  %v1413_v8 = vmul.f32 %v1285_v25, %v5116_v27  ;;  %vm2562_vm8 = vcmp.ge.f32.partialorder %v5040_v63, 5.0 }
 0x28b   : > { %v2178_v53 = vmul.f32 %v2050_v13, %v5073_v21  ;;  %v1795_v32 = vadd.f32 0.041666668, %v1667_v29  ;;  %v1286_v38 = vadd.f32 2.4801588e-05, %v1158_v35  ;;  %v903_v26 = vmul.f32 2.0876756e-09, %v5144_v16 }
 0x28c   : > { %v2689_v5 = vsel %vm2561_vm7, 0.0, %v2433_v57  ;;  %v1796_v15 = vadd.f32 0.041666668, %v1668_v12  ;;  %v1541_v21 = vadd.f32 -0.0013888889, %v1413_v8  ;;  %vm2563_vm9 = vcmp.ge.f32.partialorder %v5064_v47, 5.0 }
 0x28d   : > { %2817 = vst [vmem:[%s3321_s17 + $0x3b8] sm:$0xff] %v2689_v5  ;;  %v2306_v59 = vadd.f32 1.0, %v2178_v53  ;;  %v1923_v17 = vmul.f32 %v1795_v32, %v5099_v39  ;;  %v520_v10 = vand.u32 2147483647, %v392_v61  ;;  %v393_v34 = vmul.f32 0.31415927, %v5147_v11 }
 0x28e   : > { %v1924_v28 = vmul.f32 %v1796_v15, %v5102_v41  ;;  %v1669_v0 = vmul.f32 %v1541_v21, %v5116_v27  ;;  %v1414_v18 = vmul.f32 %v1286_v38, %v5127_v54  ;;  %v1031_v63 = vadd.f32 -2.755732e-07, %v903_v26 }
 0x28f   : > { %v2434_v48 = vmul.f32 %v2306_v59, %v2306_v59  ;;  %v2051_v45 = vadd.f32 -0.5, %v1923_v17  ;;  %v648_v60 = vmin.f32 %v520_v10, 1.5707964  ;;  %v521_v51 = vand.u32 2147483647, %v393_v34 }
 0x290   : > { %v2052_v3 = vadd.f32 -0.5, %v1924_v28  ;;  %v1797_v49 = vadd.f32 0.041666668, %v1669_v0  ;;  %v1542_v2 = vadd.f32 -0.0013888889, %v1414_v18  ;;  %v1159_v14 = vmul.f32 %v1031_v63, %v5144_v16 }
 0x291   : > { %v2690_v24 = vsel %vm2562_vm8, 0.0, %v2434_v48  ;;  %v2179_v31 = vmul.f32 %v2051_v45, %v5099_v39  ;;  %v5160_v4 = vmul.f32 %v648_v60, %v648_v60  ;;  %v649_v46 = vmin.f32 %v521_v51, 1.5707964 }
 0x292   : > { %2818 = vst [vmem:[%s3321_s17 + $0x3c0] sm:$0xff] %v2690_v24  ;;  %v2180_v50 = vmul.f32 %v2052_v3, %v5102_v41  ;;  %v1925_v23 = vmul.f32 %v1797_v49, %v5116_v27  ;;  %v1670_v7 = vmul.f32 %v1542_v2, %v5127_v54  ;;  %v1287_v20 = vadd.f32 2.4801588e-05, %v1159_v14 }
 0x293   : > { %v2307_v9 = vadd.f32 1.0, %v2179_v31  ;;  %v904_v42 = vmul.f32 2.0876756e-09, %v5160_v4  ;;  %vm2564_vm10 = vcmp.ge.f32.partialorder %v5067_v55, 5.0  ;;  %v777_v37 = vmul.f32 %v649_v46, %v649_v46 }
 0x294   : > { %v2308_v39 = vadd.f32 1.0, %v2180_v50  ;;  %v2053_v19 = vadd.f32 -0.5, %v1925_v23  ;;  %v1798_v22 = vadd.f32 0.041666668, %v1670_v7  ;;  %v1415_v41 = vmul.f32 %v1287_v20, %v5144_v16 }
 0x295   : > { %v2435_v40 = vmul.f32 %v2307_v9, %v2307_v9  ;;  %v1032_v36 = vadd.f32 -2.755732e-07, %v904_v42  ;;  %v905_v33 = vmul.f32 2.0876756e-09, %v777_v37  ;;  %vm2565_vm11 = vcmp.ge.f32.partialorder %v5080_v1, 5.0 }
 0x296   : > { %v2436_v6 = vmul.f32 %v2308_v39, %v2308_v39  ;;  %v2181_v52 = vmul.f32 %v2053_v19, %v5116_v27  ;;  %v1926_v62 = vmul.f32 %v1798_v22, %v5127_v54  ;;  %v1543_v25 = vadd.f32 -0.0013888889, %v1415_v41 }
 0x297   : > { %v2691_v13 = vsel %vm2563_vm9, 0.0, %v2435_v40  ;;  %v1160_v55 = vmul.f32 %v1032_v36, %v5160_v4  ;;  %v1033_v44 = vadd.f32 -2.755732e-07, %v905_v33  ;;  %vm2566_vm12 = vcmp.ge.f32.partialorder %v5094_v56, 5.0 }
 0x298   : > { %2819 = vst [vmem:[%s3321_s17 + $0x3c8] sm:$0xff] %v2691_v13  ;;  %v2692_v57 = vsel %vm2564_vm10, 0.0, %v2436_v6  ;;  %v2309_v29 = vadd.f32 1.0, %v2181_v52  ;;  %v2054_v58 = vadd.f32 -0.5, %v1926_v62  ;;  %v1671_v27 = vmul.f32 %v1543_v25, %v5144_v16 }
 0x299   : > { %2820 = vst [vmem:[%s3321_s17 + $0x3d0] sm:$0xff] %v2692_v57  ;;  %v1288_v53 = vadd.f32 2.4801588e-05, %v1160_v55  ;;  %v1161_v47 = vmul.f32 %v1033_v44, %v777_v37  ;;  %vm2567_vm13 = vcmp.ge.f32.partialorder %v5110_v30, 5.0  ;;  %vm2568_vm14 = vcmp.ge.f32.partialorder %v5135_v43, 5.0 }
 0x29a   : > { %v2437_v12 = vmul.f32 %v2309_v29, %v2309_v29  ;;  %v2182_v8 = vmul.f32 %v2054_v58, %v5127_v54  ;;  %v1799_v61 = vadd.f32 0.041666668, %v1671_v27  ;;  %vm2569_vm15 = vcmp.ge.f32.partialorder %v5147_v11, 5.0 }
 0x29b   : > { %v1416_v5 = vmul.f32 %v1288_v53, %v5160_v4  ;;  %v1289_v35 = vadd.f32 2.4801588e-05, %v1161_v47 }
 0x29c   : > { %v2693_v32 = vsel %vm2565_vm11, 0.0, %v2437_v12  ;;  %v2310_v59 = vadd.f32 1.0, %v2182_v8  ;;  %v1927_v15 = vmul.f32 %v1799_v61, %v5144_v16 }
 0x29d   : > { %2821 = vst [vmem:[%s3321_s17 + $0x3d8] sm:$0xff] %v2693_v32  ;;  %v1544_v21 = vadd.f32 -0.0013888889, %v1416_v5  ;;  %v1417_v1 = vmul.f32 %v1289_v35, %v777_v37 }
 0x29e   : > { %v2438_v17 = vmul.f32 %v2310_v59, %v2310_v59  ;;  %v2055_v38 = vadd.f32 -0.5, %v1927_v15 }
 0x29f   : > { %v1672_v26 = vmul.f32 %v1544_v21, %v5160_v4  ;;  %v1545_v54 = vadd.f32 -0.0013888889, %v1417_v1 }
 0x2a0   : > { %v2694_v10 = vsel %vm2566_vm12, 0.0, %v2438_v17  ;;  %v2183_v48 = vmul.f32 %v2055_v38, %v5144_v16 }
 0x2a1   : > { %v1800_v28 = vadd.f32 0.041666668, %v1672_v26  ;;  %2822 = vst [vmem:[%s3321_s17 + $0x3e0] sm:$0xff] %v2694_v10  ;;  %v1673_v0 = vmul.f32 %v1545_v54, %v777_v37 }
 0x2a2   : > { %v2311_v34 = vadd.f32 1.0, %v2183_v48 }
 0x2a3   : > { %v1928_v45 = vmul.f32 %v1800_v28, %v5160_v4  ;;  %v1801_v56 = vadd.f32 0.041666668, %v1673_v0 }
 0x2a4   : > { %v2439_v18 = vmul.f32 %v2311_v34, %v2311_v34 }
 0x2a5   : > { %v2056_v63 = vadd.f32 -0.5, %v1928_v45  ;;  %v1929_v60 = vmul.f32 %v1801_v56, %v777_v37 }
 0x2a6   : > { %v2695_v24 = vsel %vm2567_vm13, 0.0, %v2439_v18 }
 0x2a7   : > { %v2184_v3 = vmul.f32 %v2056_v63, %v5160_v4  ;;  %2823 = vst [vmem:[%s3321_s17 + $0x3e8] sm:$0xff] %v2695_v24  ;;  %v2057_v16 = vadd.f32 -0.5, %v1929_v60 }
 0x2a9   : > { %v2312_v49 = vadd.f32 1.0, %v2184_v3  ;;  %v2185_v51 = vmul.f32 %v2057_v16, %v777_v37 }
 0x2ab   : > { %v2440_v31 = vmul.f32 %v2312_v49, %v2312_v49  ;;  %v2313_v30 = vadd.f32 1.0, %v2185_v51 }
 0x2ad   : > { %v2696_v2 = vsel %vm2568_vm14, 0.0, %v2440_v31  ;;  %v2441_v14 = vmul.f32 %v2313_v30, %v2313_v30 }
 0x2ae   : > { %2824 = vst [vmem:[%s3321_s17 + $0x3f0] sm:$0xff] %v2696_v2 }
 0x2af   : > { %v2697_v43 = vsel %vm2569_vm15, 0.0, %v2441_v14 }
 0x2b0   : > { %2825 = vst [vmem:[%s3321_s17 + $0x3f8] sm:$0xff] %v2697_v43 }
 0x2b1   : > { %3027 = shalt.err (!%p3024_p2)
}
 0x2b2   : > { %s3028_s13 = scalar_lea.hbm %s5197_s2, 16384  ;;  %s3032_s20 = scalar_lea.hbm %s5246_s1, 32768 }
 0x2b3   : > { %p3029_p4 = scmp.ne.s32.totalorder %s5197_s2, %s3028_s13  ;;  %p3033_p9 = scmp.lt.u32.totalorder %s5197_s2, %s5246_s1 }
 0x2b4   : > { %p3034_p1 = scmp.lt.u32.totalorder %s3032_s20, %s3028_s13  ;;  %p3036_p6 = scmp.lt.u32.totalorder %s3028_s13, %s5197_s2 }
 0x2b5   : > { %p3030_p5 = pnand %p3029_p4, %p5253_p11 }
 0x2b6   : > { %p3035_p3 = por %p3034_p1, %p3033_p9 }
 0x2b7   : > { %p3031_p7 = pneg %p3030_p5 }
 0x2b8   : > { %p3037_p12 = por %p3036_p6, %p3035_p3 }
 0x2ba   : > { %p3038_p13 = pnand %p3037_p12, %p3031_p7 }
 0x2bc   : > { %3041 = shalt.err (!%p3038_p13)
}
 0x2bd   : > { %s3086_s24 = smov 512   ;;  %s3087_s26 = smov 32  }
 0x2be   : > { %2936 = dma.vmem_to_hbm [thread:$0]  (%p5253_p11), %s5200_s27, 16384, %s5197_s2, %s2827_s10, %s3086_s24, %s3086_s24, %s3087_s26  }
 0x2bf PF: > { %s2856_s30 = sand.u32 1, %s3068_s6   ;;  %p5254_p8 = scmp.ne.s32.totalorder %s5251_s19, 0 }
 0x2c0   : > { %p5255_p10 = scmp.ge.s32.totalorder %s3080_s9, 2  ;;  %s2857_s17 = scalar_lea.sflag [#allocation4], %s2856_s30 }
 0x2c2   : > { %p2943_p0 = pnand %p5255_p10, %p5254_p8 }
 0x2c4   : > { %3063 = dma.done.wait (!%p2943_p0), %s2857_s17, 16384  }
 0x2c5   : > { %3065 = vsyncadd (!%p2943_p0), %s2857_s17, 4294950912  ;;  %p14_p2 = scmp.ge.s32.totalorder %s3123_s12, 4   ;;  %s5256_s6 = smov %s3072_s7 }
 0x2c6   : > { %s5257_s7 = smov %s3076_s8  ;;  %s5258_s8 = smov %s3135_s15 }
 0x2c7   : > { %s5259_s9 = smov %s3123_s12  ;;  %16 = sbr.rel (!%p14_p2) target bundleno = 5 (0x5), region = 69 }
 0x2ce   :  { %2862 = vsyncpa [#allocation3], 1 }
 0x2cf   :  { %2864 = vsyncpa [#allocation3 + $0x1], 1 }
 0x2d0   :  { %2865 = vsyncpa [#allocation4], 1 }
 0x2d1   :  { %2867 = vsyncpa [#allocation4 + $0x1], 1 }

</bundles_post_ra>
